<compile_context>
chip_gen: v7x
topology: tpu7x:2x2x1
jax: 0.10.0
libtpu: 0.0.40
codegen_flags: <defaults>
</compile_context>

<pallas_src>
import math

import jax
import jax.numpy as jnp
from jax import lax
from jax.experimental import pallas as pl
from jax.experimental.pallas import tpu as pltpu

_EPS = 1e-4
_VMEM_LIMIT = 32 * 1024 * 1024   # explicit scoped-VMEM budget (fits v5e..v7x)


def _gelu_exact(x):
    return 0.5 * x * (1.0 + lax.erf(x * (1.0 / math.sqrt(2.0))))


def _conv3x3_from_padded(xpad, w_ref, th, w, cp):
    """xpad: (th+2, w+2, cp) f32 padded tile; w_ref: (3,3,cp,cp) HWIO weights.

    Returns the (th*w, cp) f32 conv output for the tile as 9 shifted MXU
    matmuls accumulated in f32.
    """
    acc = jnp.zeros((th * w, cp), jnp.float32)
    for kh in range(3):
        for kw in range(3):
            patch = xpad[kh:kh + th, kw:kw + w, :].reshape(th * w, cp)
            acc = acc + jnp.dot(patch, w_ref[kh, kw],
                                preferred_element_type=jnp.float32)
    return acc


def _write_stats(st_ref, vals):
    """Per-tile per-channel [sum, sum_sq] partials; row-sums on the MXU."""
    cp = vals.shape[-1]
    ones = jnp.ones((1, vals.shape[0]), jnp.float32)
    st_ref[:, :, 0:1, :] = jnp.dot(
        ones, vals, preferred_element_type=jnp.float32).reshape(1, 1, 1, cp)
    st_ref[:, :, 1:2, :] = jnp.dot(
        ones, vals * vals, preferred_element_type=jnp.float32).reshape(1, 1, 1, cp)


def _assemble_padded_tile(pad_ref, center, top, bot, th, w, cp):
    """Write the zero-padded (th+2, w+2, cp) tile; every region written once."""
    th2 = th + 2
    pad_ref[0:1, 1:w + 1, :] = top
    pad_ref[1:th + 1, 1:w + 1, :] = center
    pad_ref[th + 1:th + 2, 1:w + 1, :] = bot
    pad_ref[:, 0:1, :] = jnp.zeros((th2, 1, cp), jnp.float32)
    pad_ref[:, w + 1:w + 2, :] = jnp.zeros((th2, 1, cp), jnp.float32)


# ---------------- pass 1: conv1 + BN1 partial sums -------------------------
def _conv_stats_kernel(xc_ref, xt_ref, xb_ref, w_ref, y_ref, st_ref, pad_ref):
    th2, w2, cp = pad_ref.shape
    th, w = th2 - 2, w2 - 2
    r = pl.program_id(1)
    last = pl.num_programs(1) - 1

    top_keep = (r > 0).astype(jnp.float32)        # zero halo row at image top
    bot_keep = (r < last).astype(jnp.float32)     # zero halo row at image bottom
    top = xt_ref[0].astype(jnp.float32) * top_keep
    bot = xb_ref[0].astype(jnp.float32) * bot_keep
    center = xc_ref[0].astype(jnp.float32)

    _assemble_padded_tile(pad_ref, center, top, bot, th, w, cp)
    acc = _conv3x3_from_padded(pad_ref[...], w_ref, th, w, cp)

    y_ref[...] = acc.reshape(1, th, w, cp).astype(y_ref.dtype)
    _write_stats(st_ref, acc)


# ---------- pass 2: BN1-affine + GELU + conv2 + BN2 partial sums ------------
def _bn_gelu_conv_stats_kernel(yc_ref, yt_ref, yb_ref, sc_ref, sh_ref, w_ref,
                               z_ref, st_ref, pad_ref):
    th2, w2, cp = pad_ref.shape
    th, w = th2 - 2, w2 - 2
    r = pl.program_id(1)
    last = pl.num_programs(1) - 1

    sc = sc_ref[...].reshape(1, 1, cp)
    sh = sh_ref[...].reshape(1, 1, cp)

    def act(v):  # precomputed BN1 affine + exact GELU
        return _gelu_exact(v.astype(jnp.float32) * sc + sh)

    top_keep = (r > 0).astype(jnp.float32)
    bot_keep = (r < last).astype(jnp.float32)
    top = act(yt_ref[0]) * top_keep
    bot = act(yb_ref[0]) * bot_keep
    center = act(yc_ref[0])

    _assemble_padded_tile(pad_ref, center, top, bot, th, w, cp)
    acc = _conv3x3_from_padded(pad_ref[...], w_ref, th, w, cp)

    z_ref[...] = acc.reshape(1, th, w, cp).astype(z_ref.dtype)
    _write_stats(st_ref, acc)


# ---------------- pass 3: BN2 affine + residual add ------------------------
def _bn_residual_kernel(x_ref, z_ref, sc_ref, sh_ref, o_ref):
    cp = x_ref.shape[-1]
    sc = sc_ref[...].reshape(1, 1, 1, cp)
    sh = sh_ref[...].reshape(1, 1, 1, cp)
    o_ref[...] = (x_ref[...].astype(jnp.float32)
                  + z_ref[...].astype(jnp.float32) * sc + sh).astype(o_ref.dtype)


def _bn_affine_from_partials(stats, gamma, beta, count):
    """Fold per-tile [sum, sum_sq] partials into BN scale/shift (tiny glue)."""
    s = jnp.sum(stats, axis=(0, 1))                      # (2, Cp)
    mean = s[0] / count
    var = jnp.maximum(s[1] / count - mean * mean, 0.0)   # one-pass biased var
    inv = lax.rsqrt(var + _EPS)
    scale = gamma * inv
    shift = beta - mean * scale
    return scale.reshape(1, -1), shift.reshape(1, -1)


def conv_block(x_nchw, w1_oihw, g1, b1, w2_oihw, g2, b2, *, row_tile=8):
    """Pallas ConvBlock forward. x_nchw: (N, C, H, W) f32 -> (N, C, H, W)."""
    n, c, h, w = x_nchw.shape
    cp = ((c + 127) // 128) * 128                         # lane-dense channels
    th = row_tile if (h % row_tile == 0) else h           # row tile (with halo)
    rt = h // th

    # ---- glue: layout + channel padding (no spatial padding here) ----
    x = jnp.transpose(x_nchw, (0, 2, 3, 1)).astype(jnp.float32)        # NHWC
    if cp != c:
        x = jnp.pad(x, ((0, 0), (0, 0), (0, 0), (0, cp - c)))

    def prep_w(w_oihw):
        wh = jnp.transpose(w_oihw, (2, 3, 1, 0)).astype(jnp.float32)   # HWIO
        if cp != c:
            wh = jnp.pad(wh, ((0, 0), (0, 0), (0, cp - c), (0, cp - c)))
        return wh

    def prep_v(v):  # pad gamma/beta with zeros so dead channels stay exactly 0
        v = v.astype(jnp.float32)
        return jnp.pad(v, (0, cp - c)) if cp != c else v

    w1p, w2p = prep_w(w1_oihw), prep_w(w2_oihw)
    g1p, b1p, g2p, b2p = prep_v(g1), prep_v(b1), prep_v(g2), prep_v(b2)

    # ---- shared specs / params ----
    row_spec = pl.BlockSpec((1, th, w, cp), lambda i, r: (i, r, 0, 0))
    halo_top = pl.BlockSpec(
        (1, 1, w, cp), lambda i, r: (i, jnp.maximum(r * th - 1, 0), 0, 0))
    halo_bot = pl.BlockSpec(
        (1, 1, w, cp), lambda i, r: (i, jnp.minimum(r * th + th, h - 1), 0, 0))
    w_spec = pl.BlockSpec((3, 3, cp, cp), lambda i, r: (0, 0, 0, 0))
    vec_spec = pl.BlockSpec((1, cp), lambda i, r: (0, 0))
    st_spec = pl.BlockSpec((1, 1, 2, cp), lambda i, r: (i, r, 0, 0))
    cparams = pltpu.CompilerParams(
        dimension_semantics=("parallel", "parallel"),
        vmem_limit_bytes=_VMEM_LIMIT)
    scratch = [pltpu.VMEM((th + 2, w + 2, cp), jnp.float32)]
    count = n * h * w

    # ---- pass 1: conv1 + BN1 partials ----
    y1, st1 = pl.pallas_call(
        _conv_stats_kernel,
        out_shape=(jax.ShapeDtypeStruct((n, h, w, cp), jnp.float32),
                   jax.ShapeDtypeStruct((n, rt, 2, cp), jnp.float32)),
        grid=(n, rt),
        in_specs=[row_spec, halo_top, halo_bot, w_spec],
        out_specs=(row_spec, st_spec),
        scratch_shapes=scratch,
        compiler_params=cparams,
    )(x, x, x, w1p)

    scale1, shift1 = _bn_affine_from_partials(st1, g1p, b1p, count)

    # ---- pass 2: BN1 + GELU + conv2 + BN2 partials ----
    z, st2 = pl.pallas_call(
        _bn_gelu_conv_stats_kernel,
        out_shape=(jax.ShapeDtypeStruct((n, h, w, cp), jnp.float32),
                   jax.ShapeDtypeStruct((n, rt, 2, cp), jnp.float32)),
        grid=(n, rt),
        in_specs=[row_spec, halo_top, halo_bot, vec_spec, vec_spec, w_spec],
        out_specs=(row_spec, st_spec),
        scratch_shapes=scratch,
        compiler_params=cparams,
    )(y1, y1, y1, scale1, shift1, w2p)

    scale2, shift2 = _bn_affine_from_partials(st2, g2p, b2p, count)

    # ---- pass 3: BN2 affine + residual (elementwise, lane-dense store) ----
    out = pl.pallas_call(
        _bn_residual_kernel,
        out_shape=jax.ShapeDtypeStruct((n, h, w, cp), jnp.float32),
        grid=(n, rt),
        in_specs=[row_spec, row_spec, vec_spec, vec_spec],
        out_specs=row_spec,
        compiler_params=cparams,
    )(x, z, scale2, shift2)

    out = out[..., :c]                                    # drop channel padding
    return jnp.transpose(out, (0, 3, 1, 2))               # back to NCHW


def conv_block_reference(x, w1, g1, b1, w2, g2, b2):
    """Pure-JAX reference matching the PyTorch module (training-mode BN)."""
    def conv(v, wt):
        return lax.conv_general_dilated(
            v, wt, window_strides=(1, 1), padding="SAME",
            dimension_numbers=("NCHW", "OIHW", "NCHW"))

    def bn(v, g, b):
        mean = jnp.mean(v, axis=(0, 2, 3), keepdims=True)
        var = jnp.mean((v - mean) ** 2, axis=(0, 2, 3), keepdims=True)
        return ((v - mean) * lax.rsqrt(var + _EPS) * g.reshape(1, -1, 1, 1)
                + b.reshape(1, -1, 1, 1))

    y = _gelu_exact(bn(conv(x, w1), g1, b1))
    z = bn(conv(y, w2), g2, b2)
    return x + z


if __name__ == "__main__":
    N, C, H, W = 2, 8, 16, 16
    key = jax.random.PRNGKey(0)
    kx, kw1, kw2, kg1, kb1, kg2, kb2 = jax.random.split(key, 7)

    x = jax.random.normal(kx, (N, C, H, W), jnp.float32)
    w1 = jax.random.normal(kw1, (C, C, 3, 3), jnp.float32) * 0.1
    w2 = jax.random.normal(kw2, (C, C, 3, 3), jnp.float32) * 0.1
    g1 = 1.0 + 0.1 * jax.random.normal(kg1, (C,), jnp.float32)
    b1 = 0.1 * jax.random.normal(kb1, (C,), jnp.float32)
    g2 = 1.0 + 0.1 * jax.random.normal(kg2, (C,), jnp.float32)
    b2 = 0.1 * jax.random.normal(kb2, (C,), jnp.float32)

    fn = jax.jit(conv_block)
    out = jax.block_until_ready(fn(x, w1, g1, b1, w2, g2, b2))

    ref = conv_block_reference(x, w1, g1, b1, w2, g2, b2)
    assert out.shape == (N, C, H, W)
    err = float(jnp.max(jnp.abs(out - ref)))
    assert jnp.allclose(out, ref, atol=2e-4, rtol=2e-4), f"max abs err {err}"

    print("KERNEL_OK")
</pallas_src>

<mosaic_0001>
module attributes {stable_mosaic.version = 11 : i64} {
  func.func @_conv_stats_kernel(%arg0: i32, %arg1: i32, %arg2: memref<1x8x16x128xf32, #tpu.memory_space<vmem>>, %arg3: memref<1x1x16x128xf32, #tpu.memory_space<vmem>>, %arg4: memref<1x1x16x128xf32, #tpu.memory_space<vmem>>, %arg5: memref<3x3x128x128xf32, #tpu.memory_space<vmem>>, %arg6: memref<1x8x16x128xf32, #tpu.memory_space<vmem>>, %arg7: memref<1x1x2x128xf32, #tpu.memory_space<vmem>>, %arg8: memref<10x18x128xf32, #tpu.memory_space<vmem>>) attributes {dimension_semantics = [#tpu.dimension_semantics<parallel>, #tpu.dimension_semantics<parallel>], iteration_bounds = array<i64: 2, 2>, scalar_prefetch = 0 : i64, scratch_operands = 1 : i64, tpu.core_type = #tpu.core_type<tc>, window_params = [{transform_indices = @transform_0, window_bounds = array<i64: 1, 8, 16, 128>}, {transform_indices = @transform_1, window_bounds = array<i64: 1, 1, 16, 128>}, {transform_indices = @transform_2, window_bounds = array<i64: 1, 1, 16, 128>}, {pipeline_mode = #tpu.pipeline_mode<synchronous>, transform_indices = @transform_3, window_bounds = array<i64: 3, 3, 128, 128>}, {transform_indices = @transform_4, window_bounds = array<i64: 1, 8, 16, 128>}, {transform_indices = @transform_5, window_bounds = array<i64: 1, 1, 2, 128>}]} {
    %c0_i32 = arith.constant 0 : i32
    %0 = arith.cmpi sgt, %arg1, %c0_i32 : i32
    %1 = arith.extui %0 : i1 to i32
    %2 = arith.sitofp %1 : i32 to f32
    %c1_i32 = arith.constant 1 : i32
    %3 = arith.cmpi slt, %arg1, %c1_i32 : i32
    %4 = arith.extui %3 : i1 to i32
    %5 = arith.sitofp %4 : i32 to f32
    %c0 = arith.constant 0 : index
    %c0_0 = arith.constant 0 : index
    %c0_1 = arith.constant 0 : index
    %c0_2 = arith.constant 0 : index
    %6 = vector.load %arg3[%c0, %c0_0, %c0_1, %c0_2] : memref<1x1x16x128xf32, #tpu.memory_space<vmem>>, vector<1x1x16x128xf32>
    %7 = vector.shape_cast %6 : vector<1x1x16x128xf32> to vector<1x16x128xf32>
    %8 = vector.broadcast %2 : f32 to vector<1x16x128xf32>
    %9 = arith.mulf %7, %8 : vector<1x16x128xf32>
    %c0_3 = arith.constant 0 : index
    %c0_4 = arith.constant 0 : index
    %c0_5 = arith.constant 0 : index
    %c0_6 = arith.constant 0 : index
    %10 = vector.load %arg4[%c0_3, %c0_4, %c0_5, %c0_6] : memref<1x1x16x128xf32, #tpu.memory_space<vmem>>, vector<1x1x16x128xf32>
    %11 = vector.shape_cast %10 : vector<1x1x16x128xf32> to vector<1x16x128xf32>
    %12 = vector.broadcast %5 : f32 to vector<1x16x128xf32>
    %13 = arith.mulf %11, %12 : vector<1x16x128xf32>
    %c0_7 = arith.constant 0 : index
    %c0_8 = arith.constant 0 : index
    %c0_9 = arith.constant 0 : index
    %c0_10 = arith.constant 0 : index
    %14 = vector.load %arg2[%c0_7, %c0_8, %c0_9, %c0_10] : memref<1x8x16x128xf32, #tpu.memory_space<vmem>>, vector<1x8x16x128xf32>
    %15 = vector.shape_cast %14 : vector<1x8x16x128xf32> to vector<8x16x128xf32>
    %c0_11 = arith.constant 0 : index
    %c1 = arith.constant 1 : index
    %c0_12 = arith.constant 0 : index
    %16 = vector.load %arg8[%c0_11, %c1, %c0_12] : memref<10x18x128xf32, #tpu.memory_space<vmem>>, vector<1x16x128xf32>
    tpu.vector_store %arg8[%c0_11, %c1, %c0_12], %9 {strides = array<i32>} : memref<10x18x128xf32, #tpu.memory_space<vmem>>, vector<1x16x128xf32>,
    %c1_13 = arith.constant 1 : index
    %c1_14 = arith.constant 1 : index
    %c0_15 = arith.constant 0 : index
    %17 = vector.load %arg8[%c1_13, %c1_14, %c0_15] : memref<10x18x128xf32, #tpu.memory_space<vmem>>, vector<8x16x128xf32>
    tpu.vector_store %arg8[%c1_13, %c1_14, %c0_15], %15 {strides = array<i32>} : memref<10x18x128xf32, #tpu.memory_space<vmem>>, vector<8x16x128xf32>,
    %c9 = arith.constant 9 : index
    %c1_16 = arith.constant 1 : index
    %c0_17 = arith.constant 0 : index
    %18 = vector.load %arg8[%c9, %c1_16, %c0_17] : memref<10x18x128xf32, #tpu.memory_space<vmem>>, vector<1x16x128xf32>
    tpu.vector_store %arg8[%c9, %c1_16, %c0_17], %13 {strides = array<i32>} : memref<10x18x128xf32, #tpu.memory_space<vmem>>, vector<1x16x128xf32>,
    %cst = arith.constant 0.000000e+00 : f32
    %19 = vector.broadcast %cst : f32 to vector<10x1x128xf32>
    %c0_18 = arith.constant 0 : index
    %c0_19 = arith.constant 0 : index
    %c0_20 = arith.constant 0 : index
    %20 = vector.load %arg8[%c0_18, %c0_19, %c0_20] : memref<10x18x128xf32, #tpu.memory_space<vmem>>, vector<10x1x128xf32>
    tpu.vector_store %arg8[%c0_18, %c0_19, %c0_20], %19 {strides = array<i32>} : memref<10x18x128xf32, #tpu.memory_space<vmem>>, vector<10x1x128xf32>,
    %cst_21 = arith.constant 0.000000e+00 : f32
    %21 = vector.broadcast %cst_21 : f32 to vector<10x1x128xf32>
    %c0_22 = arith.constant 0 : index
    %c17 = arith.constant 17 : index
    %c0_23 = arith.constant 0 : index
    %22 = vector.load %arg8[%c0_22, %c17, %c0_23] : memref<10x18x128xf32, #tpu.memory_space<vmem>>, vector<10x1x128xf32>
    tpu.vector_store %arg8[%c0_22, %c17, %c0_23], %21 {strides = array<i32>} : memref<10x18x128xf32, #tpu.memory_space<vmem>>, vector<10x1x128xf32>,
    %c0_24 = arith.constant 0 : index
    %c0_25 = arith.constant 0 : index
    %c0_26 = arith.constant 0 : index
    %23 = vector.load %arg8[%c0_24, %c0_25, %c0_26] : memref<10x18x128xf32, #tpu.memory_space<vmem>>, vector<10x18x128xf32>
    %cst_27 = arith.constant 0.000000e+00 : f32
    %24 = vector.broadcast %cst_27 : f32 to vector<128x128xf32>
    %25 = vector.extract_strided_slice %23 {offsets = [0, 0, 0], sizes = [8, 16, 128], strides = [1, 1, 1]} : vector<10x18x128xf32> to vector<8x16x128xf32>
    %26 = vector.shape_cast %25 : vector<8x16x128xf32> to vector<128x128xf32>
    %c0_28 = arith.constant 0 : index
    %c0_29 = arith.constant 0 : index
    %c0_30 = arith.constant 0 : index
    %c0_31 = arith.constant 0 : index
    %27 = vector.load %arg5[%c0_28, %c0_29, %c0_30, %c0_31] : memref<3x3x128x128xf32, #tpu.memory_space<vmem>>, vector<1x1x128x128xf32>
    %28 = vector.shape_cast %27 : vector<1x1x128x128xf32> to vector<128x128xf32>
    %cst_32 = arith.constant dense<0.000000e+00> : vector<128x128xf32>
    %29 = tpu.matmul %26, %28, %cst_32 {dimension_numbers = #tpu.dot_dimension_numbers<[1], [0], [0], [1], [0, 0, 1, 1], [], []>} : vector<128x128xf32>, vector<128x128xf32>, vector<128x128xf32> -> vector<128x128xf32>
    %30 = arith.addf %24, %29 : vector<128x128xf32>
    %31 = vector.extract_strided_slice %23 {offsets = [0, 1, 0], sizes = [8, 16, 128], strides = [1, 1, 1]} : vector<10x18x128xf32> to vector<8x16x128xf32>
    %32 = vector.shape_cast %31 : vector<8x16x128xf32> to vector<128x128xf32>
    %c0_33 = arith.constant 0 : index
    %c1_34 = arith.constant 1 : index
    %c0_35 = arith.constant 0 : index
    %c0_36 = arith.constant 0 : index
    %33 = vector.load %arg5[%c0_33, %c1_34, %c0_35, %c0_36] : memref<3x3x128x128xf32, #tpu.memory_space<vmem>>, vector<1x1x128x128xf32>
    %34 = vector.shape_cast %33 : vector<1x1x128x128xf32> to vector<128x128xf32>
    %cst_37 = arith.constant dense<0.000000e+00> : vector<128x128xf32>
    %35 = tpu.matmul %32, %34, %cst_37 {dimension_numbers = #tpu.dot_dimension_numbers<[1], [0], [0], [1], [0, 0, 1, 1], [], []>} : vector<128x128xf32>, vector<128x128xf32>, vector<128x128xf32> -> vector<128x128xf32>
    %36 = arith.addf %30, %35 : vector<128x128xf32>
    %37 = vector.extract_strided_slice %23 {offsets = [0, 2, 0], sizes = [8, 16, 128], strides = [1, 1, 1]} : vector<10x18x128xf32> to vector<8x16x128xf32>
    %38 = vector.shape_cast %37 : vector<8x16x128xf32> to vector<128x128xf32>
    %c0_38 = arith.constant 0 : index
    %c2 = arith.constant 2 : index
    %c0_39 = arith.constant 0 : index
    %c0_40 = arith.constant 0 : index
    %39 = vector.load %arg5[%c0_38, %c2, %c0_39, %c0_40] : memref<3x3x128x128xf32, #tpu.memory_space<vmem>>, vector<1x1x128x128xf32>
    %40 = vector.shape_cast %39 : vector<1x1x128x128xf32> to vector<128x128xf32>
    %cst_41 = arith.constant dense<0.000000e+00> : vector<128x128xf32>
    %41 = tpu.matmul %38, %40, %cst_41 {dimension_numbers = #tpu.dot_dimension_numbers<[1], [0], [0], [1], [0, 0, 1, 1], [], []>} : vector<128x128xf32>, vector<128x128xf32>, vector<128x128xf32> -> vector<128x128xf32>
    %42 = arith.addf %36, %41 : vector<128x128xf32>
    %43 = vector.extract_strided_slice %23 {offsets = [1, 0, 0], sizes = [8, 16, 128], strides = [1, 1, 1]} : vector<10x18x128xf32> to vector<8x16x128xf32>
    %44 = vector.shape_cast %43 : vector<8x16x128xf32> to vector<128x128xf32>
    %c1_42 = arith.constant 1 : index
    %c0_43 = arith.constant 0 : index
    %c0_44 = arith.constant 0 : index
    %c0_45 = arith.constant 0 : index
    %45 = vector.load %arg5[%c1_42, %c0_43, %c0_44, %c0_45] : memref<3x3x128x128xf32, #tpu.memory_space<vmem>>, vector<1x1x128x128xf32>
    %46 = vector.shape_cast %45 : vector<1x1x128x128xf32> to vector<128x128xf32>
    %cst_46 = arith.constant dense<0.000000e+00> : vector<128x128xf32>
    %47 = tpu.matmul %44, %46, %cst_46 {dimension_numbers = #tpu.dot_dimension_numbers<[1], [0], [0], [1], [0, 0, 1, 1], [], []>} : vector<128x128xf32>, vector<128x128xf32>, vector<128x128xf32> -> vector<128x128xf32>
    %48 = arith.addf %42, %47 : vector<128x128xf32>
    %49 = vector.extract_strided_slice %23 {offsets = [1, 1, 0], sizes = [8, 16, 128], strides = [1, 1, 1]} : vector<10x18x128xf32> to vector<8x16x128xf32>
    %50 = vector.shape_cast %49 : vector<8x16x128xf32> to vector<128x128xf32>
    %c1_47 = arith.constant 1 : index
    %c1_48 = arith.constant 1 : index
    %c0_49 = arith.constant 0 : index
    %c0_50 = arith.constant 0 : index
    %51 = vector.load %arg5[%c1_47, %c1_48, %c0_49, %c0_50] : memref<3x3x128x128xf32, #tpu.memory_space<vmem>>, vector<1x1x128x128xf32>
    %52 = vector.shape_cast %51 : vector<1x1x128x128xf32> to vector<128x128xf32>
    %cst_51 = arith.constant dense<0.000000e+00> : vector<128x128xf32>
    %53 = tpu.matmul %50, %52, %cst_51 {dimension_numbers = #tpu.dot_dimension_numbers<[1], [0], [0], [1], [0, 0, 1, 1], [], []>} : vector<128x128xf32>, vector<128x128xf32>, vector<128x128xf32> -> vector<128x128xf32>
    %54 = arith.addf %48, %53 : vector<128x128xf32>
    %55 = vector.extract_strided_slice %23 {offsets = [1, 2, 0], sizes = [8, 16, 128], strides = [1, 1, 1]} : vector<10x18x128xf32> to vector<8x16x128xf32>
    %56 = vector.shape_cast %55 : vector<8x16x128xf32> to vector<128x128xf32>
    %c1_52 = arith.constant 1 : index
    %c2_53 = arith.constant 2 : index
    %c0_54 = arith.constant 0 : index
    %c0_55 = arith.constant 0 : index
    %57 = vector.load %arg5[%c1_52, %c2_53, %c0_54, %c0_55] : memref<3x3x128x128xf32, #tpu.memory_space<vmem>>, vector<1x1x128x128xf32>
    %58 = vector.shape_cast %57 : vector<1x1x128x128xf32> to vector<128x128xf32>
    %cst_56 = arith.constant dense<0.000000e+00> : vector<128x128xf32>
    %59 = tpu.matmul %56, %58, %cst_56 {dimension_numbers = #tpu.dot_dimension_numbers<[1], [0], [0], [1], [0, 0, 1, 1], [], []>} : vector<128x128xf32>, vector<128x128xf32>, vector<128x128xf32> -> vector<128x128xf32>
    %60 = arith.addf %54, %59 : vector<128x128xf32>
    %61 = vector.extract_strided_slice %23 {offsets = [2, 0, 0], sizes = [8, 16, 128], strides = [1, 1, 1]} : vector<10x18x128xf32> to vector<8x16x128xf32>
    %62 = vector.shape_cast %61 : vector<8x16x128xf32> to vector<128x128xf32>
    %c2_57 = arith.constant 2 : index
    %c0_58 = arith.constant 0 : index
    %c0_59 = arith.constant 0 : index
    %c0_60 = arith.constant 0 : index
    %63 = vector.load %arg5[%c2_57, %c0_58, %c0_59, %c0_60] : memref<3x3x128x128xf32, #tpu.memory_space<vmem>>, vector<1x1x128x128xf32>
    %64 = vector.shape_cast %63 : vector<1x1x128x128xf32> to vector<128x128xf32>
    %cst_61 = arith.constant dense<0.000000e+00> : vector<128x128xf32>
    %65 = tpu.matmul %62, %64, %cst_61 {dimension_numbers = #tpu.dot_dimension_numbers<[1], [0], [0], [1], [0, 0, 1, 1], [], []>} : vector<128x128xf32>, vector<128x128xf32>, vector<128x128xf32> -> vector<128x128xf32>
    %66 = arith.addf %60, %65 : vector<128x128xf32>
    %67 = vector.extract_strided_slice %23 {offsets = [2, 1, 0], sizes = [8, 16, 128], strides = [1, 1, 1]} : vector<10x18x128xf32> to vector<8x16x128xf32>
    %68 = vector.shape_cast %67 : vector<8x16x128xf32> to vector<128x128xf32>
    %c2_62 = arith.constant 2 : index
    %c1_63 = arith.constant 1 : index
    %c0_64 = arith.constant 0 : index
    %c0_65 = arith.constant 0 : index
    %69 = vector.load %arg5[%c2_62, %c1_63, %c0_64, %c0_65] : memref<3x3x128x128xf32, #tpu.memory_space<vmem>>, vector<1x1x128x128xf32>
    %70 = vector.shape_cast %69 : vector<1x1x128x128xf32> to vector<128x128xf32>
    %cst_66 = arith.constant dense<0.000000e+00> : vector<128x128xf32>
    %71 = tpu.matmul %68, %70, %cst_66 {dimension_numbers = #tpu.dot_dimension_numbers<[1], [0], [0], [1], [0, 0, 1, 1], [], []>} : vector<128x128xf32>, vector<128x128xf32>, vector<128x128xf32> -> vector<128x128xf32>
    %72 = arith.addf %66, %71 : vector<128x128xf32>
    %73 = vector.extract_strided_slice %23 {offsets = [2, 2, 0], sizes = [8, 16, 128], strides = [1, 1, 1]} : vector<10x18x128xf32> to vector<8x16x128xf32>
    %74 = vector.shape_cast %73 : vector<8x16x128xf32> to vector<128x128xf32>
    %c2_67 = arith.constant 2 : index
    %c2_68 = arith.constant 2 : index
    %c0_69 = arith.constant 0 : index
    %c0_70 = arith.constant 0 : index
    %75 = vector.load %arg5[%c2_67, %c2_68, %c0_69, %c0_70] : memref<3x3x128x128xf32, #tpu.memory_space<vmem>>, vector<1x1x128x128xf32>
    %76 = vector.shape_cast %75 : vector<1x1x128x128xf32> to vector<128x128xf32>
    %cst_71 = arith.constant dense<0.000000e+00> : vector<128x128xf32>
    %77 = tpu.matmul %74, %76, %cst_71 {dimension_numbers = #tpu.dot_dimension_numbers<[1], [0], [0], [1], [0, 0, 1, 1], [], []>} : vector<128x128xf32>, vector<128x128xf32>, vector<128x128xf32> -> vector<128x128xf32>
    %78 = arith.addf %72, %77 : vector<128x128xf32>
    %79 = vector.shape_cast %78 : vector<128x128xf32> to vector<1x8x16x128xf32>
    %c0_72 = arith.constant 0 : index
    %c0_73 = arith.constant 0 : index
    %c0_74 = arith.constant 0 : index
    %c0_75 = arith.constant 0 : index
    %80 = vector.load %arg6[%c0_72, %c0_73, %c0_74, %c0_75] : memref<1x8x16x128xf32, #tpu.memory_space<vmem>>, vector<1x8x16x128xf32>
    tpu.vector_store %arg6[%c0_72, %c0_73, %c0_74, %c0_75], %79 {strides = array<i32>} : memref<1x8x16x128xf32, #tpu.memory_space<vmem>>, vector<1x8x16x128xf32>,
    %cst_76 = arith.constant 1.000000e+00 : f32
    %81 = vector.broadcast %cst_76 : f32 to vector<1x128xf32>
    %cst_77 = arith.constant dense<0.000000e+00> : vector<1x128xf32>
    %82 = tpu.matmul %81, %78, %cst_77 {dimension_numbers = #tpu.dot_dimension_numbers<[1], [0], [0], [1], [0, 0, 1, 1], [], []>} : vector<1x128xf32>, vector<128x128xf32>, vector<1x128xf32> -> vector<1x128xf32>
    %83 = vector.shape_cast %82 : vector<1x128xf32> to vector<1x1x1x128xf32>
    %c0_78 = arith.constant 0 : index
    %c0_79 = arith.constant 0 : index
    %c0_80 = arith.constant 0 : index
    %c0_81 = arith.constant 0 : index
    %84 = vector.load %arg7[%c0_78, %c0_79, %c0_80, %c0_81] : memref<1x1x2x128xf32, #tpu.memory_space<vmem>>, vector<1x1x1x128xf32>
    tpu.vector_store %arg7[%c0_78, %c0_79, %c0_80, %c0_81], %83 {strides = array<i32>} : memref<1x1x2x128xf32, #tpu.memory_space<vmem>>, vector<1x1x1x128xf32>,
    %85 = arith.mulf %78, %78 : vector<128x128xf32>
    %cst_82 = arith.constant dense<0.000000e+00> : vector<1x128xf32>
    %86 = tpu.matmul %81, %85, %cst_82 {dimension_numbers = #tpu.dot_dimension_numbers<[1], [0], [0], [1], [0, 0, 1, 1], [], []>} : vector<1x128xf32>, vector<128x128xf32>, vector<1x128xf32> -> vector<1x128xf32>
    %87 = vector.shape_cast %86 : vector<1x128xf32> to vector<1x1x1x128xf32>
    %c0_83 = arith.constant 0 : index
    %c0_84 = arith.constant 0 : index
    %c1_85 = arith.constant 1 : index
    %c0_86 = arith.constant 0 : index
    %88 = vector.load %arg7[%c0_83, %c0_84, %c1_85, %c0_86] : memref<1x1x2x128xf32, #tpu.memory_space<vmem>>, vector<1x1x1x128xf32>
    tpu.vector_store %arg7[%c0_83, %c0_84, %c1_85, %c0_86], %87 {strides = array<i32>} : memref<1x1x2x128xf32, #tpu.memory_space<vmem>>, vector<1x1x1x128xf32>,
    return
  }
  func.func @transform_0(%arg0: i32, %arg1: i32) -> (i32, i32, i32, i32) {
    %c0_i32 = arith.constant 0 : i32
    %c0_i32_0 = arith.constant 0 : i32
    %c0_i32_1 = arith.constant 0 : i32
    return %arg0, %arg1, %c0_i32, %c0_i32_0 : i32, i32, i32, i32
  }
  func.func @transform_1(%arg0: i32, %arg1: i32) -> (i32, i32, i32, i32) {
    %c8_i32 = arith.constant 8 : i32
    %0 = arith.muli %arg1, %c8_i32 : i32
    %c1_i32 = arith.constant 1 : i32
    %1 = arith.subi %0, %c1_i32 : i32
    %c0_i32 = arith.constant 0 : i32
    %2 = arith.maxsi %1, %c0_i32 : i32
    %c0_i32_0 = arith.constant 0 : i32
    %c0_i32_1 = arith.constant 0 : i32
    %c0_i32_2 = arith.constant 0 : i32
    return %arg0, %2, %c0_i32_0, %c0_i32_1 : i32, i32, i32, i32
  }
  func.func @transform_2(%arg0: i32, %arg1: i32) -> (i32, i32, i32, i32) {
    %c8_i32 = arith.constant 8 : i32
    %0 = arith.muli %arg1, %c8_i32 : i32
    %c8_i32_0 = arith.constant 8 : i32
    %1 = arith.addi %0, %c8_i32_0 : i32
    %c15_i32 = arith.constant 15 : i32
    %2 = arith.minsi %1, %c15_i32 : i32
    %c0_i32 = arith.constant 0 : i32
    %c0_i32_1 = arith.constant 0 : i32
    %c0_i32_2 = arith.constant 0 : i32
    return %arg0, %2, %c0_i32, %c0_i32_1 : i32, i32, i32, i32
  }
  func.func @transform_3(%arg0: i32, %arg1: i32) -> (i32, i32, i32, i32) {
    %c0_i32 = arith.constant 0 : i32
    %c0_i32_0 = arith.constant 0 : i32
    %c0_i32_1 = arith.constant 0 : i32
    %c0_i32_2 = arith.constant 0 : i32
    %c0_i32_3 = arith.constant 0 : i32
    return %c0_i32, %c0_i32_0, %c0_i32_1, %c0_i32_2 : i32, i32, i32, i32
  }
  func.func @transform_4(%arg0: i32, %arg1: i32) -> (i32, i32, i32, i32) {
    %c0_i32 = arith.constant 0 : i32
    %c0_i32_0 = arith.constant 0 : i32
    %c0_i32_1 = arith.constant 0 : i32
    return %arg0, %arg1, %c0_i32, %c0_i32_0 : i32, i32, i32, i32
  }
  func.func @transform_5(%arg0: i32, %arg1: i32) -> (i32, i32, i32, i32) {
    %c0_i32 = arith.constant 0 : i32
    %c0_i32_0 = arith.constant 0 : i32
    %c0_i32_1 = arith.constant 0 : i32
    return %arg0, %arg1, %c0_i32, %c0_i32_0 : i32, i32, i32, i32
  }
}

module attributes {stable_mosaic.version = 11 : i64} {
  func.func @_bn_residual_kernel(%arg0: i32, %arg1: i32, %arg2: memref<1x8x16x128xf32, #tpu.memory_space<vmem>>, %arg3: memref<1x8x16x128xf32, #tpu.memory_space<vmem>>, %arg4: memref<1x128xf32, #tpu.memory_space<vmem>>, %arg5: memref<1x128xf32, #tpu.memory_space<vmem>>, %arg6: memref<1x8x16x128xf32, #tpu.memory_space<vmem>>) attributes {dimension_semantics = [#tpu.dimension_semantics<parallel>, #tpu.dimension_semantics<parallel>], iteration_bounds = array<i64: 2, 2>, scalar_prefetch = 0 : i64, scratch_operands = 0 : i64, tpu.core_type = #tpu.core_type<tc>, window_params = [{transform_indices = @transform_0, window_bounds = array<i64: 1, 8, 16, 128>}, {transform_indices = @transform_1, window_bounds = array<i64: 1, 8, 16, 128>}, {pipeline_mode = #tpu.pipeline_mode<synchronous>, transform_indices = @transform_2, window_bounds = array<i64: 1, 128>}, {pipeline_mode = #tpu.pipeline_mode<synchronous>, transform_indices = @transform_3, window_bounds = array<i64: 1, 128>}, {transform_indices = @transform_4, window_bounds = array<i64: 1, 8, 16, 128>}]} {
    %c0 = arith.constant 0 : index
    %c0_0 = arith.constant 0 : index
    %0 = vector.load %arg4[%c0, %c0_0] : memref<1x128xf32, #tpu.memory_space<vmem>>, vector<1x128xf32>
    %1 = vector.shape_cast %0 : vector<1x128xf32> to vector<1x1x1x128xf32>
    %c0_1 = arith.constant 0 : index
    %c0_2 = arith.constant 0 : index
    %2 = vector.load %arg5[%c0_1, %c0_2] : memref<1x128xf32, #tpu.memory_space<vmem>>, vector<1x128xf32>
    %3 = vector.shape_cast %2 : vector<1x128xf32> to vector<1x1x1x128xf32>
    %c0_3 = arith.constant 0 : index
    %c0_4 = arith.constant 0 : index
    %c0_5 = arith.constant 0 : index
    %c0_6 = arith.constant 0 : index
    %4 = vector.load %arg2[%c0_3, %c0_4, %c0_5, %c0_6] : memref<1x8x16x128xf32, #tpu.memory_space<vmem>>, vector<1x8x16x128xf32>
    %c0_7 = arith.constant 0 : index
    %c0_8 = arith.constant 0 : index
    %c0_9 = arith.constant 0 : index
    %c0_10 = arith.constant 0 : index
    %5 = vector.load %arg3[%c0_7, %c0_8, %c0_9, %c0_10] : memref<1x8x16x128xf32, #tpu.memory_space<vmem>>, vector<1x8x16x128xf32>
    %6 = vector.broadcast %1 : vector<1x1x1x128xf32> to vector<1x8x16x128xf32>
    %7 = arith.mulf %5, %6 : vector<1x8x16x128xf32>
    %8 = arith.addf %4, %7 : vector<1x8x16x128xf32>
    %9 = vector.broadcast %3 : vector<1x1x1x128xf32> to vector<1x8x16x128xf32>
    %10 = arith.addf %8, %9 : vector<1x8x16x128xf32>
    %c0_11 = arith.constant 0 : index
    %c0_12 = arith.constant 0 : index
    %c0_13 = arith.constant 0 : index
    %c0_14 = arith.constant 0 : index
    %11 = vector.load %arg6[%c0_11, %c0_12, %c0_13, %c0_14] : memref<1x8x16x128xf32, #tpu.memory_space<vmem>>, vector<1x8x16x128xf32>
    tpu.vector_store %arg6[%c0_11, %c0_12, %c0_13, %c0_14], %10 {strides = array<i32>} : memref<1x8x16x128xf32, #tpu.memory_space<vmem>>, vector<1x8x16x128xf32>,
    return
  }
  func.func @transform_0(%arg0: i32, %arg1: i32) -> (i32, i32, i32, i32) {
    %c0_i32 = arith.constant 0 : i32
    %c0_i32_0 = arith.constant 0 : i32
    %c0_i32_1 = arith.constant 0 : i32
    return %arg0, %arg1, %c0_i32, %c0_i32_0 : i32, i32, i32, i32
  }
  func.func @transform_1(%arg0: i32, %arg1: i32) -> (i32, i32, i32, i32) {
    %c0_i32 = arith.constant 0 : i32
    %c0_i32_0 = arith.constant 0 : i32
    %c0_i32_1 = arith.constant 0 : i32
    return %arg0, %arg1, %c0_i32, %c0_i32_0 : i32, i32, i32, i32
  }
  func.func @transform_2(%arg0: i32, %arg1: i32) -> (i32, i32) {
    %c0_i32 = arith.constant 0 : i32
    %c0_i32_0 = arith.constant 0 : i32
    %c0_i32_1 = arith.constant 0 : i32
    return %c0_i32, %c0_i32_0 : i32, i32
  }
  func.func @transform_3(%arg0: i32, %arg1: i32) -> (i32, i32) {
    %c0_i32 = arith.constant 0 : i32
    %c0_i32_0 = arith.constant 0 : i32
    %c0_i32_1 = arith.constant 0 : i32
    return %c0_i32, %c0_i32_0 : i32, i32
  }
  func.func @transform_4(%arg0: i32, %arg1: i32) -> (i32, i32, i32, i32) {
    %c0_i32 = arith.constant 0 : i32
    %c0_i32_0 = arith.constant 0 : i32
    %c0_i32_1 = arith.constant 0 : i32
    return %arg0, %arg1, %c0_i32, %c0_i32_0 : i32, i32, i32, i32
  }
}

module attributes {stable_mosaic.version = 11 : i64} {
  func.func @_bn_gelu_conv_stats_kernel(%arg0: i32, %arg1: i32, %arg2: memref<1x8x16x128xf32, #tpu.memory_space<vmem>>, %arg3: memref<1x1x16x128xf32, #tpu.memory_space<vmem>>, %arg4: memref<1x1x16x128xf32, #tpu.memory_space<vmem>>, %arg5: memref<1x128xf32, #tpu.memory_space<vmem>>, %arg6: memref<1x128xf32, #tpu.memory_space<vmem>>, %arg7: memref<3x3x128x128xf32, #tpu.memory_space<vmem>>, %arg8: memref<1x8x16x128xf32, #tpu.memory_space<vmem>>, %arg9: memref<1x1x2x128xf32, #tpu.memory_space<vmem>>, %arg10: memref<10x18x128xf32, #tpu.memory_space<vmem>>) attributes {dimension_semantics = [#tpu.dimension_semantics<parallel>, #tpu.dimension_semantics<parallel>], iteration_bounds = array<i64: 2, 2>, scalar_prefetch = 0 : i64, scratch_operands = 1 : i64, tpu.core_type = #tpu.core_type<tc>, window_params = [{transform_indices = @transform_0, window_bounds = array<i64: 1, 8, 16, 128>}, {transform_indices = @transform_1, window_bounds = array<i64: 1, 1, 16, 128>}, {transform_indices = @transform_2, window_bounds = array<i64: 1, 1, 16, 128>}, {pipeline_mode = #tpu.pipeline_mode<synchronous>, transform_indices = @transform_3, window_bounds = array<i64: 1, 128>}, {pipeline_mode = #tpu.pipeline_mode<synchronous>, transform_indices = @transform_4, window_bounds = array<i64: 1, 128>}, {pipeline_mode = #tpu.pipeline_mode<synchronous>, transform_indices = @transform_5, window_bounds = array<i64: 3, 3, 128, 128>}, {transform_indices = @transform_6, window_bounds = array<i64: 1, 8, 16, 128>}, {transform_indices = @transform_7, window_bounds = array<i64: 1, 1, 2, 128>}]} {
    %c0 = arith.constant 0 : index
    %c0_0 = arith.constant 0 : index
    %0 = vector.load %arg5[%c0, %c0_0] : memref<1x128xf32, #tpu.memory_space<vmem>>, vector<1x128xf32>
    %1 = vector.shape_cast %0 : vector<1x128xf32> to vector<1x1x128xf32>
    %c0_1 = arith.constant 0 : index
    %c0_2 = arith.constant 0 : index
    %2 = vector.load %arg6[%c0_1, %c0_2] : memref<1x128xf32, #tpu.memory_space<vmem>>, vector<1x128xf32>
    %3 = vector.shape_cast %2 : vector<1x128xf32> to vector<1x1x128xf32>
    %c0_i32 = arith.constant 0 : i32
    %4 = arith.cmpi sgt, %arg1, %c0_i32 : i32
    %5 = arith.extui %4 : i1 to i32
    %6 = arith.sitofp %5 : i32 to f32
    %c1_i32 = arith.constant 1 : i32
    %7 = arith.cmpi slt, %arg1, %c1_i32 : i32
    %8 = arith.extui %7 : i1 to i32
    %9 = arith.sitofp %8 : i32 to f32
    %c0_3 = arith.constant 0 : index
    %c0_4 = arith.constant 0 : index
    %c0_5 = arith.constant 0 : index
    %c0_6 = arith.constant 0 : index
    %10 = vector.load %arg3[%c0_3, %c0_4, %c0_5, %c0_6] : memref<1x1x16x128xf32, #tpu.memory_space<vmem>>, vector<1x1x16x128xf32>
    %11 = vector.shape_cast %10 : vector<1x1x16x128xf32> to vector<1x16x128xf32>
    %12 = vector.broadcast %1 : vector<1x1x128xf32> to vector<1x16x128xf32>
    %13 = arith.mulf %11, %12 : vector<1x16x128xf32>
    %14 = vector.broadcast %3 : vector<1x1x128xf32> to vector<1x16x128xf32>
    %15 = arith.addf %13, %14 : vector<1x16x128xf32>
    %cst = arith.constant 5.000000e-01 : f32
    %16 = vector.broadcast %cst : f32 to vector<1x16x128xf32>
    %17 = arith.mulf %16, %15 : vector<1x16x128xf32>
    %cst_7 = arith.constant 0.707106769 : f32
    %18 = vector.broadcast %cst_7 : f32 to vector<1x16x128xf32>
    %19 = arith.mulf %15, %18 : vector<1x16x128xf32>
    %20 = math.erf %19 : vector<1x16x128xf32>
    %cst_8 = arith.constant 1.000000e+00 : f32
    %21 = vector.broadcast %cst_8 : f32 to vector<1x16x128xf32>
    %22 = arith.addf %21, %20 : vector<1x16x128xf32>
    %23 = arith.mulf %17, %22 : vector<1x16x128xf32>
    %24 = vector.broadcast %6 : f32 to vector<1x16x128xf32>
    %25 = arith.mulf %23, %24 : vector<1x16x128xf32>
    %c0_9 = arith.constant 0 : index
    %c0_10 = arith.constant 0 : index
    %c0_11 = arith.constant 0 : index
    %c0_12 = arith.constant 0 : index
    %26 = vector.load %arg4[%c0_9, %c0_10, %c0_11, %c0_12] : memref<1x1x16x128xf32, #tpu.memory_space<vmem>>, vector<1x1x16x128xf32>
    %27 = vector.shape_cast %26 : vector<1x1x16x128xf32> to vector<1x16x128xf32>
    %28 = vector.broadcast %1 : vector<1x1x128xf32> to vector<1x16x128xf32>
    %29 = arith.mulf %27, %28 : vector<1x16x128xf32>
    %30 = vector.broadcast %3 : vector<1x1x128xf32> to vector<1x16x128xf32>
    %31 = arith.addf %29, %30 : vector<1x16x128xf32>
    %cst_13 = arith.constant 5.000000e-01 : f32
    %32 = vector.broadcast %cst_13 : f32 to vector<1x16x128xf32>
    %33 = arith.mulf %32, %31 : vector<1x16x128xf32>
    %cst_14 = arith.constant 0.707106769 : f32
    %34 = vector.broadcast %cst_14 : f32 to vector<1x16x128xf32>
    %35 = arith.mulf %31, %34 : vector<1x16x128xf32>
    %36 = math.erf %35 : vector<1x16x128xf32>
    %cst_15 = arith.constant 1.000000e+00 : f32
    %37 = vector.broadcast %cst_15 : f32 to vector<1x16x128xf32>
    %38 = arith.addf %37, %36 : vector<1x16x128xf32>
    %39 = arith.mulf %33, %38 : vector<1x16x128xf32>
    %40 = vector.broadcast %9 : f32 to vector<1x16x128xf32>
    %41 = arith.mulf %39, %40 : vector<1x16x128xf32>
    %c0_16 = arith.constant 0 : index
    %c0_17 = arith.constant 0 : index
    %c0_18 = arith.constant 0 : index
    %c0_19 = arith.constant 0 : index
    %42 = vector.load %arg2[%c0_16, %c0_17, %c0_18, %c0_19] : memref<1x8x16x128xf32, #tpu.memory_space<vmem>>, vector<1x8x16x128xf32>
    %43 = vector.shape_cast %42 : vector<1x8x16x128xf32> to vector<8x16x128xf32>
    %44 = vector.broadcast %1 : vector<1x1x128xf32> to vector<8x16x128xf32>
    %45 = arith.mulf %43, %44 : vector<8x16x128xf32>
    %46 = vector.broadcast %3 : vector<1x1x128xf32> to vector<8x16x128xf32>
    %47 = arith.addf %45, %46 : vector<8x16x128xf32>
    %cst_20 = arith.constant 5.000000e-01 : f32
    %48 = vector.broadcast %cst_20 : f32 to vector<8x16x128xf32>
    %49 = arith.mulf %48, %47 : vector<8x16x128xf32>
    %cst_21 = arith.constant 0.707106769 : f32
    %50 = vector.broadcast %cst_21 : f32 to vector<8x16x128xf32>
    %51 = arith.mulf %47, %50 : vector<8x16x128xf32>
    %52 = math.erf %51 : vector<8x16x128xf32>
    %cst_22 = arith.constant 1.000000e+00 : f32
    %53 = vector.broadcast %cst_22 : f32 to vector<8x16x128xf32>
    %54 = arith.addf %53, %52 : vector<8x16x128xf32>
    %55 = arith.mulf %49, %54 : vector<8x16x128xf32>
    %c0_23 = arith.constant 0 : index
    %c1 = arith.constant 1 : index
    %c0_24 = arith.constant 0 : index
    %56 = vector.load %arg10[%c0_23, %c1, %c0_24] : memref<10x18x128xf32, #tpu.memory_space<vmem>>, vector<1x16x128xf32>
    tpu.vector_store %arg10[%c0_23, %c1, %c0_24], %25 {strides = array<i32>} : memref<10x18x128xf32, #tpu.memory_space<vmem>>, vector<1x16x128xf32>,
    %c1_25 = arith.constant 1 : index
    %c1_26 = arith.constant 1 : index
    %c0_27 = arith.constant 0 : index
    %57 = vector.load %arg10[%c1_25, %c1_26, %c0_27] : memref<10x18x128xf32, #tpu.memory_space<vmem>>, vector<8x16x128xf32>
    tpu.vector_store %arg10[%c1_25, %c1_26, %c0_27], %55 {strides = array<i32>} : memref<10x18x128xf32, #tpu.memory_space<vmem>>, vector<8x16x128xf32>,
    %c9 = arith.constant 9 : index
    %c1_28 = arith.constant 1 : index
    %c0_29 = arith.constant 0 : index
    %58 = vector.load %arg10[%c9, %c1_28, %c0_29] : memref<10x18x128xf32, #tpu.memory_space<vmem>>, vector<1x16x128xf32>
    tpu.vector_store %arg10[%c9, %c1_28, %c0_29], %41 {strides = array<i32>} : memref<10x18x128xf32, #tpu.memory_space<vmem>>, vector<1x16x128xf32>,
    %cst_30 = arith.constant 0.000000e+00 : f32
    %59 = vector.broadcast %cst_30 : f32 to vector<10x1x128xf32>
    %c0_31 = arith.constant 0 : index
    %c0_32 = arith.constant 0 : index
    %c0_33 = arith.constant 0 : index
    %60 = vector.load %arg10[%c0_31, %c0_32, %c0_33] : memref<10x18x128xf32, #tpu.memory_space<vmem>>, vector<10x1x128xf32>
    tpu.vector_store %arg10[%c0_31, %c0_32, %c0_33], %59 {strides = array<i32>} : memref<10x18x128xf32, #tpu.memory_space<vmem>>, vector<10x1x128xf32>,
    %cst_34 = arith.constant 0.000000e+00 : f32
    %61 = vector.broadcast %cst_34 : f32 to vector<10x1x128xf32>
    %c0_35 = arith.constant 0 : index
    %c17 = arith.constant 17 : index
    %c0_36 = arith.constant 0 : index
    %62 = vector.load %arg10[%c0_35, %c17, %c0_36] : memref<10x18x128xf32, #tpu.memory_space<vmem>>, vector<10x1x128xf32>
    tpu.vector_store %arg10[%c0_35, %c17, %c0_36], %61 {strides = array<i32>} : memref<10x18x128xf32, #tpu.memory_space<vmem>>, vector<10x1x128xf32>,
    %c0_37 = arith.constant 0 : index
    %c0_38 = arith.constant 0 : index
    %c0_39 = arith.constant 0 : index
    %63 = vector.load %arg10[%c0_37, %c0_38, %c0_39] : memref<10x18x128xf32, #tpu.memory_space<vmem>>, vector<10x18x128xf32>
    %cst_40 = arith.constant 0.000000e+00 : f32
    %64 = vector.broadcast %cst_40 : f32 to vector<128x128xf32>
    %65 = vector.extract_strided_slice %63 {offsets = [0, 0, 0], sizes = [8, 16, 128], strides = [1, 1, 1]} : vector<10x18x128xf32> to vector<8x16x128xf32>
    %66 = vector.shape_cast %65 : vector<8x16x128xf32> to vector<128x128xf32>
    %c0_41 = arith.constant 0 : index
    %c0_42 = arith.constant 0 : index
    %c0_43 = arith.constant 0 : index
    %c0_44 = arith.constant 0 : index
    %67 = vector.load %arg7[%c0_41, %c0_42, %c0_43, %c0_44] : memref<3x3x128x128xf32, #tpu.memory_space<vmem>>, vector<1x1x128x128xf32>
    %68 = vector.shape_cast %67 : vector<1x1x128x128xf32> to vector<128x128xf32>
    %cst_45 = arith.constant dense<0.000000e+00> : vector<128x128xf32>
    %69 = tpu.matmul %66, %68, %cst_45 {dimension_numbers = #tpu.dot_dimension_numbers<[1], [0], [0], [1], [0, 0, 1, 1], [], []>} : vector<128x128xf32>, vector<128x128xf32>, vector<128x128xf32> -> vector<128x128xf32>
    %70 = arith.addf %64, %69 : vector<128x128xf32>
    %71 = vector.extract_strided_slice %63 {offsets = [0, 1, 0], sizes = [8, 16, 128], strides = [1, 1, 1]} : vector<10x18x128xf32> to vector<8x16x128xf32>
    %72 = vector.shape_cast %71 : vector<8x16x128xf32> to vector<128x128xf32>
    %c0_46 = arith.constant 0 : index
    %c1_47 = arith.constant 1 : index
    %c0_48 = arith.constant 0 : index
    %c0_49 = arith.constant 0 : index
    %73 = vector.load %arg7[%c0_46, %c1_47, %c0_48, %c0_49] : memref<3x3x128x128xf32, #tpu.memory_space<vmem>>, vector<1x1x128x128xf32>
    %74 = vector.shape_cast %73 : vector<1x1x128x128xf32> to vector<128x128xf32>
    %cst_50 = arith.constant dense<0.000000e+00> : vector<128x128xf32>
    %75 = tpu.matmul %72, %74, %cst_50 {dimension_numbers = #tpu.dot_dimension_numbers<[1], [0], [0], [1], [0, 0, 1, 1], [], []>} : vector<128x128xf32>, vector<128x128xf32>, vector<128x128xf32> -> vector<128x128xf32>
    %76 = arith.addf %70, %75 : vector<128x128xf32>
    %77 = vector.extract_strided_slice %63 {offsets = [0, 2, 0], sizes = [8, 16, 128], strides = [1, 1, 1]} : vector<10x18x128xf32> to vector<8x16x128xf32>
    %78 = vector.shape_cast %77 : vector<8x16x128xf32> to vector<128x128xf32>
    %c0_51 = arith.constant 0 : index
    %c2 = arith.constant 2 : index
    %c0_52 = arith.constant 0 : index
    %c0_53 = arith.constant 0 : index
    %79 = vector.load %arg7[%c0_51, %c2, %c0_52, %c0_53] : memref<3x3x128x128xf32, #tpu.memory_space<vmem>>, vector<1x1x128x128xf32>
    %80 = vector.shape_cast %79 : vector<1x1x128x128xf32> to vector<128x128xf32>
    %cst_54 = arith.constant dense<0.000000e+00> : vector<128x128xf32>
    %81 = tpu.matmul %78, %80, %cst_54 {dimension_numbers = #tpu.dot_dimension_numbers<[1], [0], [0], [1], [0, 0, 1, 1], [], []>} : vector<128x128xf32>, vector<128x128xf32>, vector<128x128xf32> -> vector<128x128xf32>
    %82 = arith.addf %76, %81 : vector<128x128xf32>
    %83 = vector.extract_strided_slice %63 {offsets = [1, 0, 0], sizes = [8, 16, 128], strides = [1, 1, 1]} : vector<10x18x128xf32> to vector<8x16x128xf32>
    %84 = vector.shape_cast %83 : vector<8x16x128xf32> to vector<128x128xf32>
    %c1_55 = arith.constant 1 : index
    %c0_56 = arith.constant 0 : index
    %c0_57 = arith.constant 0 : index
    %c0_58 = arith.constant 0 : index
    %85 = vector.load %arg7[%c1_55, %c0_56, %c0_57, %c0_58] : memref<3x3x128x128xf32, #tpu.memory_space<vmem>>, vector<1x1x128x128xf32>
    %86 = vector.shape_cast %85 : vector<1x1x128x128xf32> to vector<128x128xf32>
    %cst_59 = arith.constant dense<0.000000e+00> : vector<128x128xf32>
    %87 = tpu.matmul %84, %86, %cst_59 {dimension_numbers = #tpu.dot_dimension_numbers<[1], [0], [0], [1], [0, 0, 1, 1], [], []>} : vector<128x128xf32>, vector<128x128xf32>, vector<128x128xf32> -> vector<128x128xf32>
    %88 = arith.addf %82, %87 : vector<128x128xf32>
    %89 = vector.extract_strided_slice %63 {offsets = [1, 1, 0], sizes = [8, 16, 128], strides = [1, 1, 1]} : vector<10x18x128xf32> to vector<8x16x128xf32>
    %90 = vector.shape_cast %89 : vector<8x16x128xf32> to vector<128x128xf32>
    %c1_60 = arith.constant 1 : index
    %c1_61 = arith.constant 1 : index
    %c0_62 = arith.constant 0 : index
    %c0_63 = arith.constant 0 : index
    %91 = vector.load %arg7[%c1_60, %c1_61, %c0_62, %c0_63] : memref<3x3x128x128xf32, #tpu.memory_space<vmem>>, vector<1x1x128x128xf32>
    %92 = vector.shape_cast %91 : vector<1x1x128x128xf32> to vector<128x128xf32>
    %cst_64 = arith.constant dense<0.000000e+00> : vector<128x128xf32>
    %93 = tpu.matmul %90, %92, %cst_64 {dimension_numbers = #tpu.dot_dimension_numbers<[1], [0], [0], [1], [0, 0, 1, 1], [], []>} : vector<128x128xf32>, vector<128x128xf32>, vector<128x128xf32> -> vector<128x128xf32>
    %94 = arith.addf %88, %93 : vector<128x128xf32>
    %95 = vector.extract_strided_slice %63 {offsets = [1, 2, 0], sizes = [8, 16, 128], strides = [1, 1, 1]} : vector<10x18x128xf32> to vector<8x16x128xf32>
    %96 = vector.shape_cast %95 : vector<8x16x128xf32> to vector<128x128xf32>
    %c1_65 = arith.constant 1 : index
    %c2_66 = arith.constant 2 : index
    %c0_67 = arith.constant 0 : index
    %c0_68 = arith.constant 0 : index
    %97 = vector.load %arg7[%c1_65, %c2_66, %c0_67, %c0_68] : memref<3x3x128x128xf32, #tpu.memory_space<vmem>>, vector<1x1x128x128xf32>
    %98 = vector.shape_cast %97 : vector<1x1x128x128xf32> to vector<128x128xf32>
    %cst_69 = arith.constant dense<0.000000e+00> : vector<128x128xf32>
    %99 = tpu.matmul %96, %98, %cst_69 {dimension_numbers = #tpu.dot_dimension_numbers<[1], [0], [0], [1], [0, 0, 1, 1], [], []>} : vector<128x128xf32>, vector<128x128xf32>, vector<128x128xf32> -> vector<128x128xf32>
    %100 = arith.addf %94, %99 : vector<128x128xf32>
    %101 = vector.extract_strided_slice %63 {offsets = [2, 0, 0], sizes = [8, 16, 128], strides = [1, 1, 1]} : vector<10x18x128xf32> to vector<8x16x128xf32>
    %102 = vector.shape_cast %101 : vector<8x16x128xf32> to vector<128x128xf32>
    %c2_70 = arith.constant 2 : index
    %c0_71 = arith.constant 0 : index
    %c0_72 = arith.constant 0 : index
    %c0_73 = arith.constant 0 : index
    %103 = vector.load %arg7[%c2_70, %c0_71, %c0_72, %c0_73] : memref<3x3x128x128xf32, #tpu.memory_space<vmem>>, vector<1x1x128x128xf32>
    %104 = vector.shape_cast %103 : vector<1x1x128x128xf32> to vector<128x128xf32>
    %cst_74 = arith.constant dense<0.000000e+00> : vector<128x128xf32>
    %105 = tpu.matmul %102, %104, %cst_74 {dimension_numbers = #tpu.dot_dimension_numbers<[1], [0], [0], [1], [0, 0, 1, 1], [], []>} : vector<128x128xf32>, vector<128x128xf32>, vector<128x128xf32> -> vector<128x128xf32>
    %106 = arith.addf %100, %105 : vector<128x128xf32>
    %107 = vector.extract_strided_slice %63 {offsets = [2, 1, 0], sizes = [8, 16, 128], strides = [1, 1, 1]} : vector<10x18x128xf32> to vector<8x16x128xf32>
    %108 = vector.shape_cast %107 : vector<8x16x128xf32> to vector<128x128xf32>
    %c2_75 = arith.constant 2 : index
    %c1_76 = arith.constant 1 : index
    %c0_77 = arith.constant 0 : index
    %c0_78 = arith.constant 0 : index
    %109 = vector.load %arg7[%c2_75, %c1_76, %c0_77, %c0_78] : memref<3x3x128x128xf32, #tpu.memory_space<vmem>>, vector<1x1x128x128xf32>
    %110 = vector.shape_cast %109 : vector<1x1x128x128xf32> to vector<128x128xf32>
    %cst_79 = arith.constant dense<0.000000e+00> : vector<128x128xf32>
    %111 = tpu.matmul %108, %110, %cst_79 {dimension_numbers = #tpu.dot_dimension_numbers<[1], [0], [0], [1], [0, 0, 1, 1], [], []>} : vector<128x128xf32>, vector<128x128xf32>, vector<128x128xf32> -> vector<128x128xf32>
    %112 = arith.addf %106, %111 : vector<128x128xf32>
    %113 = vector.extract_strided_slice %63 {offsets = [2, 2, 0], sizes = [8, 16, 128], strides = [1, 1, 1]} : vector<10x18x128xf32> to vector<8x16x128xf32>
    %114 = vector.shape_cast %113 : vector<8x16x128xf32> to vector<128x128xf32>
    %c2_80 = arith.constant 2 : index
    %c2_81 = arith.constant 2 : index
    %c0_82 = arith.constant 0 : index
    %c0_83 = arith.constant 0 : index
    %115 = vector.load %arg7[%c2_80, %c2_81, %c0_82, %c0_83] : memref<3x3x128x128xf32, #tpu.memory_space<vmem>>, vector<1x1x128x128xf32>
    %116 = vector.shape_cast %115 : vector<1x1x128x128xf32> to vector<128x128xf32>
    %cst_84 = arith.constant dense<0.000000e+00> : vector<128x128xf32>
    %117 = tpu.matmul %114, %116, %cst_84 {dimension_numbers = #tpu.dot_dimension_numbers<[1], [0], [0], [1], [0, 0, 1, 1], [], []>} : vector<128x128xf32>, vector<128x128xf32>, vector<128x128xf32> -> vector<128x128xf32>
    %118 = arith.addf %112, %117 : vector<128x128xf32>
    %119 = vector.shape_cast %118 : vector<128x128xf32> to vector<1x8x16x128xf32>
    %c0_85 = arith.constant 0 : index
    %c0_86 = arith.constant 0 : index
    %c0_87 = arith.constant 0 : index
    %c0_88 = arith.constant 0 : index
    %120 = vector.load %arg8[%c0_85, %c0_86, %c0_87, %c0_88] : memref<1x8x16x128xf32, #tpu.memory_space<vmem>>, vector<1x8x16x128xf32>
    tpu.vector_store %arg8[%c0_85, %c0_86, %c0_87, %c0_88], %119 {strides = array<i32>} : memref<1x8x16x128xf32, #tpu.memory_space<vmem>>, vector<1x8x16x128xf32>,
    %cst_89 = arith.constant 1.000000e+00 : f32
    %121 = vector.broadcast %cst_89 : f32 to vector<1x128xf32>
    %cst_90 = arith.constant dense<0.000000e+00> : vector<1x128xf32>
    %122 = tpu.matmul %121, %118, %cst_90 {dimension_numbers = #tpu.dot_dimension_numbers<[1], [0], [0], [1], [0, 0, 1, 1], [], []>} : vector<1x128xf32>, vector<128x128xf32>, vector<1x128xf32> -> vector<1x128xf32>
    %123 = vector.shape_cast %122 : vector<1x128xf32> to vector<1x1x1x128xf32>
    %c0_91 = arith.constant 0 : index
    %c0_92 = arith.constant 0 : index
    %c0_93 = arith.constant 0 : index
    %c0_94 = arith.constant 0 : index
    %124 = vector.load %arg9[%c0_91, %c0_92, %c0_93, %c0_94] : memref<1x1x2x128xf32, #tpu.memory_space<vmem>>, vector<1x1x1x128xf32>
    tpu.vector_store %arg9[%c0_91, %c0_92, %c0_93, %c0_94], %123 {strides = array<i32>} : memref<1x1x2x128xf32, #tpu.memory_space<vmem>>, vector<1x1x1x128xf32>,
    %125 = arith.mulf %118, %118 : vector<128x128xf32>
    %cst_95 = arith.constant dense<0.000000e+00> : vector<1x128xf32>
    %126 = tpu.matmul %121, %125, %cst_95 {dimension_numbers = #tpu.dot_dimension_numbers<[1], [0], [0], [1], [0, 0, 1, 1], [], []>} : vector<1x128xf32>, vector<128x128xf32>, vector<1x128xf32> -> vector<1x128xf32>
    %127 = vector.shape_cast %126 : vector<1x128xf32> to vector<1x1x1x128xf32>
    %c0_96 = arith.constant 0 : index
    %c0_97 = arith.constant 0 : index
    %c1_98 = arith.constant 1 : index
    %c0_99 = arith.constant 0 : index
    %128 = vector.load %arg9[%c0_96, %c0_97, %c1_98, %c0_99] : memref<1x1x2x128xf32, #tpu.memory_space<vmem>>, vector<1x1x1x128xf32>
    tpu.vector_store %arg9[%c0_96, %c0_97, %c1_98, %c0_99], %127 {strides = array<i32>} : memref<1x1x2x128xf32, #tpu.memory_space<vmem>>, vector<1x1x1x128xf32>,
    return
  }
  func.func @transform_0(%arg0: i32, %arg1: i32) -> (i32, i32, i32, i32) {
    %c0_i32 = arith.constant 0 : i32
    %c0_i32_0 = arith.constant 0 : i32
    %c0_i32_1 = arith.constant 0 : i32
    return %arg0, %arg1, %c0_i32, %c0_i32_0 : i32, i32, i32, i32
  }
  func.func @transform_1(%arg0: i32, %arg1: i32) -> (i32, i32, i32, i32) {
    %c8_i32 = arith.constant 8 : i32
    %0 = arith.muli %arg1, %c8_i32 : i32
    %c1_i32 = arith.constant 1 : i32
    %1 = arith.subi %0, %c1_i32 : i32
    %c0_i32 = arith.constant 0 : i32
    %2 = arith.maxsi %1, %c0_i32 : i32
    %c0_i32_0 = arith.constant 0 : i32
    %c0_i32_1 = arith.constant 0 : i32
    %c0_i32_2 = arith.constant 0 : i32
    return %arg0, %2, %c0_i32_0, %c0_i32_1 : i32, i32, i32, i32
  }
  func.func @transform_2(%arg0: i32, %arg1: i32) -> (i32, i32, i32, i32) {
    %c8_i32 = arith.constant 8 : i32
    %0 = arith.muli %arg1, %c8_i32 : i32
    %c8_i32_0 = arith.constant 8 : i32
    %1 = arith.addi %0, %c8_i32_0 : i32
    %c15_i32 = arith.constant 15 : i32
    %2 = arith.minsi %1, %c15_i32 : i32
    %c0_i32 = arith.constant 0 : i32
    %c0_i32_1 = arith.constant 0 : i32
    %c0_i32_2 = arith.constant 0 : i32
    return %arg0, %2, %c0_i32, %c0_i32_1 : i32, i32, i32, i32
  }
  func.func @transform_3(%arg0: i32, %arg1: i32) -> (i32, i32) {
    %c0_i32 = arith.constant 0 : i32
    %c0_i32_0 = arith.constant 0 : i32
    %c0_i32_1 = arith.constant 0 : i32
    return %c0_i32, %c0_i32_0 : i32, i32
  }
  func.func @transform_4(%arg0: i32, %arg1: i32) -> (i32, i32) {
    %c0_i32 = arith.constant 0 : i32
    %c0_i32_0 = arith.constant 0 : i32
    %c0_i32_1 = arith.constant 0 : i32
    return %c0_i32, %c0_i32_0 : i32, i32
  }
  func.func @transform_5(%arg0: i32, %arg1: i32) -> (i32, i32, i32, i32) {
    %c0_i32 = arith.constant 0 : i32
    %c0_i32_0 = arith.constant 0 : i32
    %c0_i32_1 = arith.constant 0 : i32
    %c0_i32_2 = arith.constant 0 : i32
    %c0_i32_3 = arith.constant 0 : i32
    return %c0_i32, %c0_i32_0, %c0_i32_1, %c0_i32_2 : i32, i32, i32, i32
  }
  func.func @transform_6(%arg0: i32, %arg1: i32) -> (i32, i32, i32, i32) {
    %c0_i32 = arith.constant 0 : i32
    %c0_i32_0 = arith.constant 0 : i32
    %c0_i32_1 = arith.constant 0 : i32
    return %arg0, %arg1, %c0_i32, %c0_i32_0 : i32, i32, i32, i32
  }
  func.func @transform_7(%arg0: i32, %arg1: i32) -> (i32, i32, i32, i32) {
    %c0_i32 = arith.constant 0 : i32
    %c0_i32_0 = arith.constant 0 : i32
    %c0_i32_1 = arith.constant 0 : i32
    return %arg0, %arg1, %c0_i32, %c0_i32_0 : i32, i32, i32, i32
  }
}

</mosaic_0001>

<bundles_post_ra>
// kernel: conv_block.5
= control target key start
LH: loop header
LB: loop body
LE: loop exit
PB: predicated region body
PF: predicated region fallthrough
CT: control target
= control target key end

     0   :  { %s637_s15 = smov 0   ;;  %s639_s16 = smov 0   ;;  %s787_s0 = inlined_call_operand.vmem [shape: f32[2,16,16,128], index: 0, kind: input, shape index: {}]   ;;  %s788_s1 = inlined_call_operand.vmem [shape: f32[2,16,16,128], index: 1, kind: input, shape index: {}]   ;;  %s789_s2 = inlined_call_operand.vmem [shape: f32[1,128], index: 2, kind: input, shape index: {}]   ;;  %s790_s3 = inlined_call_operand.vmem [shape: f32[1,128], index: 3, kind: input, shape index: {}]   ;;  %s791_s4 = inlined_call_operand.vmem [shape: f32[2,16,16,128], index: 4, kind: output, shape index: {}]  }
   0x1   :  { %s641_s17 = smov 0   ;;  %s643_s18 = smov 0  }
   0x2   :  { %s645_s19 = smov 0  }
   0x3 LB: > { %s23_s20 = sadd.s32 1, %s602_s17  ;;  %s26_s21 = sadd.s32 1, %s606_s18  ;;  %s610_s19 = sphi %s645_s19, %s14_s19   ;;  %s606_s18 = sphi %s643_s18, %s795_s18   ;;  %s602_s17 = sphi %s641_s17, %s794_s17   ;;  %s598_s16 = sphi %s639_s16, %s793_s16   ;;  %s594_s15 = sphi %s637_s15, %s792_s15  }
   0x4   : > { %p24_p0 = scmp.ge.s32.totalorder %s23_s20, 2  ;;  %p515_p1 = scmp.ge.s32.totalorder %s610_s19, 1 }
   0x5   : > { %p202_p2 = scmp.lt.s32.totalorder %s610_s19, 5 }
   0x6   : > { %s797_s20 = smov (%p24_p0, %s23_s20), 0  ;;  %s799_s21 = smov (!%p24_p0, %s26_s21), %s606_s18 }
   0x7   : > { %p203_p3 = pnand %p515_p1, %p202_p2  ;;  %p28_p4 = scmp.ge.s32.totalorder %s799_s21, 2 }
   0x8   : > { %s516_s22 = sshll.u32 (!%p203_p3), %s594_s15, 3  ;;  %p249_p5 = scmp.lt.s32.totalorder (!%p203_p3), %s598_s16, 1  ;;  %v670_v0 = vld [vmem:[%s789_s2] ss:$0 sm:$0xff] (!%p203_p3) }
   0x9   : > { %s801_s21 = smov (%p28_p4, %s799_s21), 0  ;;  %206 = sbr.rel (%p203_p3) target bundleno = 42 (0x2a), region = 36 }
   0xa   : > { %p251_p6 = scmp.lt.s32.totalorder (!%p203_p3), %s516_s22, 15  ;;  %v685_v1 = vld [vmem:[%s790_s3] ss:$0 sm:$0xff] (!%p203_p3) }
  0x10   : > { %s803_s16 = smov (!%p249_p5, %s598_s16), 1  ;;  %s805_s22 = smov (!%p251_p6, %s516_s22), 15 }
  0x11   : > { %s518_s23 = sshll.u32 %s803_s16, 5  ;;  %s517_s24 = sshll.u32 %s805_s22, 1 }
  0x12   : > { %s255_s25 = sadd.s32 %s518_s23, %s517_s24 }
  0x13   : > { %s519_s26 = sshll.u32 %s255_s25, 3 }
  0x14   : > { %s675_s5 = scalar_lea.vmem %s787_s0, %s519_s26  ;;  %s680_s8 = scalar_lea.vmem %s788_s1, %s519_s26 }
  0x15   : > { %v283_v2 = vld [vmem:[%s675_s5] sm:$0xff]  ;;  %v284_v4 = vld [vmem:[%s675_s5 + $0x8] sm:$0xff]  ;;  %v285_v7 = vld [vmem:[%s675_s5 + $0x10] sm:$0xff]  ;;  %s706_s13 = scalar_lea.vmem %s791_s4, %s519_s26 }
  0x16   : > { %v299_v3 = vld [vmem:[%s680_s8] sm:$0xff]  ;;  %v300_v6 = vld [vmem:[%s680_s8 + $0x8] sm:$0xff]  ;;  %v301_v8 = vld [vmem:[%s680_s8 + $0x10] sm:$0xff] }
  0x17   : > { %v321_v5 = vmul.f32 %v670_v0, %v299_v3  ;;  %v322_v9 = vmul.f32 %v670_v0, %v300_v6  ;;  %v323_v10 = vmul.f32 %v670_v0, %v301_v8  ;;  %v286_v11 = vld [vmem:[%s675_s5 + $0x18] sm:$0xff]  ;;  %v287_v13 = vld [vmem:[%s675_s5 + $0x20] sm:$0xff]  ;;  %v288_v17 = vld [vmem:[%s675_s5 + $0x28] sm:$0xff] }
  0x18   : > { %v302_v12 = vld [vmem:[%s680_s8 + $0x18] sm:$0xff]  ;;  %v303_v16 = vld [vmem:[%s680_s8 + $0x20] sm:$0xff]  ;;  %v304_v18 = vld [vmem:[%s680_s8 + $0x28] sm:$0xff] }
  0x19   : > { %v337_v14 = vadd.f32 %v321_v5, %v283_v2  ;;  %v324_v15 = vmul.f32 %v670_v0, %v302_v12  ;;  %v338_v19 = vadd.f32 %v322_v9, %v284_v4  ;;  %v339_v20 = vadd.f32 %v323_v10, %v285_v7  ;;  %v289_v23 = vld [vmem:[%s675_s5 + $0x30] sm:$0xff]  ;;  %v290_v28 = vld [vmem:[%s675_s5 + $0x38] sm:$0xff]  ;;  %v307_v30 = vld [vmem:[%s680_s8 + $0x40] sm:$0xff] }
  0x1a   : > { %v325_v21 = vmul.f32 %v670_v0, %v303_v16  ;;  %v326_v22 = vmul.f32 %v670_v0, %v304_v18  ;;  %v305_v24 = vld [vmem:[%s680_s8 + $0x30] sm:$0xff]  ;;  %v306_v29 = vld [vmem:[%s680_s8 + $0x38] sm:$0xff]  ;;  %v291_v35 = vld [vmem:[%s675_s5 + $0x40] sm:$0xff]  ;;  %v329_v41 = vmul.f32 %v670_v0, %v307_v30 }
  0x1b   : > { %v359_v25 = vadd.f32 %v685_v1, %v337_v14  ;;  %v340_v26 = vadd.f32 %v324_v15, %v286_v11  ;;  %v327_v27 = vmul.f32 %v670_v0, %v305_v24  ;;  %v360_v31 = vadd.f32 %v685_v1, %v338_v19  ;;  %v292_v36 = vld [vmem:[%s675_s5 + $0x48] sm:$0xff]  ;;  %v293_v42 = vld [vmem:[%s675_s5 + $0x50] sm:$0xff]  ;;  %v310_v44 = vld [vmem:[%s680_s8 + $0x58] sm:$0xff] }
  0x1c   : > { %v361_v32 = vadd.f32 %v685_v1, %v339_v20  ;;  %v341_v33 = vadd.f32 %v325_v21, %v287_v13  ;;  %v342_v34 = vadd.f32 %v326_v22, %v288_v17  ;;  %v308_v37 = vld [vmem:[%s680_s8 + $0x48] sm:$0xff]  ;;  %v328_v40 = vmul.f32 %v670_v0, %v306_v29  ;;  %v309_v43 = vld [vmem:[%s680_s8 + $0x50] sm:$0xff]  ;;  %v294_v49 = vld [vmem:[%s675_s5 + $0x58] sm:$0xff] }
  0x1d   : > { %375 = vst [vmem:[%s706_s13] sm:$0xff] %v359_v25  ;;  %v362_v38 = vadd.f32 %v685_v1, %v340_v26  ;;  %v343_v39 = vadd.f32 %v327_v27, %v289_v23  ;;  %376 = vst [vmem:[%s706_s13 + $0x8] sm:$0xff] %v360_v31  ;;  %v330_v47 = vmul.f32 %v670_v0, %v308_v37  ;;  %v295_v50 = vld [vmem:[%s675_s5 + $0x60] sm:$0xff]  ;;  %v296_v56 = vld [vmem:[%s675_s5 + $0x68] sm:$0xff] }
  0x1e   : > { %377 = vst [vmem:[%s706_s13 + $0x10] sm:$0xff] %v361_v32  ;;  %v363_v45 = vadd.f32 %v685_v1, %v341_v33  ;;  %v364_v46 = vadd.f32 %v685_v1, %v342_v34  ;;  %v331_v48 = vmul.f32 %v670_v0, %v309_v43  ;;  %v311_v51 = vld [vmem:[%s680_s8 + $0x60] sm:$0xff]  ;;  %v344_v53 = vadd.f32 %v328_v40, %v290_v28  ;;  %v312_v57 = vld [vmem:[%s680_s8 + $0x68] sm:$0xff]  ;;  %v313_v58 = vld [vmem:[%s680_s8 + $0x70] sm:$0xff] }
  0x1f   : > { %378 = vst [vmem:[%s706_s13 + $0x18] sm:$0xff] %v362_v38  ;;  %v365_v52 = vadd.f32 %v685_v1, %v343_v39  ;;  %v345_v54 = vadd.f32 %v329_v41, %v291_v35  ;;  %v332_v55 = vmul.f32 %v670_v0, %v310_v44  ;;  %v346_v59 = vadd.f32 %v330_v47, %v292_v36  ;;  %v297_v63 = vld [vmem:[%s675_s5 + $0x70] sm:$0xff]  ;;  %v314_v2 = vld [vmem:[%s680_s8 + $0x78] sm:$0xff] }
  0x20   : > { %379 = vst [vmem:[%s706_s13 + $0x20] sm:$0xff] %v363_v45  ;;  %380 = vst [vmem:[%s706_s13 + $0x28] sm:$0xff] %v364_v46  ;;  %v347_v60 = vadd.f32 %v331_v48, %v293_v42  ;;  %v333_v61 = vmul.f32 %v670_v0, %v311_v51  ;;  %v334_v62 = vmul.f32 %v670_v0, %v312_v57  ;;  %v298_v11 = vld [vmem:[%s675_s5 + $0x78] sm:$0xff] }
  0x21   : > { %381 = vst [vmem:[%s706_s13 + $0x30] sm:$0xff] %v365_v52  ;;  %v366_v3 = vadd.f32 %v685_v1, %v344_v53  ;;  %v367_v4 = vadd.f32 %v685_v1, %v345_v54  ;;  %v348_v5 = vadd.f32 %v332_v55, %v294_v49  ;;  %v335_v6 = vmul.f32 %v670_v0, %v313_v58 }
  0x22   : > { %v368_v7 = vadd.f32 %v685_v1, %v346_v59  ;;  %v369_v8 = vadd.f32 %v685_v1, %v347_v60  ;;  %v349_v9 = vadd.f32 %v333_v61, %v295_v50  ;;  %v350_v10 = vadd.f32 %v334_v62, %v296_v56 }
  0x23   : > { %382 = vst [vmem:[%s706_s13 + $0x38] sm:$0xff] %v366_v3  ;;  %383 = vst [vmem:[%s706_s13 + $0x40] sm:$0xff] %v367_v4  ;;  %v370_v12 = vadd.f32 %v685_v1, %v348_v5  ;;  %v351_v13 = vadd.f32 %v335_v6, %v297_v63  ;;  %v336_v14 = vmul.f32 %v670_v0, %v314_v2 }
  0x24   : > { %384 = vst [vmem:[%s706_s13 + $0x48] sm:$0xff] %v368_v7  ;;  %385 = vst [vmem:[%s706_s13 + $0x50] sm:$0xff] %v369_v8  ;;  %v371_v15 = vadd.f32 %v685_v1, %v349_v9  ;;  %v372_v16 = vadd.f32 %v685_v1, %v350_v10 }
  0x25   : > { %386 = vst [vmem:[%s706_s13 + $0x58] sm:$0xff] %v370_v12  ;;  %v373_v17 = vadd.f32 %v685_v1, %v351_v13  ;;  %v352_v18 = vadd.f32 %v336_v14, %v298_v11 }
  0x26   : > { %387 = vst [vmem:[%s706_s13 + $0x60] sm:$0xff] %v371_v15  ;;  %388 = vst [vmem:[%s706_s13 + $0x68] sm:$0xff] %v372_v16 }
  0x27   : > { %389 = vst [vmem:[%s706_s13 + $0x70] sm:$0xff] %v373_v17  ;;  %v374_v19 = vadd.f32 %v685_v1, %v352_v18 }
  0x29   : > { %390 = vst [vmem:[%s706_s13 + $0x78] sm:$0xff] %v374_v19 }
  0x2a PF: > { %s14_s19 = sadd.s32 1, %s610_s19   ;;  %s792_s15 = smov %s602_s17 }
  0x2b   : > { %p11_p7 = scmp.ge.s32.totalorder %s14_s19, 6   ;;  %s793_s16 = smov %s606_s18 }
  0x2c   : > { %s794_s17 = smov %s797_s20  ;;  %s795_s18 = smov %s801_s21 }
  0x2d   :  { %13 = sbr.rel (!%p11_p7) target bundleno = 3 (0x3), region = 69 }

// kernel: conv_block.3
= control target key start
LH: loop header
LB: loop body
LE: loop exit
PB: predicated region body
PF: predicated region fallthrough
CT: control target
= control target key end

     0   :  { %s4271_s18 = smov 0   ;;  %s4273_s19 = smov 0   ;;  %s5319_s0 = inlined_call_operand.vmem [shape: f32[2,16,16,128], index: 0, kind: input, shape index: {}, may-alias: {0,1,2}]   ;;  %s5320_s1 = inlined_call_operand.vmem [shape: f32[2,16,16,128], index: 1, kind: input, shape index: {}, may-alias: {0,1,2}]   ;;  %s5321_s2 = inlined_call_operand.vmem [shape: f32[2,16,16,128], index: 2, kind: input, shape index: {}, may-alias: {0,1,2}]   ;;  %s5322_s3 = inlined_call_operand.vmem [shape: f32[3,3,128,128], index: 3, kind: input, shape index: {}]   ;;  %s5323_s4 = inlined_call_operand.vmem [shape: f32[2,16,16,128], index: 4, kind: output, shape index: {0}]   ;;  %s5324_s5 = inlined_call_operand.vmem [shape: f32[2,2,2,128], index: 5, kind: output, shape index: {1}]  }
   0x1   :  { %s4275_s20 = smov 0   ;;  %s4277_s21 = smov 0  }
   0x2   :  { %s4279_s22 = smov 0  }
   0x3 LB: > { %s25_s23 = sadd.s32 1, %s4227_s20  ;;  %s28_s24 = sadd.s32 1, %s4231_s21  ;;  %s4235_s22 = sphi %s4279_s22, %s16_s22   ;;  %s4231_s21 = sphi %s4277_s21, %s5329_s21   ;;  %s4227_s20 = sphi %s4275_s20, %s5328_s20   ;;  %s4223_s19 = sphi %s4273_s19, %s5327_s19   ;;  %s4219_s18 = sphi %s4271_s18, %s5326_s18  }
   0x4   : > { %p26_p0 = scmp.ge.s32.totalorder %s25_s23, 2  ;;  %p2631_p1 = scmp.ge.s32.totalorder %s4235_s22, 1 }
   0x5   : > { %p278_p2 = scmp.lt.s32.totalorder %s4235_s22, 5 }
   0x6   : > { %s5331_s23 = smov (%p26_p0, %s25_s23), 0  ;;  %s5333_s24 = smov (!%p26_p0, %s28_s24), %s4231_s21 }
   0x7   : > { %p279_p3 = pnand %p2631_p1, %p278_p2  ;;  %p30_p4 = scmp.ge.s32.totalorder %s5333_s24, 2 }
   0x8   : > { %v2659_v0 = vld [vmem:[%s5322_s3 + $0x80] sm:$0xff] (!%p279_p3)  ;;  %v2660_v1 = vld [vmem:[%s5322_s3 + $0x88] sm:$0xff] (!%p279_p3)  ;;  %s4315_s6 = sshll.u32 (!%p279_p3), %s4219_s18, 3  ;;  %p351_p5 = scmp.lt.s32.totalorder (!%p279_p3), %s4223_s19, 1  ;;  %v2661_v5 = vld [vmem:[%s5322_s3 + $0x90] sm:$0xff] (!%p279_p3)  ;;  %v4237_v7 = vmov (!%p279_p3), 0.0  }
   0x9   : > { %s5335_s24 = smov (%p30_p4, %s5333_s24), 0  ;;  %282 = sbr.rel (%p279_p3) target bundleno = 666 (0x29a), region = 36 }
   0xa   : > { %v2707_v2 = vld [vmem:[%s5322_s3 + $0x200] sm:$0xff] (!%p279_p3)  ;;  %v3687_v3 = vpack.c.bf16 (!%p279_p3), %v2660_v1, %v2659_v0  ;;  %v2708_v4 = vld [vmem:[%s5322_s3 + $0x208] sm:$0xff] (!%p279_p3)  ;;  %v2662_v6 = vld [vmem:[%s5322_s3 + $0x98] sm:$0xff] (!%p279_p3)  ;;  %p353_p6 = scmp.lt.s32.totalorder (!%p279_p3), %s4315_s6, 15  ;;  %s4329_s13 = sadd.s32 (!%p279_p3), 4294967295, %s4315_s6  ;;  %vm558_vm0 = vcmask (!%p279_p3), 1046528  }
   0xb   : > { %468 = vst [vmem:[#allocation2] sm:$0x1] (!%p279_p3), %v4237_v7  ;;  %469 = vst [vmem:[#allocation2 + $0x18] sm:$0x1] (!%p279_p3), %v4237_v7  ;;  %v3815_v8 = vpack.c.bf16 (!%p279_p3), %v2708_v4, %v2707_v2  ;;  %v3691_v9 = vpack.c.bf16 (!%p279_p3), %v2662_v6, %v2661_v5  ;;  %v2709_v10 = vld [vmem:[%s5322_s3 + $0x210] sm:$0xff] (!%p279_p3)  ;;  %v2710_v11 = vld [vmem:[%s5322_s3 + $0x218] sm:$0xff] (!%p279_p3) }
   0xc   : > { %470 = vst [vmem:[#allocation2 + $0x30] sm:$0x1] (!%p279_p3), %v4237_v7  ;;  %471 = vst [vmem:[#allocation2 + $0x48] sm:$0x1] (!%p279_p3), %v4237_v7  ;;  %v2663_v12 = vld [vmem:[%s5322_s3 + $0xa0] sm:$0xff] (!%p279_p3)  ;;  %3688 = vmatprep.subr.bf16.mxu1 (!%p279_p3), %v3687_v3  ;;  %v3819_v13 = vpack.c.bf16 (!%p279_p3), %v2710_v11, %v2709_v10  ;;  %v2664_v14 = vld [vmem:[%s5322_s3 + $0xa8] sm:$0xff] (!%p279_p3) }
   0xd   : > { %472 = vst [vmem:[#allocation2 + $0x60] sm:$0x1] (!%p279_p3), %v4237_v7  ;;  %473 = vst [vmem:[#allocation2 + $0x78] sm:$0x1] (!%p279_p3), %v4237_v7  ;;  %v2711_v15 = vld [vmem:[%s5322_s3 + $0x220] sm:$0xff] (!%p279_p3)  ;;  %v2712_v16 = vld [vmem:[%s5322_s3 + $0x228] sm:$0xff] (!%p279_p3)  ;;  %3816 = vmatprep.subr.bf16.mxu0 (!%p279_p3), %v3815_v8  ;;  %3690 = vmatpush3.bf16.msra.mxu1 (!%p279_p3), %v3687_v3  ;;  %v3695_v17 = vpack.c.bf16 (!%p279_p3), %v2664_v14, %v2663_v12 }
   0xe   : > { %474 = vst [vmem:[#allocation2 + $0x90] sm:$0x1] (!%p279_p3), %v4237_v7  ;;  %475 = vst [vmem:[#allocation2 + $0xa8] sm:$0x1] (!%p279_p3), %v4237_v7  ;;  %3818 = vmatpush3.bf16.msra.mxu0 (!%p279_p3), %v3815_v8  ;;  %3692 = vmatprep.subr.bf16.mxu1 (!%p279_p3), %v3691_v9  ;;  %p363_p7 = scmp.gt.s32.totalorder (!%p279_p3), %s4329_s13, 0  ;;  %v3823_v18 = vpack.c.bf16 (!%p279_p3), %v2712_v16, %v2711_v15  ;;  %v2665_v19 = vld [vmem:[%s5322_s3 + $0xb0] sm:$0xff] (!%p279_p3) }
   0xf   : > { %476 = vst [vmem:[#allocation2 + $0xc0] sm:$0x1] (!%p279_p3), %v4237_v7  ;;  %477 = vst [vmem:[#allocation2 + $0xd8] sm:$0x1] (!%p279_p3), %v4237_v7  ;;  %3820 = vmatprep.subr.bf16.mxu0 (!%p279_p3), %v3819_v13  ;;  %v2666_v20 = vld [vmem:[%s5322_s3 + $0xb8] sm:$0xff] (!%p279_p3)  ;;  %p414_p8 = scmp.gt.s32.totalorder (!%p279_p3), %s4219_s18, 0 }
  0x10   : > { %478 = vst [vmem:[#allocation2 + $0x11] sm:$0x1] %v4237_v7  ;;  %479 = vst [vmem:[#allocation2 + $0x29] sm:$0x1] %v4237_v7  ;;  %s5337_s19 = smov (!%p351_p5, %s4223_s19), 1  ;;  %v2713_v21 = vld [vmem:[%s5322_s3 + $0x230] sm:$0xff]  ;;  %v3699_v23 = vpack.c.bf16 %v2666_v20, %v2665_v19 }
  0x11   : > { %480 = vst [vmem:[#allocation2 + $0x41] sm:$0x1] %v4237_v7  ;;  %481 = vst [vmem:[#allocation2 + $0x59] sm:$0x1] %v4237_v7  ;;  %s354_s9 = scalar_select %p353_p6, %s4315_s6, 15  ;;  %v2714_v22 = vld [vmem:[%s5322_s3 + $0x238] sm:$0xff]  ;;  %3694 = vmatpush3.bf16.msra.mxu1 %v3691_v9 }
  0x12   : > { %482 = vst [vmem:[#allocation2 + $0x71] sm:$0x1] %v4237_v7  ;;  %483 = vst [vmem:[#allocation2 + $0x89] sm:$0x1] %v4237_v7  ;;  %s4378_s10 = sshll.u32 %s5337_s19, 5  ;;  %p2638_p9 = scmp.lt.s32.totalorder %s4329_s13, 15  ;;  %3822 = vmatpush3.bf16.msra.mxu0 %v3819_v13  ;;  %3696 = vmatprep.subr.bf16.mxu1 %v3695_v17  ;;  %v3827_v24 = vpack.c.bf16 %v2714_v22, %v2713_v21 }
  0x13   : > { %484 = vst [vmem:[#allocation2 + $0xa1] sm:$0x1] %v4237_v7  ;;  %485 = vst [vmem:[#allocation2 + $0xb9] sm:$0x1] %v4237_v7  ;;  %s2633_s11 = sshll.u32 %s354_s9, 1  ;;  %3824 = vmatprep.subr.bf16.mxu0 %v3823_v18  ;;  %v2667_v25 = vld [vmem:[%s5322_s3 + $0xc0] sm:$0xff] }
  0x14   : > { %486 = vst [vmem:[#allocation2 + $0xd1] sm:$0x1] %v4237_v7  ;;  %487 = vst [vmem:[#allocation2 + $0xe9] sm:$0x1] %v4237_v7  ;;  %s4388_s17 = sadd.s32 %s4378_s10, %s2633_s11  ;;  %v2668_v26 = vld [vmem:[%s5322_s3 + $0xc8] sm:$0xff]  ;;  %v2715_v28 = vld [vmem:[%s5322_s3 + $0x240] sm:$0xff] }
  0x15   : > { %s2635_s29 = sshll.u32 %s4388_s17, 3  ;;  %v2716_v29 = vld [vmem:[%s5322_s3 + $0x248] sm:$0xff]  ;;  %3698 = vmatpush3.bf16.msra.mxu1 %v3695_v17  ;;  %v3703_v32 = vpack.c.bf16 %v2668_v26, %v2667_v25  ;;  %v2669_v35 = vld [vmem:[%s5322_s3 + $0xd0] sm:$0xff]  ;;  %v2670_v36 = vld [vmem:[%s5322_s3 + $0xd8] sm:$0xff]  ;;  %s379_s11 = sadd.s32 8, %s4315_s6  ;;  %vm922_vm1 = vcmask 1045504  }
  0x16   : > { %s4404_s8 = scalar_lea.vmem %s5319_s0, %s2635_s29  ;;  %3826 = vmatpush3.bf16.msra.mxu0 %v3823_v18  ;;  %3700 = vmatprep.subr.bf16.mxu1 %v3699_v23  ;;  %v3831_v34 = vpack.c.bf16 %v2716_v29, %v2715_v28  ;;  %v2717_v38 = vld [vmem:[%s5322_s3 + $0x250] sm:$0xff]  ;;  %v2718_v39 = vld [vmem:[%s5322_s3 + $0x258] sm:$0xff]  ;;  %v3707_v43 = vpack.c.bf16 %v2670_v36, %v2669_v35  ;;  %v2671_v48 = vld [vmem:[%s5322_s3 + $0xe0] sm:$0xff]  ;;  %p4546_p10 = scmp.lt.s32.totalorder %s379_s11, 15  ;;  %vm4239_vm2 = vmmov 0  }
  0x17   : > { %s364_s9 = scalar_select %p363_p7, %s4329_s13, 0  ;;  %v430_v27 = vld [vmem:[%s4404_s8] sm:$0xff]  ;;  %v431_v30 = vld [vmem:[%s4404_s8 + $0x8] sm:$0xff]  ;;  %v432_v31 = vld [vmem:[%s4404_s8 + $0x10] sm:$0xff]  ;;  %3828 = vmatprep.subr.bf16.mxu0 %v3827_v24  ;;  %v3835_v47 = vpack.c.bf16 %v2718_v39, %v2717_v38 }
  0x18   : > { %s415_s16 = scalar_select %p414_p8, 1, 0  ;;  %449 = vst [vmem:[#allocation2 + $0x19] sm:$0xff] %v430_v27  ;;  %450 = vst [vmem:[#allocation2 + $0x21] sm:$0xff] %v431_v30  ;;  %v433_v33 = vld [vmem:[%s4404_s8 + $0x18] sm:$0xff]  ;;  %v434_v37 = vld [vmem:[%s4404_s8 + $0x20] sm:$0xff] }
  0x19   : > { %s5339_s9 = smov (!%p2638_p9, %s364_s9), 15  ;;  %451 = vst [vmem:[#allocation2 + $0x31] sm:$0xff] %v432_v31  ;;  %452 = vst [vmem:[#allocation2 + $0x39] sm:$0xff] %v433_v33  ;;  %v435_v41 = vld [vmem:[%s4404_s8 + $0x28] sm:$0xff]  ;;  %3702 = vmatpush3.bf16.msra.mxu1 %v3699_v23  ;;  %v436_v42 = vld [vmem:[%s4404_s8 + $0x30] sm:$0xff]  ;;  %s5341_s11 = smov (!%p4546_p10, %s379_s11), 15 }
  0x1a   : > { %s416_s30 = scvt.s32.f32 %s415_s16  ;;  %s2643_s7 = sshll.u32 %s5339_s9, 1  ;;  %453 = vst [vmem:[#allocation2 + $0x49] sm:$0xff] %v434_v37  ;;  %454 = vst [vmem:[#allocation2 + $0x51] sm:$0xff] %v435_v41  ;;  %3830 = vmatpush3.bf16.msra.mxu0 %v3827_v24  ;;  %3704 = vmatprep.subr.bf16.mxu1 %v3703_v32  ;;  %v437_v46 = vld [vmem:[%s4404_s8 + $0x38] sm:$0xff]  ;;  %v2672_v49 = vld [vmem:[%s5322_s3 + $0xe8] sm:$0xff] }
  0x1b   : > { %s371_s15 = sadd.s32 %s2643_s7, %s4378_s10  ;;  %455 = vst [vmem:[#allocation2 + $0x61] sm:$0xff] %v436_v42  ;;  %3832 = vmatprep.subr.bf16.mxu0 %v3831_v34  ;;  %456 = vst [vmem:[#allocation2 + $0x69] sm:$0xff] %v437_v46  ;;  %v2719_v53 = vld [vmem:[%s5322_s3 + $0x260] sm:$0xff]  ;;  %v2720_v54 = vld [vmem:[%s5322_s3 + $0x268] sm:$0xff]  ;;  %v3711_v59 = vpack.c.bf16 %v2672_v49, %v2671_v48  ;;  %s5343_s11 = smov (!%p4546_p10, %s5341_s11), 15 }
  0x1c   : > { %s2645_s27 = sshll.u32 %s371_s15, 3  ;;  %v422_v40 = vstv %s416_s30  ;;  %v438_v58 = vld [vmem:[%s4404_s8 + $0x40] sm:$0xff]  ;;  %v439_v60 = vld [vmem:[%s4404_s8 + $0x48] sm:$0xff]  ;;  %v3839_v61 = vpack.c.bf16 %v2720_v54, %v2719_v53  ;;  %v2673_v62 = vld [vmem:[%s5322_s3 + $0xf0] sm:$0xff]  ;;  %p408_p11 = scmp.lt.s32.totalorder %s4219_s18, 1 }
  0x1d   : > { %s373_s7 = scalar_lea.vmem %s5320_s1, %s2645_s27  ;;  %3706 = vmatpush3.bf16.msra.mxu1 %v3703_v32  ;;  %457 = vst [vmem:[#allocation2 + $0x79] sm:$0xff] %v438_v58  ;;  %v2674_v63 = vld [vmem:[%s5322_s3 + $0xf8] sm:$0xff]  ;;  %458 = vst [vmem:[#allocation2 + $0x81] sm:$0xff] %v439_v60  ;;  %v2721_v1 = vld [vmem:[%s5322_s3 + $0x270] sm:$0xff]  ;;  %s4648_s15 = sshll.u32 %s5343_s11, 1 }
  0x1e   : > { %v420_v44 = vld [vmem:[%s373_s7] sm:$0xff]  ;;  %v421_v45 = vld [vmem:[%s373_s7 + $0x8] sm:$0xff]  ;;  %3834 = vmatpush3.bf16.msra.mxu0 %v3831_v34  ;;  %3708 = vmatprep.subr.bf16.mxu1 %v3707_v43  ;;  %v2722_v2 = vld [vmem:[%s5322_s3 + $0x278] sm:$0xff]  ;;  %v3715_v4 = vpack.c.bf16 %v2674_v63, %v2673_v62  ;;  %s4661_s11 = scalar_select %p408_p11, 1, 0 }
  0x1f   : > { %v423_v50 = vmul.f32 %v422_v40, %v420_v44  ;;  %v424_v51 = vmul.f32 %v422_v40, %v421_v45  ;;  %v4455_v52 = vld [vmem:[#allocation2 + $0x18] sm:$0xff]  ;;  %v4463_v55 = vld [vmem:[#allocation2 + $0x20] sm:$0xff]  ;;  %3836 = vmatprep.subr.bf16.mxu0 %v3835_v47  ;;  %v440_v3 = vld [vmem:[%s4404_s8 + $0x50] sm:$0xff]  ;;  %v3843_v9 = vpack.c.bf16 %v2722_v2, %v2721_v1  ;;  %s388_s28 = sadd.s32 %s4648_s15, %s4378_s10  ;;  %s5226_s16 = scalar_lea.vmem %s5323_s4, %s2635_s29 }
  0x20   : > { %v564_v56 = vrot.slane %v4455_v52, 1  ;;  %v565_v57 = vrot.slane %v4463_v55, 1  ;;  %v518_v5 = vld [vmem:[%s5322_s3] sm:$0xff]  ;;  %v519_v6 = vld [vmem:[%s5322_s3 + $0x8] sm:$0xff]  ;;  %v441_v8 = vld [vmem:[%s4404_s8 + $0x58] sm:$0xff]  ;;  %459 = vst [vmem:[#allocation2 + $0x91] sm:$0xff] %v440_v3  ;;  %s419_s30 = scvt.s32.f32 %s4661_s11 }
  0x21   : > { %446 = vst [vmem:[#allocation2 + $0x1] sm:$0xff] %v423_v50  ;;  %447 = vst [vmem:[#allocation2 + $0x9] sm:$0xff] %v424_v51  ;;  %3710 = vmatpush3.bf16.msra.mxu1 %v3707_v43  ;;  %v4495_v10 = vld [vmem:[#allocation2 + $0x28] sm:$0x3]  ;;  %v2723_v11 = vld [vmem:[%s5322_s3 + $0x280] sm:$0xff]  ;;  %v3719_v21 = vpack.c.bf16 %v519_v6, %v518_v5  ;;  %s2652_s10 = sshll.u32 %s388_s28, 3 }
  0x22   : > { %v4478_v0 = vsel %vm558_vm0, %v564_v56, %v565_v57  ;;  %3838 = vmatpush3.bf16.msra.mxu0 %v3835_v47  ;;  %3712 = vmatprep.subr.bf16.mxu1 %v3711_v59  ;;  %v2724_v12 = vld [vmem:[%s5322_s3 + $0x288] sm:$0xff]  ;;  %460 = vst [vmem:[#allocation2 + $0x99] sm:$0xff] %v441_v8  ;;  %v4512_v19 = vld [vmem:[#allocation2 + $0x30] sm:$0xff]  ;;  %v4514_v20 = vld [vmem:[#allocation2 + $0x38] sm:$0xff]  ;;  %v567_v22 = vrot.slane %v4495_v10, 1  ;;  %s390_s9 = scalar_lea.vmem %s5321_s2, %s2652_s10  ;;  %s5345_s18 = smov (!%p408_p11, %s4219_s18), 1 }
  0x23   : > { %3369 = vmatprep.mubr.f32.mxu0 %v4478_v0  ;;  %3840 = vmatprep.subr.bf16.mxu0 %v3839_v61  ;;  %v520_v23 = vld [vmem:[%s5322_s3 + $0x10] sm:$0xff]  ;;  %v442_v24 = vld [vmem:[%s4404_s8 + $0x60] sm:$0xff]  ;;  %v3847_v26 = vpack.c.bf16 %v2724_v12, %v2723_v11  ;;  %v521_v27 = vld [vmem:[%s5322_s3 + $0x18] sm:$0xff]  ;;  %v569_v30 = vrot.slane %v4512_v19, 1  ;;  %v570_v31 = vrot.slane %v4514_v20, 1  ;;  %s2657_s17 = sshll.u32 %s5337_s19, 1 }
  0x24   : > { %v4526_v28 = vld [vmem:[#allocation2 + $0x40] sm:$0x3]  ;;  %v443_v29 = vld [vmem:[%s4404_s8 + $0x68] sm:$0xff]  ;;  %461 = vst [vmem:[#allocation2 + $0xa9] sm:$0xff] %v442_v24  ;;  %v2725_v32 = vld [vmem:[%s5322_s3 + $0x290] sm:$0xff]  ;;  %v568_v39 = vsel %vm558_vm0, %v565_v57, %v567_v22  ;;  %v3723_v41 = vpack.c.bf16 %v521_v27, %v520_v23  ;;  %s411_s29 = sadd.s32 %s2657_s17, %s5345_s18 }
  0x25   : > { %3714 = vmatpush3.bf16.msra.mxu1 %v3711_v59  ;;  %v2726_v33 = vld [vmem:[%s5322_s3 + $0x298] sm:$0xff]  ;;  %462 = vst [vmem:[#allocation2 + $0xb1] sm:$0xff] %v443_v29  ;;  %v444_v34 = vld [vmem:[%s4404_s8 + $0x70] sm:$0xff]  ;;  %v4539_v36 = vld [vmem:[#allocation2 + $0x48] sm:$0xff]  ;;  %v572_v40 = vrot.slane %v4526_v28, 1  ;;  %v4557_v43 = vsel %vm558_vm0, %v569_v30, %v570_v31  ;;  %s2658_s25 = sshll.u32 %s411_s29, 1 }
  0x26   : > { %3842 = vmatpush3.bf16.msra.mxu0 %v3839_v61  ;;  %3716 = vmatprep.subr.bf16.mxu1 %v3715_v4  ;;  %v4541_v37 = vld [vmem:[#allocation2 + $0x50] sm:$0xff]  ;;  %v445_v38 = vld [vmem:[%s4404_s8 + $0x78] sm:$0xff]  ;;  %463 = vst [vmem:[#allocation2 + $0xc1] sm:$0xff] %v444_v34  ;;  %v3851_v44 = vpack.c.bf16 %v2726_v33, %v2725_v32  ;;  %v574_v45 = vrot.slane %v4539_v36, 1  ;;  %v522_v47 = vld [vmem:[%s5322_s3 + $0x20] sm:$0xff]  ;;  %s413_s27 = scalar_lea.vmem %s5324_s5, %s2658_s25 }
  0x27   : > { %3844 = vmatprep.subr.bf16.mxu0 %v3843_v9  ;;  %464 = vst [vmem:[#allocation2 + $0xc9] sm:$0xff] %v445_v38  ;;  %v4554_v42 = vld [vmem:[#allocation2 + $0x58] sm:$0x3]  ;;  %v575_v46 = vrot.slane %v4541_v37, 1  ;;  %v523_v48 = vld [vmem:[%s5322_s3 + $0x28] sm:$0xff]  ;;  %v2727_v49 = vld [vmem:[%s5322_s3 + $0x2a0] sm:$0xff]  ;;  %v4585_v54 = vsel %vm558_vm0, %v570_v31, %v572_v40 }
  0x28   : > { %v4503_v13 = vld [vmem:[#allocation2] sm:$0xff]  ;;  %v4505_v14 = vld [vmem:[#allocation2 + $0x8] sm:$0xff]  ;;  %v4507_v15 = vld [vmem:[#allocation2 + $0x10] sm:$0x3]  ;;  %v577_v56 = vrot.slane %v4554_v42, 1  ;;  %v3727_v57 = vpack.c.bf16 %v523_v48, %v522_v47 }
  0x29   : > { %v559_v16 = vrot.slane %v4503_v13, 1  ;;  %v560_v17 = vrot.slane %v4505_v14, 1  ;;  %v562_v18 = vrot.slane %v4507_v15, 1  ;;  %3718 = vmatpush3.bf16.msra.mxu1 %v3715_v4  ;;  %v2728_v50 = vld [vmem:[%s5322_s3 + $0x2a8] sm:$0xff]  ;;  %v4573_v51 = vld [vmem:[#allocation2 + $0x60] sm:$0xff]  ;;  %v4592_v59 = vsel %vm558_vm0, %v574_v45, %v575_v46  ;;  %v524_v63 = vld [vmem:[%s5322_s3 + $0x30] sm:$0xff] }
  0x2a   : > { %3846 = vmatpush3.bf16.msra.mxu0 %v3843_v9  ;;  %3720 = vmatprep.subr.bf16.mxu1 %v3719_v21  ;;  %v4575_v53 = vld [vmem:[#allocation2 + $0x68] sm:$0xff]  ;;  %v4589_v58 = vld [vmem:[#allocation2 + $0x70] sm:$0x3]  ;;  %v3855_v60 = vpack.c.bf16 %v2728_v50, %v2727_v49  ;;  %v579_v61 = vrot.slane %v4573_v51, 1  ;;  %v2730_v2 = vld [vmem:[%s5322_s3 + $0x2b8] sm:$0xff]  ;;  %v4618_v5 = vsel %vm558_vm0, %v575_v46, %v577_v56  ;;  %v926_v29 = vrot.slane %v4507_v15, 2 }
  0x2b   : > { %v561_v25 = vsel %vm558_vm0, %v559_v16, %v560_v17  ;;  %v563_v35 = vsel %vm558_vm0, %v560_v17, %v562_v18  ;;  %3848 = vmatprep.subr.bf16.mxu0 %v3847_v26  ;;  %v580_v62 = vrot.slane %v4575_v53, 1  ;;  %v2729_v1 = vld [vmem:[%s5322_s3 + $0x2b0] sm:$0xff]  ;;  %v4609_v3 = vld [vmem:[#allocation2 + $0x78] sm:$0xff]  ;;  %v4611_v4 = vld [vmem:[#allocation2 + $0x80] sm:$0xff]  ;;  %v582_v6 = vrot.slane %v4589_v58, 1 }
  0x2c   : > { %3145 = vmatprep.mubr.f32.mxu1 %v561_v25  ;;  %v4622_v9 = vld [vmem:[#allocation2 + $0x88] sm:$0x3]  ;;  %v3859_v12 = vpack.c.bf16 %v2730_v2, %v2729_v1  ;;  %v584_v16 = vrot.slane %v4609_v3, 1  ;;  %v585_v17 = vrot.slane %v4611_v4, 1  ;;  %v526_v18 = vld [vmem:[%s5322_s3 + $0x40] sm:$0xff]  ;;  %v4644_v24 = vld [vmem:[#allocation2 + $0x90] sm:$0xff] }
  0x2d   : > { %3146 = vmatmul.mubr.f32.vlgmr.msra.gmra.mrb[0].mxu1 %v563_v35  ;;  %3370 = vmatmul.mubr.f32.vlgmr.msra.gmra.mrb[0].mxu0 %v568_v39  ;;  %v4627_v11 = vsel %vm558_vm0, %v579_v61, %v580_v62  ;;  %v2731_v22 = vld [vmem:[%s5322_s3 + $0x2c0] sm:$0xff]  ;;  %v2732_v23 = vld [vmem:[%s5322_s3 + $0x2c8] sm:$0xff]  ;;  %v4646_v25 = vld [vmem:[#allocation2 + $0x98] sm:$0xff]  ;;  %v587_v27 = vrot.slane %v4622_v9, 1  ;;  %v589_v34 = vrot.slane %v4644_v24, 1  ;;  %v923_v45 = vrot.slane %v4503_v13, 2 }
  0x2e   : > { %3722 = vmatpush3.bf16.msra.mxu1 %v3719_v21  ;;  %3850 = vmatpush3.bf16.msra.mxu0 %v3847_v26  ;;  %v527_v21 = vld [vmem:[%s5322_s3 + $0x48] sm:$0xff]  ;;  %v4652_v26 = vsel %vm558_vm0, %v580_v62, %v582_v6  ;;  %v4657_v31 = vld [vmem:[#allocation2 + $0xa0] sm:$0x3]  ;;  %v4665_v32 = vsel %vm558_vm0, %v584_v16, %v585_v17  ;;  %v3863_v33 = vpack.c.bf16 %v2732_v23, %v2731_v22  ;;  %v590_v15 = vrot.slane %v4646_v25, 1  ;;  %v528_v35 = vld [vmem:[%s5322_s3 + $0x50] sm:$0xff] }
  0x2f   : > { %3148 = vmatprep.mubr.f32.mxu1 %v4478_v0  ;;  %3372 = vmatprep.mubr.f32.mxu0 %v4557_v43  ;;  %v525_v0 = vld [vmem:[%s5322_s3 + $0x38] sm:$0xff]  ;;  %v3735_v30 = vpack.c.bf16 %v527_v21, %v526_v18  ;;  %v924_v46 = vrot.slane %v4505_v14, 2  ;;  %v4692_v47 = vsel %vm558_vm0, %v585_v17, %v587_v27  ;;  %v592_v48 = vrot.slane %v4657_v31, 1  ;;  %v531_v1 = vld [vmem:[%s5322_s3 + $0x68] sm:$0xff]  ;;  %v2735_v2 = vld [vmem:[%s5322_s3 + $0x2e0] sm:$0xff] }
  0x30   : > { %3724 = vmatprep.subr.bf16.mxu1 %v3723_v41  ;;  %3852 = vmatprep.subr.bf16.mxu0 %v3851_v44  ;;  %v3731_v8 = vpack.c.bf16 %v525_v0, %v524_v63  ;;  %v529_v38 = vld [vmem:[%s5322_s3 + $0x58] sm:$0xff]  ;;  %v530_v0 = vld [vmem:[%s5322_s3 + $0x60] sm:$0xff]  ;;  %v2736_v6 = vld [vmem:[%s5322_s3 + $0x2e8] sm:$0xff]  ;;  %v427_v22 = vstv %s419_s30 }
  0x31   : > { %3149 = vmatmul.mubr.f32.gmra.mrb[2].mxu1 %v568_v39  ;;  %3373 = vmatmul.mubr.f32.gmra.mrb[2].mxu0 %v4585_v54  ;;  %v2733_v39 = vld [vmem:[%s5322_s3 + $0x2d0] sm:$0xff]  ;;  %v2734_v40 = vld [vmem:[%s5322_s3 + $0x2d8] sm:$0xff]  ;;  %v3739_v49 = vpack.c.bf16 %v529_v38, %v528_v35  ;;  %v4699_v56 = vsel %vm922_vm1, %v923_v45, %v924_v46  ;;  %v4730_v16 = vsel %vm558_vm0, %v590_v15, %v592_v48  ;;  %v425_v38 = vld [vmem:[%s390_s9] sm:$0xff] }
  0x32   : > { %3726 = vmatpush3.bf16.msra.mxu1 %v3723_v41  ;;  %3854 = vmatpush3.bf16.msra.mxu0 %v3851_v44  ;;  %v4684_v41 = vld [vmem:[#allocation2 + $0xa8] sm:$0xff]  ;;  %v4686_v44 = vld [vmem:[#allocation2 + $0xb0] sm:$0xff]  ;;  %v4696_v50 = vld [vmem:[#allocation2 + $0xb8] sm:$0x3]  ;;  %v3867_v61 = vpack.c.bf16 %v2734_v40, %v2733_v39  ;;  %v3743_v18 = vpack.c.bf16 %v531_v1, %v530_v0  ;;  %v3871_v27 = vpack.c.bf16 %v2736_v6, %v2735_v2  ;;  %v928_v0 = vrot.slane %v4455_v52, 2 }
  0x33   : > { %3151 = vmatprep.mubr.f32.mxu1 %v4557_v43  ;;  %3375 = vmatprep.mubr.f32.mxu0 %v4592_v59  ;;  %v594_v62 = vrot.slane %v4684_v41, 1  ;;  %v595_v63 = vrot.slane %v4686_v44, 1  ;;  %v597_v17 = vrot.slane %v4696_v50, 1  ;;  %v4737_v21 = vld [vmem:[#allocation2 + $0xd0] sm:$0x3]  ;;  %v2738_v35 = vld [vmem:[%s5322_s3 + $0x2f8] sm:$0xff]  ;;  %v428_v45 = vmul.f32 %v427_v22, %v425_v38 }
  0x34   : > { %3728 = vmatprep.subr.bf16.mxu1 %v3727_v57  ;;  %3856 = vmatprep.subr.bf16.mxu0 %v3855_v60  ;;  %v1341_v40 = vrot.slane %v4737_v21, 1  ;;  %v2675_v1 = vld [vmem:[%s5322_s3 + $0x100] sm:$0xff]  ;;  %v2676_v2 = vld [vmem:[%s5322_s3 + $0x108] sm:$0xff]  ;;  %v2742_v38 = vld [vmem:[%s5322_s3 + $0x318] sm:$0xff] }
  0x35   : > { %3152 = vmatmul.mubr.f32.gmra.mrb[4].mxu1 %v4585_v54  ;;  %3376 = vmatmul.mubr.f32.gmra.mrb[4].mxu0 %v4618_v5  ;;  %v4741_v23 = vsel %vm558_vm0, %v594_v62, %v595_v63  ;;  %v4760_v39 = vsel %vm558_vm0, %v595_v63, %v597_v17  ;;  %v929_v63 = vrot.slane %v4463_v55, 2  ;;  %466 = vst [vmem:[#allocation2 + $0xd9] sm:$0xff] %v428_v45  ;;  %v2739_v6 = vld [vmem:[%s5322_s3 + $0x300] sm:$0xff]  ;;  %v2740_v17 = vld [vmem:[%s5322_s3 + $0x308] sm:$0xff]  ;;  %v936_v45 = vrot.slane %v4526_v28, 2 }
  0x36   : > { %3730 = vmatpush3.bf16.msra.mxu1 %v3727_v57  ;;  %3858 = vmatpush3.bf16.msra.mxu0 %v3855_v60  ;;  %v4702_v57 = vsel %vm922_vm1, %v924_v46, %v926_v29  ;;  %v4707_v60 = vsel %vm558_vm0, %v589_v34, %v590_v15  ;;  %v533_v34 = vld [vmem:[%s5322_s3 + $0x78] sm:$0xff]  ;;  %v2737_v15 = vld [vmem:[%s5322_s3 + $0x2f0] sm:$0xff]  ;;  %v426_v46 = vld [vmem:[%s390_s9 + $0x8] sm:$0xff] }
  0x37   : > { %3154 = vmatprep.mubr.f32.mxu1 %v4592_v59  ;;  %3378 = vmatprep.mubr.f32.mxu0 %v4627_v11  ;;  %v2680_v28 = vld [vmem:[%s5322_s3 + $0x128] sm:$0xff] }
  0x38   : > { %3732 = vmatprep.subr.bf16.mxu1 %v3731_v8  ;;  %3860 = vmatprep.subr.bf16.mxu0 %v3859_v12 }
  0x39   : > { %3155 = vmatmul.mubr.f32.gmra.mrb[6].mxu1 %v4618_v5  ;;  %3379 = vmatmul.mubr.f32.gmra.mrb[6].mxu0 %v4652_v26 }
  0x3a   : > { %3734 = vmatpush3.bf16.msra.mxu1 %v3731_v8  ;;  %3862 = vmatpush3.bf16.msra.mxu0 %v3859_v12  ;;  %v4724_v8 = vld [vmem:[#allocation2 + $0xc0] sm:$0xff]  ;;  %v4726_v12 = vld [vmem:[#allocation2 + $0xc8] sm:$0xff] }
  0x3b   : > { %3157 = vmatprep.mubr.f32.mxu1 %v4627_v11  ;;  %3381 = vmatprep.mubr.f32.mxu0 %v4665_v32  ;;  %v1338_v29 = vrot.slane %v4724_v8, 1 }
  0x3c   : > { %3736 = vmatprep.subr.bf16.mxu1 %v3735_v30  ;;  %3864 = vmatprep.subr.bf16.mxu0 %v3863_v33 }
  0x3d   : > { %3158 = vmatmul.mubr.f32.gmra.mrb[8].mxu1 %v4652_v26  ;;  %3382 = vmatmul.mubr.f32.gmra.mrb[8].mxu0 %v4692_v47 }
  0x3e   : > { %3738 = vmatpush3.bf16.msra.mxu1 %v3735_v30  ;;  %3866 = vmatpush3.bf16.msra.mxu0 %v3863_v33  ;;  %v1339_v30 = vrot.slane %v4726_v12, 1  ;;  %v532_v33 = vld [vmem:[%s5322_s3 + $0x70] sm:$0xff] }
  0x3f   : > { %3160 = vmatprep.mubr.f32.mxu1 %v4665_v32  ;;  %3384 = vmatprep.mubr.f32.mxu0 %v4707_v60  ;;  %v3747_v48 = vpack.c.bf16 %v533_v34, %v532_v33  ;;  %v4791_v33 = vsel %vm922_vm1, %v928_v0, %v929_v63  ;;  %v3879_v34 = vpack.c.bf16 %v2740_v17, %v2739_v6  ;;  %v2679_v0 = vld [vmem:[%s5322_s3 + $0x120] sm:$0xff] }
  0x40   : > { %3740 = vmatprep.subr.bf16.mxu1 %v3739_v49  ;;  %3868 = vmatprep.subr.bf16.mxu0 %v3867_v61  ;;  %v4766_v62 = vsel %vm558_vm0, %v1338_v29, %v1339_v30  ;;  %v4786_v29 = vsel %vm558_vm0, %v1339_v30, %v1341_v40  ;;  %v2678_v30 = vld [vmem:[%s5322_s3 + $0x118] sm:$0xff]  ;;  %v3759_v6 = vpack.c.bf16 %v2680_v28, %v2679_v0  ;;  %v951_v28 = vrot.slane %v4622_v9, 2 }
  0x41   : > { %3161 = vmatmul.mubr.f32.gmra.mrb[10].mxu1 %v4692_v47  ;;  %3385 = vmatmul.mubr.f32.gmra.mrb[10].mxu0 %v4730_v16  ;;  %v2686_v9 = vld [vmem:[%s5322_s3 + $0x158] sm:$0xff] }
  0x42   : > { %3742 = vmatpush3.bf16.msra.mxu1 %v3739_v49  ;;  %3870 = vmatpush3.bf16.msra.mxu0 %v3867_v61  ;;  %v429_v49 = vmul.f32 %v427_v22, %v426_v46  ;;  %v3875_v61 = vpack.c.bf16 %v2738_v35, %v2737_v15  ;;  %v931_v22 = vrot.slane %v4495_v10, 2  ;;  %v933_v15 = vrot.slane %v4512_v19, 2  ;;  %v2741_v35 = vld [vmem:[%s5322_s3 + $0x310] sm:$0xff] }
  0x43   : > { %3163 = vmatprep.mubr.f32.mxu1 %v4707_v60  ;;  %3387 = vmatprep.mubr.f32.mxu0 %v4741_v23  ;;  %v934_v10 = vrot.slane %v4514_v20, 2 }
  0x44   : > { %3744 = vmatprep.subr.bf16.mxu1 %v3743_v18  ;;  %3872 = vmatprep.subr.bf16.mxu0 %v3871_v27  ;;  %467 = vst [vmem:[#allocation2 + $0xe1] sm:$0xff] %v429_v49  ;;  %v4810_v40 = vsel %vm922_vm1, %v929_v63, %v931_v22  ;;  %v3883_v49 = vpack.c.bf16 %v2742_v38, %v2741_v35  ;;  %v2744_v63 = vld [vmem:[%s5322_s3 + $0x328] sm:$0xff] }
  0x45   : > { %3164 = vmatmul.mubr.f32.gmra.mrb[12].mxu1 %v4730_v16  ;;  %3388 = vmatmul.mubr.f32.gmra.mrb[12].mxu0 %v4760_v39 }
  0x46   : > { %3746 = vmatpush3.bf16.msra.mxu1 %v3743_v18  ;;  %3874 = vmatpush3.bf16.msra.mxu0 %v3871_v27  ;;  %v3751_v18 = vpack.c.bf16 %v2676_v2, %v2675_v1  ;;  %v2677_v27 = vld [vmem:[%s5322_s3 + $0x110] sm:$0xff]  ;;  %v4835_v1 = vsel %vm922_vm1, %v934_v10, %v936_v45  ;;  %v941_v2 = vrot.slane %v4554_v42, 2  ;;  %v2682_v42 = vld [vmem:[%s5322_s3 + $0x138] sm:$0xff]  ;;  %v948_v45 = vrot.slane %v4609_v3, 2 }
  0x47   : > { %3166 = vmatprep.mubr.f32.mxu1 %v4741_v23  ;;  %3390 = vmatprep.mubr.f32.mxu0 %v4766_v62  ;;  %v3755_v46 = vpack.c.bf16 %v2678_v30, %v2677_v27  ;;  %v946_v27 = vrot.slane %v4589_v58, 2  ;;  %v2684_v58 = vld [vmem:[%s5322_s3 + $0x148] sm:$0xff] }
  0x48   : > { %3748 = vmatprep.subr.bf16.mxu1 %v3747_v48  ;;  %3876 = vmatprep.subr.bf16.mxu0 %v3875_v61 }
  0x49   : > { %3167 = vmatmul.mubr.f32.gmra.mrb[14].mxu1 %v4760_v39  ;;  %3391 = vmatmul.mubr.f32.gmra.mrb[14].mxu0 %v4786_v29 }
  0x4a   : > { %3750 = vmatpush3.bf16.msra.mxu1 %v3747_v48  ;;  %3878 = vmatpush3.bf16.msra.mxu0 %v3875_v61  ;;  %v4816_v48 = vsel %vm922_vm1, %v933_v15, %v934_v10  ;;  %v938_v61 = vrot.slane %v4539_v36, 2  ;;  %v2746_v15 = vld [vmem:[%s5322_s3 + $0x338] sm:$0xff] }
  0x4b   : > { %3201 = vmatprep.mubr.f32.mxu1 %v4503_v13  ;;  %3425 = vmatprep.mubr.f32.mxu0 %v4791_v33  ;;  %v939_v13 = vrot.slane %v4541_v37, 2 }
  0x4c   : > { %3752 = vmatprep.subr.bf16.mxu1 %v3751_v18  ;;  %3880 = vmatprep.subr.bf16.mxu0 %v3879_v34 }
  0x4d   : > { %3202 = vmatmul.mubr.f32.vlgmr.msra.gmra.mrb[0].mxu1 %v4505_v14  ;;  %3426 = vmatmul.mubr.f32.vlgmr.msra.gmra.mrb[0].mxu0 %v4810_v40  ;;  %v2743_v14 = vld [vmem:[%s5322_s3 + $0x320] sm:$0xff]  ;;  %v4841_v17 = vsel %vm922_vm1, %v938_v61, %v939_v13  ;;  %v4860_v10 = vsel %vm922_vm1, %v939_v13, %v941_v2  ;;  %v2748_v13 = vld [vmem:[%s5322_s3 + $0x348] sm:$0xff] }
  0x4e   : > { %3754 = vmatpush3.bf16.msra.mxu1 %v3751_v18  ;;  %3882 = vmatpush3.bf16.msra.mxu0 %v3879_v34  ;;  %v3887_v22 = vpack.c.bf16 %v2744_v63, %v2743_v14  ;;  %v943_v18 = vrot.slane %v4573_v51, 2  ;;  %v2681_v34 = vld [vmem:[%s5322_s3 + $0x130] sm:$0xff]  ;;  %v2747_v61 = vld [vmem:[%s5322_s3 + $0x340] sm:$0xff] }
  0x4f   : > { %3204 = vmatprep.mubr.f32.mxu1 %v4455_v52  ;;  %3428 = vmatprep.mubr.f32.mxu0 %v4816_v48  ;;  %v944_v52 = vrot.slane %v4575_v53, 2  ;;  %v3763_v30 = vpack.c.bf16 %v2682_v42, %v2681_v34  ;;  %v3895_v2 = vpack.c.bf16 %v2748_v13, %v2747_v61  ;;  %v2750_v34 = vld [vmem:[%s5322_s3 + $0x358] sm:$0xff]  ;;  %v961_v13 = vrot.slane %v4696_v50, 2 }
  0x50   : > { %3756 = vmatprep.subr.bf16.mxu1 %v3755_v46  ;;  %3884 = vmatprep.subr.bf16.mxu0 %v3883_v49  ;;  %v2690_v50 = vld [vmem:[%s5322_s3 + $0x178] sm:$0xff] }
  0x51   : > { %3205 = vmatmul.mubr.f32.gmra.mrb[2].mxu1 %v4463_v55  ;;  %3429 = vmatmul.mubr.f32.gmra.mrb[2].mxu0 %v4835_v1  ;;  %v2745_v55 = vld [vmem:[%s5322_s3 + $0x330] sm:$0xff]  ;;  %v4866_v35 = vsel %vm922_vm1, %v943_v18, %v944_v52  ;;  %v4885_v0 = vsel %vm922_vm1, %v944_v52, %v946_v27 }
  0x52   : > { %3758 = vmatpush3.bf16.msra.mxu1 %v3755_v46  ;;  %3886 = vmatpush3.bf16.msra.mxu0 %v3883_v49  ;;  %v3891_v38 = vpack.c.bf16 %v2746_v15, %v2745_v55  ;;  %v949_v46 = vrot.slane %v4611_v4, 2  ;;  %v2683_v49 = vld [vmem:[%s5322_s3 + $0x140] sm:$0xff]  ;;  %v2685_v18 = vld [vmem:[%s5322_s3 + $0x150] sm:$0xff]  ;;  %v956_v55 = vrot.slane %v4657_v31, 2  ;;  %v2688_v31 = vld [vmem:[%s5322_s3 + $0x168] sm:$0xff] }
  0x53   : > { %3207 = vmatprep.mubr.f32.mxu1 %v4512_v19  ;;  %3431 = vmatprep.mubr.f32.mxu0 %v4841_v17  ;;  %v3767_v14 = vpack.c.bf16 %v2684_v58, %v2683_v49  ;;  %v2749_v52 = vld [vmem:[%s5322_s3 + $0x350] sm:$0xff]  ;;  %v3771_v15 = vpack.c.bf16 %v2686_v9, %v2685_v18  ;;  %v2751_v49 = vld [vmem:[%s5322_s3 + $0x360] sm:$0xff]  ;;  %v2752_v58 = vld [vmem:[%s5322_s3 + $0x368] sm:$0xff]  ;;  %v1524_v18 = vrot.slane %v4726_v12, 2 }
  0x54   : > { %3760 = vmatprep.subr.bf16.mxu1 %v3759_v6  ;;  %3888 = vmatprep.subr.bf16.mxu0 %v3887_v22  ;;  %v4891_v63 = vsel %vm922_vm1, %v948_v45, %v949_v46  ;;  %v4910_v42 = vsel %vm922_vm1, %v949_v46, %v951_v28  ;;  %v959_v45 = vrot.slane %v4686_v44, 2  ;;  %v2687_v46 = vld [vmem:[%s5322_s3 + $0x160] sm:$0xff]  ;;  %v2753_v9 = vld [vmem:[%s5322_s3 + $0x370] sm:$0xff] }
  0x55   : > { %3208 = vmatmul.mubr.f32.gmra.mrb[4].mxu1 %v4514_v20  ;;  %3432 = vmatmul.mubr.f32.gmra.mrb[4].mxu0 %v4860_v10  ;;  %v3775_v28 = vpack.c.bf16 %v2688_v31, %v2687_v46  ;;  %v2756_v31 = vld [vmem:[%s5322_s3 + $0x388] sm:$0xff] }
  0x56   : > { %3762 = vmatpush3.bf16.msra.mxu1 %v3759_v6  ;;  %3890 = vmatpush3.bf16.msra.mxu0 %v3887_v22  ;;  %v953_v6 = vrot.slane %v4644_v24, 2  ;;  %v954_v22 = vrot.slane %v4646_v25, 2 }
  0x57   : > { %3210 = vmatprep.mubr.f32.mxu1 %v4539_v36  ;;  %3434 = vmatprep.mubr.f32.mxu0 %v4866_v35 }
  0x58   : > { %3764 = vmatprep.subr.bf16.mxu1 %v3763_v30  ;;  %3892 = vmatprep.subr.bf16.mxu0 %v3891_v38  ;;  %v4916_v27 = vsel %vm922_vm1, %v953_v6, %v954_v22  ;;  %v4935_v61 = vsel %vm922_vm1, %v954_v22, %v956_v55  ;;  %v3903_v6 = vpack.c.bf16 %v2752_v58, %v2751_v49  ;;  %v2689_v22 = vld [vmem:[%s5322_s3 + $0x170] sm:$0xff]  ;;  %v1526_v55 = vrot.slane %v4737_v21, 2  ;;  %v2755_v21 = vld [vmem:[%s5322_s3 + $0x380] sm:$0xff] }
  0x59   : > { %3211 = vmatmul.mubr.f32.gmra.mrb[6].mxu1 %v4541_v37  ;;  %3435 = vmatmul.mubr.f32.gmra.mrb[6].mxu0 %v4885_v0 }
  0x5a   : > { %3766 = vmatpush3.bf16.msra.mxu1 %v3763_v30  ;;  %3894 = vmatpush3.bf16.msra.mxu0 %v3891_v38  ;;  %v3899_v30 = vpack.c.bf16 %v2750_v34, %v2749_v52  ;;  %v958_v38 = vrot.slane %v4684_v41, 2  ;;  %v2754_v52 = vld [vmem:[%s5322_s3 + $0x378] sm:$0xff]  ;;  %v4960_v34 = vsel %vm922_vm1, %v959_v45, %v961_v13  ;;  %v4983_v49 = vsel %vm922_vm1, %v1524_v18, %v1526_v55 }
  0x5b   : > { %3213 = vmatprep.mubr.f32.mxu1 %v4573_v51  ;;  %3437 = vmatprep.mubr.f32.mxu0 %v4891_v63  ;;  %v3907_v46 = vpack.c.bf16 %v2754_v52, %v2753_v9  ;;  %v3911_v13 = vpack.c.bf16 %v2756_v31, %v2755_v21  ;;  %v2695_v9 = vld [vmem:[%s5322_s3 + $0x1a0] sm:$0xff]  ;;  %v2696_v52 = vld [vmem:[%s5322_s3 + $0x1a8] sm:$0xff] }
  0x5c   : > { %3768 = vmatprep.subr.bf16.mxu1 %v3767_v14  ;;  %3896 = vmatprep.subr.bf16.mxu0 %v3895_v2  ;;  %v3791_v55 = vpack.c.bf16 %v2696_v52, %v2695_v9  ;;  %v2699_v31 = vld [vmem:[%s5322_s3 + $0x1c0] sm:$0xff]  ;;  %v2766_v9 = vld [vmem:[%s5322_s3 + $0x3d8] sm:$0xff] }
  0x5d   : > { %3214 = vmatmul.mubr.f32.gmra.mrb[8].mxu1 %v4575_v53  ;;  %3438 = vmatmul.mubr.f32.gmra.mrb[8].mxu0 %v4910_v42 }
  0x5e   : > { %3770 = vmatpush3.bf16.msra.mxu1 %v3767_v14  ;;  %3898 = vmatpush3.bf16.msra.mxu0 %v3895_v2  ;;  %v4941_v14 = vsel %vm922_vm1, %v958_v38, %v959_v45  ;;  %v1523_v2 = vrot.slane %v4724_v8, 2  ;;  %v2692_v45 = vld [vmem:[%s5322_s3 + $0x188] sm:$0xff] }
  0x5f   : > { %3216 = vmatprep.mubr.f32.mxu1 %v4609_v3  ;;  %3440 = vmatprep.mubr.f32.mxu0 %v4916_v27 }
  0x60   : > { %3772 = vmatprep.subr.bf16.mxu1 %v3771_v15  ;;  %3900 = vmatprep.subr.bf16.mxu0 %v3899_v30  ;;  %v4966_v38 = vsel %vm922_vm1, %v1523_v2, %v1524_v18  ;;  %v2757_v2 = vld [vmem:[%s5322_s3 + $0x390] sm:$0xff]  ;;  %v2758_v18 = vld [vmem:[%s5322_s3 + $0x398] sm:$0xff] }
  0x61   : > { %3217 = vmatmul.mubr.f32.gmra.mrb[10].mxu1 %v4611_v4  ;;  %3441 = vmatmul.mubr.f32.gmra.mrb[10].mxu0 %v4935_v61 }
  0x62   : > { %3774 = vmatpush3.bf16.msra.mxu1 %v3771_v15  ;;  %3902 = vmatpush3.bf16.msra.mxu0 %v3899_v30  ;;  %v3779_v15 = vpack.c.bf16 %v2690_v50, %v2689_v22  ;;  %v2691_v30 = vld [vmem:[%s5322_s3 + $0x180] sm:$0xff]  ;;  %v3915_v50 = vpack.c.bf16 %v2758_v18, %v2757_v2  ;;  %v2701_v18 = vld [vmem:[%s5322_s3 + $0x1d0] sm:$0xff] }
  0x63   : > { %3219 = vmatprep.mubr.f32.mxu1 %v4644_v24  ;;  %3443 = vmatprep.mubr.f32.mxu0 %v4941_v14  ;;  %v3783_v58 = vpack.c.bf16 %v2692_v45, %v2691_v30  ;;  %v2698_v30 = vld [vmem:[%s5322_s3 + $0x1b8] sm:$0xff] }
  0x64   : > { %3776 = vmatprep.subr.bf16.mxu1 %v3775_v28  ;;  %3904 = vmatprep.subr.bf16.mxu0 %v3903_v6 }
  0x65   : > { %3220 = vmatmul.mubr.f32.gmra.mrb[12].mxu1 %v4646_v25  ;;  %3444 = vmatmul.mubr.f32.gmra.mrb[12].mxu0 %v4960_v34 }
  0x66   : > { %3778 = vmatpush3.bf16.msra.mxu1 %v3775_v28  ;;  %3906 = vmatpush3.bf16.msra.mxu0 %v3903_v6  ;;  %v2693_v28 = vld [vmem:[%s5322_s3 + $0x190] sm:$0xff]  ;;  %v2694_v6 = vld [vmem:[%s5322_s3 + $0x198] sm:$0xff] }
  0x67   : > { %3222 = vmatprep.mubr.f32.mxu1 %v4684_v41  ;;  %3446 = vmatprep.mubr.f32.mxu0 %v4966_v38  ;;  %v3787_v22 = vpack.c.bf16 %v2694_v6, %v2693_v28  ;;  %v2764_v28 = vld [vmem:[%s5322_s3 + $0x3c8] sm:$0xff] }
  0x68   : > { %3780 = vmatprep.subr.bf16.mxu1 %v3779_v15  ;;  %3908 = vmatprep.subr.bf16.mxu0 %v3907_v46 }
  0x69   : > { %3223 = vmatmul.mubr.f32.gmra.mrb[14].mxu1 %v4686_v44  ;;  %3447 = vmatmul.mubr.f32.gmra.mrb[14].mxu0 %v4983_v49 }
  0x6a   : > { %3782 = vmatpush3.bf16.msra.mxu1 %v3779_v15  ;;  %3910 = vmatpush3.bf16.msra.mxu0 %v3907_v46  ;;  %v2697_v46 = vld [vmem:[%s5322_s3 + $0x1b0] sm:$0xff] }
  0x6b   : > { %3257 = vmatprep.mubr.f32.mxu1 %v4699_v56  ;;  %3481 = vmatprep.mubr.f32.mxu0 %v4512_v19  ;;  %v2759_v56 = vld [vmem:[%s5322_s3 + $0x3a0] sm:$0xff]  ;;  %v3795_v45 = vpack.c.bf16 %v2698_v30, %v2697_v46  ;;  %v2768_v46 = vld [vmem:[%s5322_s3 + $0x3e8] sm:$0xff] }
  0x6c   : > { %3784 = vmatprep.subr.bf16.mxu1 %v3783_v58  ;;  %3912 = vmatprep.subr.bf16.mxu0 %v3911_v13 }
  0x6d   : > { %3258 = vmatmul.mubr.f32.vlgmr.msra.gmra.mrb[0].mxu1 %v4702_v57  ;;  %3482 = vmatmul.mubr.f32.vlgmr.msra.gmra.mrb[0].mxu0 %v4514_v20  ;;  %v2760_v57 = vld [vmem:[%s5322_s3 + $0x3a8] sm:$0xff] }
  0x6e   : > { %3786 = vmatpush3.bf16.msra.mxu1 %v3783_v58  ;;  %3914 = vmatpush3.bf16.msra.mxu0 %v3911_v13  ;;  %v3919_v15 = vpack.c.bf16 %v2760_v57, %v2759_v56  ;;  %v2700_v58 = vld [vmem:[%s5322_s3 + $0x1c8] sm:$0xff]  ;;  %v2763_v13 = vld [vmem:[%s5322_s3 + $0x3c0] sm:$0xff] }
  0x6f   : > { %3260 = vmatprep.mubr.f32.mxu1 %v4791_v33  ;;  %3484 = vmatprep.mubr.f32.mxu0 %v4539_v36  ;;  %v2761_v33 = vld [vmem:[%s5322_s3 + $0x3b0] sm:$0xff]  ;;  %v3799_v6 = vpack.c.bf16 %v2700_v58, %v2699_v31  ;;  %v3927_v2 = vpack.c.bf16 %v2764_v28, %v2763_v13  ;;  %v2703_v57 = vld [vmem:[%s5322_s3 + $0x1e0] sm:$0xff]  ;;  %v2770_v31 = vld [vmem:[%s5322_s3 + $0x3f8] sm:$0xff] }
  0x70   : > { %3788 = vmatprep.subr.bf16.mxu1 %v3787_v22  ;;  %3916 = vmatprep.subr.bf16.mxu0 %v3915_v50  ;;  %v5099_v13 = vld [vmem:[#allocation2 + $0xd8] sm:$0xff] }
  0x71   : > { %3261 = vmatmul.mubr.f32.gmra.mrb[2].mxu1 %v4810_v40  ;;  %3485 = vmatmul.mubr.f32.gmra.mrb[2].mxu0 %v4541_v37  ;;  %v2762_v40 = vld [vmem:[%s5322_s3 + $0x3b8] sm:$0xff] }
  0x72   : > { %3790 = vmatpush3.bf16.msra.mxu1 %v3787_v22  ;;  %3918 = vmatpush3.bf16.msra.mxu0 %v3915_v50  ;;  %v3923_v21 = vpack.c.bf16 %v2762_v40, %v2761_v33  ;;  %v2702_v22 = vld [vmem:[%s5322_s3 + $0x1d8] sm:$0xff]  ;;  %v2765_v50 = vld [vmem:[%s5322_s3 + $0x3d0] sm:$0xff] }
  0x73   : > { %3263 = vmatprep.mubr.f32.mxu1 %v4816_v48  ;;  %3487 = vmatprep.mubr.f32.mxu0 %v4573_v51  ;;  %v3803_v52 = vpack.c.bf16 %v2702_v22, %v2701_v18  ;;  %v3931_v56 = vpack.c.bf16 %v2766_v9, %v2765_v50  ;;  %v2705_v40 = vld [vmem:[%s5322_s3 + $0x1f0] sm:$0xff]  ;;  %v5109_v18 = vld [vmem:[#allocation2 + $0xe0] sm:$0xff]  ;;  %v2774_v9 = vld [vmem:[%s5322_s3 + $0x418] sm:$0xff] }
  0x74   : > { %3792 = vmatprep.subr.bf16.mxu1 %v3791_v55  ;;  %3920 = vmatprep.subr.bf16.mxu0 %v3919_v15  ;;  %v2773_v50 = vld [vmem:[%s5322_s3 + $0x410] sm:$0xff] }
  0x75   : > { %3264 = vmatmul.mubr.f32.gmra.mrb[4].mxu1 %v4835_v1  ;;  %3488 = vmatmul.mubr.f32.gmra.mrb[4].mxu0 %v4575_v53 }
  0x76   : > { %3794 = vmatpush3.bf16.msra.mxu1 %v3791_v55  ;;  %3922 = vmatpush3.bf16.msra.mxu0 %v3919_v15  ;;  %v2704_v55 = vld [vmem:[%s5322_s3 + $0x1e8] sm:$0xff]  ;;  %v2767_v15 = vld [vmem:[%s5322_s3 + $0x3e0] sm:$0xff] }
  0x77   : > { %3266 = vmatprep.mubr.f32.mxu1 %v4841_v17  ;;  %3490 = vmatprep.mubr.f32.mxu0 %v4609_v3  ;;  %v3807_v30 = vpack.c.bf16 %v2704_v55, %v2703_v57  ;;  %v3935_v33 = vpack.c.bf16 %v2768_v46, %v2767_v15  ;;  %v4196_v57 = vld [vmem:[#allocation2 + $0x20] sm:$0xff]  ;;  %v2776_v15 = vld [vmem:[%s5322_s3 + $0x428] sm:$0xff]  ;;  %v2777_v46 = vld [vmem:[%s5322_s3 + $0x430] sm:$0xff] }
  0x78   : > { %3796 = vmatprep.subr.bf16.mxu1 %v3795_v45  ;;  %3924 = vmatprep.subr.bf16.mxu0 %v3923_v21  ;;  %v2775_v55 = vld [vmem:[%s5322_s3 + $0x420] sm:$0xff] }
  0x79   : > { %3267 = vmatmul.mubr.f32.gmra.mrb[6].mxu1 %v4860_v10  ;;  %3491 = vmatmul.mubr.f32.gmra.mrb[6].mxu0 %v4611_v4 }
  0x7a   : > { %3798 = vmatpush3.bf16.msra.mxu1 %v3795_v45  ;;  %3926 = vmatpush3.bf16.msra.mxu0 %v3923_v21  ;;  %v2706_v45 = vld [vmem:[%s5322_s3 + $0x1f8] sm:$0xff]  ;;  %v2769_v21 = vld [vmem:[%s5322_s3 + $0x3f0] sm:$0xff] }
  0x7b   : > { %3269 = vmatprep.mubr.f32.mxu1 %v4866_v35  ;;  %3493 = vmatprep.mubr.f32.mxu0 %v4644_v24  ;;  %v3811_v58 = vpack.c.bf16 %v2706_v45, %v2705_v40  ;;  %v3939_v28 = vpack.c.bf16 %v2770_v31, %v2769_v21 }
  0x7c   : > { %3800 = vmatprep.subr.bf16.mxu1 %v3799_v6  ;;  %3928 = vmatprep.subr.bf16.mxu0 %v3927_v2 }
  0x7d   : > { %3270 = vmatmul.mubr.f32.gmra.mrb[8].mxu1 %v4885_v0  ;;  %3494 = vmatmul.mubr.f32.gmra.mrb[8].mxu0 %v4646_v25 }
  0x7e   : > { %3802 = vmatpush3.bf16.msra.mxu1 %v3799_v6  ;;  %3930 = vmatpush3.bf16.msra.mxu0 %v3927_v2  ;;  %v2771_v6 = vld [vmem:[%s5322_s3 + $0x400] sm:$0xff]  ;;  %v2772_v2 = vld [vmem:[%s5322_s3 + $0x408] sm:$0xff] }
  0x7f   : > { %3272 = vmatprep.mubr.f32.mxu1 %v4891_v63  ;;  %3496 = vmatprep.mubr.f32.mxu0 %v4684_v41  ;;  %v3943_v22 = vpack.c.bf16 %v2772_v2, %v2771_v6 }
  0x80   : > { %3804 = vmatprep.subr.bf16.mxu1 %v3803_v52  ;;  %3932 = vmatprep.subr.bf16.mxu0 %v3931_v56 }
  0x81   : > { %3273 = vmatmul.mubr.f32.gmra.mrb[10].mxu1 %v4910_v42  ;;  %3497 = vmatmul.mubr.f32.gmra.mrb[10].mxu0 %v4686_v44 }
  0x82   : > { %3806 = vmatpush3.bf16.msra.mxu1 %v3803_v52  ;;  %3934 = vmatpush3.bf16.msra.mxu0 %v3931_v56  ;;  %v4195_v52 = vld [vmem:[#allocation2 + $0x18] sm:$0xff]  ;;  %v3947_v56 = vpack.c.bf16 %v2774_v9, %v2773_v50 }
  0x83   : > { %3275 = vmatprep.mubr.f32.mxu1 %v4916_v27  ;;  %3499 = vmatprep.mubr.f32.mxu0 %v4724_v8 }
  0x84   : > { %3808 = vmatprep.subr.bf16.mxu1 %v3807_v30  ;;  %3936 = vmatprep.subr.bf16.mxu0 %v3935_v33 }
  0x85   : > { %3276 = vmatmul.mubr.f32.gmra.mrb[12].mxu1 %v4935_v61  ;;  %3500 = vmatmul.mubr.f32.gmra.mrb[12].mxu0 %v4726_v12 }
  0x86   : > { %3810 = vmatpush3.bf16.msra.mxu1 %v3807_v30  ;;  %3938 = vmatpush3.bf16.msra.mxu0 %v3935_v33  ;;  %v2778_v30 = vld [vmem:[%s5322_s3 + $0x438] sm:$0xff] }
  0x87   : > { %3278 = vmatprep.mubr.f32.mxu1 %v4941_v14  ;;  %3502 = vmatprep.mubr.f32.mxu0 %v5099_v13 }
  0x88   : > { %3812 = vmatprep.subr.bf16.mxu1 %v3811_v58  ;;  %3940 = vmatprep.subr.bf16.mxu0 %v3939_v28 }
  0x89   : > { %3279 = vmatmul.mubr.f32.gmra.mrb[14].mxu1 %v4960_v34  ;;  %3503 = vmatmul.mubr.f32.gmra.mrb[14].mxu0 %v5109_v18 }
  0x8a   : > { %3814 = vmatpush3.bf16.msra.mxu1 %v3811_v58  ;;  %3942 = vmatpush3.bf16.msra.mxu0 %v3939_v28 }
  0x8b   : > { %3313 = vmatprep.mubr.f32.mxu1 %v4195_v52  ;;  %3537 = vmatprep.mubr.f32.mxu0 %v4557_v43  ;;  %v3951_v43 = vpack.c.bf16 %v2776_v15, %v2775_v55 }
  0x8c   : > { %3944 = vmatprep.subr.bf16.mxu0 %v3943_v22 }
  0x8d   : > { %3314 = vmatmul.mubr.f32.vlgmr.msra.gmra.mrb[0].mxu1 %v4196_v57  ;;  %3538 = vmatmul.mubr.f32.vlgmr.msra.gmra.mrb[0].mxu0 %v4585_v54  ;;  %v2780_v54 = vld [vmem:[%s5322_s3 + $0x448] sm:$0xff] }
  0x8e   : > { %3316 = vmatprep.mubr.f32.mxu1 %v4512_v19  ;;  %3946 = vmatpush3.bf16.msra.mxu0 %v3943_v22  ;;  %v3955_v19 = vpack.c.bf16 %v2778_v30, %v2777_v46 }
  0x8f   : > { %3540 = vmatprep.mubr.f32.mxu0 %v4592_v59  ;;  %3948 = vmatprep.subr.bf16.mxu0 %v3947_v56  ;;  %v2782_v59 = vld [vmem:[%s5322_s3 + $0x458] sm:$0xff] }
  0x91   : > { %3317 = vmatmul.mubr.f32.gmra.mrb[2].mxu1 %v4514_v20  ;;  %3541 = vmatmul.mubr.f32.gmra.mrb[2].mxu0 %v4618_v5  ;;  %v2779_v20 = vld [vmem:[%s5322_s3 + $0x440] sm:$0xff]  ;;  %v2784_v5 = vld [vmem:[%s5322_s3 + $0x468] sm:$0xff] }
  0x92   : > { %3319 = vmatprep.mubr.f32.mxu1 %v4539_v36  ;;  %3950 = vmatpush3.bf16.msra.mxu0 %v3947_v56  ;;  %v3959_v36 = vpack.c.bf16 %v2780_v54, %v2779_v20 }
  0x93   : > { %3543 = vmatprep.mubr.f32.mxu0 %v4627_v11  ;;  %3952 = vmatprep.subr.bf16.mxu0 %v3951_v43  ;;  %v1890_v11 = vrot.slane %v5109_v18, 1 }
  0x95   : > { %3320 = vmatmul.mubr.f32.gmra.mrb[4].mxu1 %v4541_v37  ;;  %3544 = vmatmul.mubr.f32.gmra.mrb[4].mxu0 %v4652_v26  ;;  %v2781_v37 = vld [vmem:[%s5322_s3 + $0x450] sm:$0xff]  ;;  %v517_v26 = vld [vmem:[#allocation2 + $0xe8] sm:$0x3] }
  0x96   : > { %3322 = vmatprep.mubr.f32.mxu1 %v4573_v51  ;;  %3954 = vmatpush3.bf16.msra.mxu0 %v3951_v43  ;;  %v3963_v51 = vpack.c.bf16 %v2782_v59, %v2781_v37 }
  0x97   : > { %3546 = vmatprep.mubr.f32.mxu0 %v4665_v32  ;;  %3956 = vmatprep.subr.bf16.mxu0 %v3955_v19  ;;  %v2785_v32 = vld [vmem:[%s5322_s3 + $0x470] sm:$0xff] }
  0x99   : > { %3323 = vmatmul.mubr.f32.gmra.mrb[6].mxu1 %v4575_v53  ;;  %3547 = vmatmul.mubr.f32.gmra.mrb[6].mxu0 %v4692_v47  ;;  %v2783_v53 = vld [vmem:[%s5322_s3 + $0x460] sm:$0xff]  ;;  %v1892_v47 = vrot.slane %v517_v26, 1 }
  0x9a   : > { %3325 = vmatprep.mubr.f32.mxu1 %v4609_v3  ;;  %3958 = vmatpush3.bf16.msra.mxu0 %v3955_v19  ;;  %v1889_v3 = vrot.slane %v5099_v13, 1 }
  0x9b   : > { %3549 = vmatprep.mubr.f32.mxu0 %v4707_v60  ;;  %3960 = vmatprep.subr.bf16.mxu0 %v3959_v36 }
  0x9c   : > { %v1891_v60 = vsel %vm558_vm0, %v1889_v3, %v1890_v11 }
  0x9d   : > { %3326 = vmatmul.mubr.f32.gmra.mrb[8].mxu1 %v4611_v4  ;;  %3550 = vmatmul.mubr.f32.gmra.mrb[8].mxu0 %v4730_v16  ;;  %v3967_v4 = vpack.c.bf16 %v2784_v5, %v2783_v53  ;;  %v1893_v16 = vsel %vm558_vm0, %v1890_v11, %v1892_v47 }
  0x9e   : > { %3328 = vmatprep.mubr.f32.mxu1 %v4644_v24  ;;  %3962 = vmatpush3.bf16.msra.mxu0 %v3959_v36  ;;  %v2786_v24 = vld [vmem:[%s5322_s3 + $0x478] sm:$0xff] }
  0x9f   : > { %3552 = vmatprep.mubr.f32.mxu0 %v4741_v23  ;;  %3964 = vmatprep.subr.bf16.mxu0 %v3963_v51 }
  0xa1   : > { %3329 = vmatmul.mubr.f32.gmra.mrb[10].mxu1 %v4646_v25  ;;  %3553 = vmatmul.mubr.f32.gmra.mrb[10].mxu0 %v4760_v39  ;;  %v3971_v25 = vpack.c.bf16 %v2786_v24, %v2785_v32  ;;  %v4238_v39 = vmov 0.0|0.0  }
  0xa2   : > { %3331 = vmatprep.mubr.f32.mxu1 %v4684_v41  ;;  %3966 = vmatpush3.bf16.msra.mxu0 %v3963_v51  ;;  %v2074_v41 = vrot.slane %v5099_v13, 2 }
  0xa3   : > { %3555 = vmatprep.mubr.f32.mxu0 %v4766_v62  ;;  %3968 = vmatprep.subr.bf16.mxu0 %v3967_v4 }
  0xa4   : > { %3975 = vmatprep.subr.bf16.mxu1 %v4238_v39 }
  0xa5   : > { %3332 = vmatmul.mubr.f32.gmra.mrb[12].mxu1 %v4686_v44  ;;  %3556 = vmatmul.mubr.f32.gmra.mrb[12].mxu0 %v4786_v29  ;;  %v2075_v44 = vrot.slane %v5109_v18, 2 }
  0xa6   : > { %3334 = vmatprep.mubr.f32.mxu1 %v4724_v8  ;;  %3970 = vmatpush3.bf16.msra.mxu0 %v3967_v4  ;;  %v2077_v8 = vrot.slane %v517_v26, 2 }
  0xa7   : > { %3558 = vmatprep.mubr.f32.mxu0 %v1891_v60  ;;  %3972 = vmatprep.subr.bf16.mxu0 %v3971_v25 }
  0xa8   : > { %v2078_v23 = vsel %vm922_vm1, %v2075_v44, %v2077_v8 }
  0xa9   : > { %3335 = vmatmul.mubr.f32.gmra.mrb[14].mxu1 %v4726_v12  ;;  %3559 = vmatmul.mubr.f32.gmra.mrb[14].mxu0 %v1893_v16  ;;  %v2076_v12 = vsel %vm922_vm1, %v2074_v41, %v2075_v44 }
  0xaa   : > { %3974 = vmatpush3.bf16.msra.mxu0 %v3971_v25  ;;  %3593 = vmatprep.mubr.f32.mxu0 %v4816_v48 }
  0xab   : > { %3649 = vmatprep.mubr.msk.f32.mxu1 %vm4239_vm2, %v4237_v7 }
  0xad   : > { %3594 = vmatmul.mubr.f32.vlgmr.msra.gmra.mrb[0].mxu0 %v4835_v1 }
  0xae   : > { %3596 = vmatprep.mubr.f32.mxu0 %v4841_v17 }
  0xb1   : > { %3597 = vmatmul.mubr.f32.gmra.mrb[2].mxu0 %v4860_v10 }
  0xb2   : > { %3599 = vmatprep.mubr.f32.mxu0 %v4866_v35 }
  0xb5   : > { %3600 = vmatmul.mubr.f32.gmra.mrb[4].mxu0 %v4885_v0 }
  0xb6   : > { %3602 = vmatprep.mubr.f32.mxu0 %v4891_v63 }
  0xb9   : > { %3603 = vmatmul.mubr.f32.gmra.mrb[6].mxu0 %v4910_v42 }
  0xba   : > { %3605 = vmatprep.mubr.f32.mxu0 %v4916_v27 }
  0xbd   : > { %3606 = vmatmul.mubr.f32.gmra.mrb[8].mxu0 %v4935_v61 }
  0xbe   : > { %3608 = vmatprep.mubr.f32.mxu0 %v4941_v14 }
  0xc1   : > { %3609 = vmatmul.mubr.f32.gmra.mrb[10].mxu0 %v4960_v34 }
  0xc2   : > { %3611 = vmatprep.mubr.f32.mxu0 %v4966_v38 }
  0xc5   : > { %3612 = vmatmul.mubr.f32.gmra.mrb[12].mxu0 %v4983_v49 }
  0xc6   : > { %3614 = vmatprep.mubr.f32.mxu0 %v2076_v12 }
  0xc9   : > { %3615 = vmatmul.mubr.f32.gmra.mrb[14].mxu0 %v2078_v23 }
 0x160   : > { %v3315_v62 = vpop.f32.mrb[0].mxu1 }
 0x161   : > { %v1240_v29 = vpop.f32.mrb[1].mxu1 }
 0x164   : > { %v3318_v48 = vpop.f32.mrb[2].mxu1 }
 0x165   : > { %v1250_v1 = vpop.f32.mrb[3].mxu1 }
 0x168   : > { %v3321_v17 = vpop.f32.mrb[4].mxu1 }
 0x169   : > { %v1260_v10 = vpop.f32.mrb[5].mxu1 }
 0x16c   : > { %v3324_v35 = vpop.f32.mrb[6].mxu1 }
 0x16d   : > { %v1270_v0 = vpop.f32.mrb[7].mxu1 }
 0x170   : > { %v3327_v63 = vpop.f32.mrb[8].mxu1 }
 0x171   : > { %v1280_v42 = vpop.f32.mrb[9].mxu1 }
 0x174   : > { %v5209_v27 = vpop.f32.mrb[10].mxu1 }
 0x175   : > { %v5211_v61 = vpop.f32.mrb[11].mxu1 }
 0x178   : > { %v5213_v14 = vpop.f32.mrb[12].mxu1 }
 0x179   : > { %v5215_v34 = vpop.f32.mrb[13].mxu1 }
 0x17c   : > { %v5217_v38 = vpop.f32.mrb[14].mxu1 }
 0x17d   : > { %v5219_v49 = vpop.f32.mrb[15].mxu1 }
 0x180   : > { %v3595_v33 = vpop.f32.mrb[0].mxu0 }
 0x181   : > { %v4023_v40 = vadd.f32 %v3595_v33, %v3315_v62  ;;  %v2164_v45 = vpop.f32.mrb[1].mxu0 }
 0x182   : > { %v4024_v21 = vadd.f32 %v2164_v45, %v1240_v29 }
 0x183   : > { %2260 = vst [vmem:[%s5226_s16 + $0x8] sm:$0xff] %v4023_v40  ;;  %v5229_v31 = vmul.f32 %v4023_v40, %v4023_v40 }
 0x184   : > { %2259 = vst [vmem:[%s5226_s16] sm:$0xff] %v4024_v21  ;;  %v3976_v58 = vpack.c.bf16 %v4023_v40, %v4024_v21  ;;  %v5232_v13 = vmul.f32 %v4024_v21, %v4024_v21  ;;  %v3598_v28 = vpop.f32.mrb[2].mxu0 }
 0x185   : > { %v4025_v6 = vadd.f32 %v3598_v28, %v3318_v48  ;;  %v2174_v2 = vpop.f32.mrb[3].mxu0 }
 0x186   : > { %v4000_v18 = vpack.c.bf16 %v5229_v31, %v5232_v13  ;;  %v4026_v22 = vadd.f32 %v2174_v2, %v1250_v1  ;;  %3977 = vmatpush3.bf16.msra.mxu1 %v3976_v58  ;;  %v4240_v58 = vmov 1.0  }
 0x187   : > { %2262 = vst [vmem:[%s5226_s16 + $0x18] sm:$0xff] %v4025_v6  ;;  %v5237_v50 = vmul.f32 %v4025_v6, %v4025_v6  ;;  %3978 = vmatprep.subr.bf16.mxu1 %v4238_v39 }
 0x188   : > { %2261 = vst [vmem:[%s5226_s16 + $0x10] sm:$0xff] %v4026_v22  ;;  %v3979_v9 = vpack.c.bf16 %v4025_v6, %v4026_v22  ;;  %v5241_v52 = vmul.f32 %v4026_v22, %v4026_v22  ;;  %v3601_v56 = vpop.f32.mrb[4].mxu0 }
 0x189   : > { %v4027_v57 = vadd.f32 %v3601_v56, %v3321_v17  ;;  %v2184_v55 = vpop.f32.mrb[5].mxu0 }
 0x18a   : > { %v4003_v15 = vpack.c.bf16 %v5237_v50, %v5241_v52  ;;  %v4028_v43 = vadd.f32 %v2184_v55, %v1260_v10  ;;  %3980 = vmatpush3.bf16.msra.mxu1 %v3979_v9 }
 0x18b   : > { %2264 = vst [vmem:[%s5226_s16 + $0x28] sm:$0xff] %v4027_v57  ;;  %v5246_v46 = vmul.f32 %v4027_v57, %v4027_v57  ;;  %3981 = vmatprep.subr.bf16.mxu1 %v4238_v39 }
 0x18c   : > { %2263 = vst [vmem:[%s5226_s16 + $0x20] sm:$0xff] %v4028_v43  ;;  %v3982_v30 = vpack.c.bf16 %v4027_v57, %v4028_v43  ;;  %v5250_v19 = vmul.f32 %v4028_v43, %v4028_v43  ;;  %v3604_v20 = vpop.f32.mrb[6].mxu0 }
 0x18d   : > { %v4029_v54 = vadd.f32 %v3604_v20, %v3324_v35  ;;  %v2194_v36 = vpop.f32.mrb[7].mxu0 }
 0x18e   : > { %v4006_v37 = vpack.c.bf16 %v5246_v46, %v5250_v19  ;;  %v4030_v59 = vadd.f32 %v2194_v36, %v1270_v0  ;;  %3983 = vmatpush3.bf16.msra.mxu1 %v3982_v30 }
 0x18f   : > { %2266 = vst [vmem:[%s5226_s16 + $0x38] sm:$0xff] %v4029_v54  ;;  %v5255_v51 = vmul.f32 %v4029_v54, %v4029_v54  ;;  %3984 = vmatprep.subr.bf16.mxu1 %v4238_v39 }
 0x190   : > { %2265 = vst [vmem:[%s5226_s16 + $0x30] sm:$0xff] %v4030_v59  ;;  %v3985_v53 = vpack.c.bf16 %v4029_v54, %v4030_v59  ;;  %v2352_v5 = vmul.f32 %v4030_v59, %v4030_v59  ;;  %v3607_v3 = vpop.f32.mrb[8].mxu0 }
 0x191   : > { %v4031_v11 = vadd.f32 %v3607_v3, %v3327_v63  ;;  %v2204_v4 = vpop.f32.mrb[9].mxu0 }
 0x192   : > { %v4009_v26 = vpack.c.bf16 %v5255_v51, %v2352_v5  ;;  %v4032_v32 = vadd.f32 %v2204_v4, %v1280_v42  ;;  %3986 = vmatpush3.bf16.msra.mxu1 %v3985_v53 }
 0x193   : > { %2268 = vst [vmem:[%s5226_s16 + $0x48] sm:$0xff] %v4031_v11  ;;  %v2355_v24 = vmul.f32 %v4031_v11, %v4031_v11  ;;  %3987 = vmatprep.subr.bf16.mxu1 %v4238_v39 }
 0x194   : > { %2267 = vst [vmem:[%s5226_s16 + $0x40] sm:$0xff] %v4032_v32  ;;  %v3988_v47 = vpack.c.bf16 %v4031_v11, %v4032_v32  ;;  %v2354_v60 = vmul.f32 %v4032_v32, %v4032_v32  ;;  %v3610_v25 = vpop.f32.mrb[10].mxu0 }
 0x195   : > { %v4033_v16 = vadd.f32 %v3610_v25, %v5209_v27  ;;  %v2214_v41 = vpop.f32.mrb[11].mxu0 }
 0x196   : > { %v4012_v44 = vpack.c.bf16 %v2355_v24, %v2354_v60  ;;  %v4034_v8 = vadd.f32 %v2214_v41, %v5211_v61  ;;  %3989 = vmatpush3.bf16.msra.mxu1 %v3988_v47 }
 0x197   : > { %2270 = vst [vmem:[%s5226_s16 + $0x58] sm:$0xff] %v4033_v16  ;;  %v2357_v12 = vmul.f32 %v4033_v16, %v4033_v16  ;;  %3990 = vmatprep.subr.bf16.mxu1 %v4238_v39 }
 0x198   : > { %2269 = vst [vmem:[%s5226_s16 + $0x50] sm:$0xff] %v4034_v8  ;;  %v3991_v23 = vpack.c.bf16 %v4033_v16, %v4034_v8  ;;  %v2356_v62 = vmul.f32 %v4034_v8, %v4034_v8  ;;  %v3613_v29 = vpop.f32.mrb[12].mxu0 }
 0x199   : > { %v4035_v48 = vadd.f32 %v3613_v29, %v5213_v14  ;;  %v2224_v1 = vpop.f32.mrb[13].mxu0 }
 0x19a   : > { %v4015_v17 = vpack.c.bf16 %v2357_v12, %v2356_v62  ;;  %v4036_v10 = vadd.f32 %v2224_v1, %v5215_v34  ;;  %3992 = vmatpush3.bf16.msra.mxu1 %v3991_v23 }
 0x19b   : > { %2272 = vst [vmem:[%s5226_s16 + $0x68] sm:$0xff] %v4035_v48  ;;  %v2359_v35 = vmul.f32 %v4035_v48, %v4035_v48  ;;  %3993 = vmatprep.subr.bf16.mxu1 %v4238_v39 }
 0x19c   : > { %2271 = vst [vmem:[%s5226_s16 + $0x60] sm:$0xff] %v4036_v10  ;;  %v3994_v0 = vpack.c.bf16 %v4035_v48, %v4036_v10  ;;  %v2358_v63 = vmul.f32 %v4036_v10, %v4036_v10  ;;  %v3616_v42 = vpop.f32.mrb[14].mxu0 }
 0x19d   : > { %v4037_v27 = vadd.f32 %v3616_v42, %v5217_v38  ;;  %v2234_v61 = vpop.f32.mrb[15].mxu0 }
 0x19e   : > { %v4018_v33 = vpack.c.bf16 %v2359_v35, %v2358_v63  ;;  %v4038_v14 = vadd.f32 %v2234_v61, %v5219_v49  ;;  %3995 = vmatpush3.bf16.msra.mxu1 %v3994_v0 }
 0x19f   : > { %2274 = vst [vmem:[%s5226_s16 + $0x78] sm:$0xff] %v4037_v27  ;;  %v2361_v40 = vmul.f32 %v4037_v27, %v4037_v27  ;;  %3996 = vmatprep.subr.bf16.mxu1 %v4238_v39 }
 0x1a0   : > { %2273 = vst [vmem:[%s5226_s16 + $0x70] sm:$0xff] %v4038_v14  ;;  %v3997_v34 = vpack.c.bf16 %v4037_v27, %v4038_v14  ;;  %v2360_v45 = vmul.f32 %v4038_v14, %v4038_v14 }
 0x1a2   : > { %v4021_v21 = vpack.c.bf16 %v2361_v40, %v2360_v45  ;;  %3998 = vmatpush3.bf16.msra.mxu1 %v3997_v34 }
 0x1a3   : > { %3999 = vmatprep.subr.bf16.mxu1 %v4238_v39 }
 0x1a5   : > { %3650 = vmatmul.mubr.f32.vlgmr.msra.gmra.mrb[16].mxu1 %v4240_v58 }
 0x1a6   : > { %4001 = vmatpush3.bf16.msra.mxu1 %v4000_v18  ;;  %3684 = vmatprep.mubr.msk.f32.mxu1 %vm4239_vm2, %v4237_v7 }
 0x1a7   : > { %4002 = vmatprep.subr.bf16.mxu1 %v4238_v39 }
 0x1aa   : > { %4004 = vmatpush3.bf16.msra.mxu1 %v4003_v15 }
 0x1ab   : > { %4005 = vmatprep.subr.bf16.mxu1 %v4238_v39 }
 0x1ae   : > { %4007 = vmatpush3.bf16.msra.mxu1 %v4006_v37 }
 0x1af   : > { %4008 = vmatprep.subr.bf16.mxu1 %v4238_v39 }
 0x1b2   : > { %4010 = vmatpush3.bf16.msra.mxu1 %v4009_v26 }
 0x1b3   : > { %4011 = vmatprep.subr.bf16.mxu1 %v4238_v39 }
 0x1b6   : > { %4013 = vmatpush3.bf16.msra.mxu1 %v4012_v44 }
 0x1b7   : > { %4014 = vmatprep.subr.bf16.mxu1 %v4238_v39 }
 0x1ba   : > { %4016 = vmatpush3.bf16.msra.mxu1 %v4015_v17 }
 0x1bb   : > { %4017 = vmatprep.subr.bf16.mxu1 %v4238_v39 }
 0x1be   : > { %4019 = vmatpush3.bf16.msra.mxu1 %v4018_v33 }
 0x1bf   : > { %4020 = vmatprep.subr.bf16.mxu1 %v4238_v39 }
 0x1c2   : > { %4022 = vmatpush3.bf16.msra.mxu1 %v4021_v21 }
 0x1c5   : > { %3685 = vmatmul.mubr.f32.vlgmr.msra.gmra.mrb[18].mxu1 %v4240_v58 }
 0x278   : > { %v2341_v7 = vpop.f32.mrb[16].mxu1 }
 0x279   : > { %2345 = vst [vmem:[%s413_s27] sm:$0x1] %v2341_v7  ;;  %v3651_v38 = vpop.f32.mrb[17].mxu1 }
 0x298   : > { %v2428_v49 = vpop.f32.mrb[18].mxu1 }
 0x299   : > { %2432 = vst [vmem:[%s413_s27 + $0x1] sm:$0x1] %v2428_v49  ;;  %v3686_v31 = vpop.f32.mrb[19].mxu1 }
 0x29a PF: > { %s16_s22 = sadd.s32 1, %s4235_s22   ;;  %s5326_s18 = smov %s4227_s20 }
 0x29b   : > { %p13_p12 = scmp.ge.s32.totalorder %s16_s22, 6   ;;  %s5327_s19 = smov %s4231_s21 }
 0x29c   : > { %s5328_s20 = smov %s5331_s23  ;;  %s5329_s21 = smov %s5335_s24 }
 0x29d   :  { %15 = sbr.rel (!%p13_p12) target bundleno = 3 (0x3), region = 94 }

// kernel: conv_block.4
= control target key start
LH: loop header
LB: loop body
LE: loop exit
PB: predicated region body
PF: predicated region fallthrough
CT: control target
= control target key end

     0   :  { %s4533_s24 = smov 0   ;;  %s4535_s25 = smov 0   ;;  %s5733_s0 = inlined_call_operand.vmem [shape: f32[2,16,16,128], index: 0, kind: input, shape index: {}, may-alias: {0,1,2}]   ;;  %s5734_s1 = inlined_call_operand.vmem [shape: f32[2,16,16,128], index: 1, kind: input, shape index: {}, may-alias: {0,1,2}]   ;;  %s5735_s2 = inlined_call_operand.vmem [shape: f32[2,16,16,128], index: 2, kind: input, shape index: {}, may-alias: {0,1,2}]   ;;  %s5736_s3 = inlined_call_operand.vmem [shape: f32[1,128], index: 3, kind: input, shape index: {}]   ;;  %s5737_s4 = inlined_call_operand.vmem [shape: f32[1,128], index: 4, kind: input, shape index: {}]   ;;  %s5738_s5 = inlined_call_operand.vmem [shape: f32[3,3,128,128], index: 5, kind: input, shape index: {}]   ;;  %s5739_s6 = inlined_call_operand.vmem [shape: f32[2,16,16,128], index: 6, kind: output, shape index: {0}]   ;;  %s5740_s7 = inlined_call_operand.vmem [shape: f32[2,2,2,128], index: 7, kind: output, shape index: {1}]  }
   0x1   :  { %s4537_s26 = smov 0   ;;  %s4539_s27 = smov 0  }
   0x2   :  { %s4541_s28 = smov 0  }
   0x3 LB: > { %s27_s29 = sadd.s32 1, %s4479_s26  ;;  %s30_s30 = sadd.s32 1, %s4483_s27  ;;  %s4487_s28 = sphi %s4541_s28, %s18_s28   ;;  %s4483_s27 = sphi %s4539_s27, %s5760_s27   ;;  %s4479_s26 = sphi %s4537_s26, %s5759_s26   ;;  %s4475_s25 = sphi %s4535_s25, %s5758_s25   ;;  %s4471_s24 = sphi %s4533_s24, %s5757_s24  }
   0x4   : > { %p28_p0 = scmp.ge.s32.totalorder %s27_s29, 2  ;;  %p2839_p1 = scmp.ge.s32.totalorder %s4487_s28, 1 }
   0x5   : > { %p328_p2 = scmp.lt.s32.totalorder %s4487_s28, 5 }
   0x6   : > { %s5762_s29 = smov (%p28_p0, %s27_s29), 0  ;;  %s5764_s30 = smov (!%p28_p0, %s30_s30), %s4483_s27 }
   0x7   : > { %p329_p3 = pnand %p2839_p1, %p328_p2  ;;  %p32_p4 = scmp.ge.s32.totalorder %s5764_s30, 2 }
   0x9   : > { %s5766_s30 = smov (%p32_p4, %s5764_s30), 0  ;;  %332 = sbr.rel (%p329_p3) target bundleno = 689 (0x2b1), region = 44 }
  0x10   : > { %v2917_v0 = vld [vmem:[%s5738_s5 + $0x200] sm:$0xff]  ;;  %v2918_v1 = vld [vmem:[%s5738_s5 + $0x208] sm:$0xff]  ;;  %v2919_v2 = vld [vmem:[%s5738_s5 + $0x210] sm:$0xff]  ;;  %s4577_s14 = sshll.u32 %s4471_s24, 3  ;;  %p405_p5 = scmp.lt.s32.totalorder %s4475_s25, 1  ;;  %v5741_v7 = vmov 0.0  }
  0x11   : > { %v4025_v3 = vpack.c.bf16 %v2918_v1, %v2917_v0  ;;  %v2920_v4 = vld [vmem:[%s5738_s5 + $0x218] sm:$0xff]  ;;  %v2869_v5 = vld [vmem:[%s5738_s5 + $0x80] sm:$0xff]  ;;  %v2870_v6 = vld [vmem:[%s5738_s5 + $0x88] sm:$0xff]  ;;  %p407_p6 = scmp.lt.s32.totalorder %s4577_s14, 15  ;;  %677 = vst [vmem:[#allocation2 + $0x18] sm:$0x1] %v5741_v7 }
  0x12   : > { %676 = vst [vmem:[#allocation2] sm:$0x1] %v5741_v7  ;;  %678 = vst [vmem:[#allocation2 + $0x30] sm:$0x1] %v5741_v7  ;;  %s4611_s21 = sadd.s32 4294967295, %s4577_s14  ;;  %v4029_v8 = vpack.c.bf16 %v2920_v4, %v2919_v2  ;;  %v3897_v9 = vpack.c.bf16 %v2870_v6, %v2869_v5  ;;  %v2921_v10 = vld [vmem:[%s5738_s5 + $0x220] sm:$0xff] }
  0x13   : > { %679 = vst [vmem:[#allocation2 + $0x48] sm:$0x1] %v5741_v7  ;;  %680 = vst [vmem:[#allocation2 + $0x60] sm:$0x1] %v5741_v7  ;;  %v2922_v11 = vld [vmem:[%s5738_s5 + $0x228] sm:$0xff]  ;;  %v2871_v12 = vld [vmem:[%s5738_s5 + $0x90] sm:$0xff]  ;;  %4026 = vmatprep.subr.bf16.mxu0 %v4025_v3 }
  0x14   : > { %681 = vst [vmem:[#allocation2 + $0x78] sm:$0x1] %v5741_v7  ;;  %682 = vst [vmem:[#allocation2 + $0x90] sm:$0x1] %v5741_v7  ;;  %s5768_s25 = smov (!%p405_p5, %s4475_s25), 1  ;;  %v2872_v13 = vld [vmem:[%s5738_s5 + $0x98] sm:$0xff]  ;;  %4028 = vmatpush3.bf16.msra.mxu0 %v4025_v3  ;;  %3898 = vmatprep.subr.bf16.mxu1 %v3897_v9  ;;  %v4033_v17 = vpack.c.bf16 %v2922_v11, %v2921_v10 }
  0x15   : > { %683 = vst [vmem:[#allocation2 + $0xa8] sm:$0x1] %v5741_v7  ;;  %684 = vst [vmem:[#allocation2 + $0xc0] sm:$0x1] %v5741_v7  ;;  %s408_s15 = scalar_select %p407_p6, %s4577_s14, 15  ;;  %v3901_v14 = vpack.c.bf16 %v2872_v13, %v2871_v12  ;;  %v2873_v15 = vld [vmem:[%s5738_s5 + $0xa0] sm:$0xff]  ;;  %4030 = vmatprep.subr.bf16.mxu0 %v4029_v8  ;;  %3900 = vmatpush3.bf16.msra.mxu1 %v3897_v9 }
  0x16   : > { %685 = vst [vmem:[#allocation2 + $0xd8] sm:$0x1] %v5741_v7  ;;  %686 = vst [vmem:[#allocation2 + $0x11] sm:$0x1] %v5741_v7  ;;  %v2874_v16 = vld [vmem:[%s5738_s5 + $0xa8] sm:$0xff]  ;;  %s4640_s20 = sshll.u32 %s5768_s25, 5 }
  0x17   : > { %687 = vst [vmem:[#allocation2 + $0x29] sm:$0x1] %v5741_v7  ;;  %688 = vst [vmem:[#allocation2 + $0x41] sm:$0x1] %v5741_v7  ;;  %s2841_s22 = sshll.u32 %s408_s15, 1  ;;  %p417_p7 = scmp.gt.s32.totalorder %s4611_s21, 0  ;;  %3902 = vmatprep.subr.bf16.mxu1 %v3901_v14  ;;  %v3905_v20 = vpack.c.bf16 %v2874_v16, %v2873_v15 }
  0x18   : > { %689 = vst [vmem:[#allocation2 + $0x59] sm:$0x1] %v5741_v7  ;;  %690 = vst [vmem:[#allocation2 + $0x71] sm:$0x1] %v5741_v7  ;;  %v2923_v18 = vld [vmem:[%s5738_s5 + $0x230] sm:$0xff]  ;;  %v2924_v19 = vld [vmem:[%s5738_s5 + $0x238] sm:$0xff]  ;;  %s4650_s11 = sadd.s32 %s4640_s20, %s2841_s22  ;;  %4032 = vmatpush3.bf16.msra.mxu0 %v4029_v8 }
  0x19   : > { %691 = vst [vmem:[#allocation2 + $0x89] sm:$0x1] %v5741_v7  ;;  %692 = vst [vmem:[#allocation2 + $0xa1] sm:$0x1] %v5741_v7  ;;  %p2846_p8 = scmp.lt.s32.totalorder %s4611_s21, 15  ;;  %v2875_v21 = vld [vmem:[%s5738_s5 + $0xb0] sm:$0xff]  ;;  %4034 = vmatprep.subr.bf16.mxu0 %v4033_v17  ;;  %3904 = vmatpush3.bf16.msra.mxu1 %v3901_v14  ;;  %v4037_v23 = vpack.c.bf16 %v2924_v19, %v2923_v18 }
  0x1a   : > { %693 = vst [vmem:[#allocation2 + $0xb9] sm:$0x1] %v5741_v7  ;;  %694 = vst [vmem:[#allocation2 + $0xd1] sm:$0x1] %v5741_v7  ;;  %v2876_v22 = vld [vmem:[%s5738_s5 + $0xb8] sm:$0xff]  ;;  %s2843_s17 = sshll.u32 %s4650_s11, 3  ;;  %3906 = vmatprep.subr.bf16.mxu1 %v3905_v20 }
  0x1b   : > { %695 = vst [vmem:[#allocation2 + $0xe9] sm:$0x1] %v5741_v7  ;;  %s433_s18 = sadd.s32 8, %s4577_s14  ;;  %s4666_s22 = scalar_lea.vmem %s5733_s0, %s2843_s17  ;;  %v2925_v24 = vld [vmem:[%s5738_s5 + $0x240] sm:$0xff]  ;;  %v2926_v25 = vld [vmem:[%s5738_s5 + $0x248] sm:$0xff]  ;;  %v3909_v26 = vpack.c.bf16 %v2876_v22, %v2875_v21  ;;  %v2927_v40 = vld [vmem:[%s5738_s5 + $0x250] sm:$0xff] }
  0x1c   : > { %p4668_p9 = scmp.lt.s32.totalorder %s433_s18, 15  ;;  %v4684_v27 = vld [vmem:[%s5736_s3] ss:$0 sm:$0xff]  ;;  %v2878_v31 = vld [vmem:[%s5738_s5 + $0xc8] sm:$0xff]  ;;  %4036 = vmatpush3.bf16.msra.mxu0 %v4033_v17  ;;  %v528_v35 = vld [vmem:[%s4666_s22 + $0x10] sm:$0xff]  ;;  %v4041_v36 = vpack.c.bf16 %v2926_v25, %v2925_v24  ;;  %p470_p10 = scmp.gt.s32.totalorder %s4471_s24, 0 }
  0x1d   : > { %s418_s13 = scalar_select %p417_p7, %s4611_s21, 0  ;;  %v4689_v28 = vld [vmem:[%s5737_s4] ss:$0 sm:$0xff]  ;;  %v527_v32 = vld [vmem:[%s4666_s22 + $0x8] sm:$0xff]  ;;  %4038 = vmatprep.subr.bf16.mxu0 %v4037_v23  ;;  %3908 = vmatpush3.bf16.msra.mxu1 %v3905_v20  ;;  %v529_v38 = vld [vmem:[%s4666_s22 + $0x18] sm:$0xff]  ;;  %v544_v39 = vmul.f32 %v4684_v27, %v528_v35  ;;  %vm766_vm0 = vcmask 1046528  }
  0x1e   : > { %v526_v29 = vld [vmem:[%s4666_s22] sm:$0xff]  ;;  %v543_v34 = vmul.f32 %v4684_v27, %v527_v32  ;;  %s5772_s18 = smov (!%p4668_p9, %s433_s18), 15  ;;  %3910 = vmatprep.subr.bf16.mxu1 %v3909_v26  ;;  %v2928_v41 = vld [vmem:[%s5738_s5 + $0x258] sm:$0xff]  ;;  %v545_v44 = vmul.f32 %v4684_v27, %v529_v38  ;;  %v2879_v46 = vld [vmem:[%s5738_s5 + $0xd0] sm:$0xff]  ;;  %vm1130_vm1 = vcmask 1045504   ;;  %p462_p11 = scmp.lt.s32.totalorder %s4471_s24, 1 }
  0x1f   : > { %v2877_v30 = vld [vmem:[%s5738_s5 + $0xc0] sm:$0xff]  ;;  %v542_v33 = vmul.f32 %v4684_v27, %v526_v29  ;;  %s5770_s13 = smov (!%p2846_p8, %s418_s13), 15  ;;  %v2880_v47 = vld [vmem:[%s5738_s5 + $0xd8] sm:$0xff]  ;;  %v4733_v49 = vadd.f32 %v4689_v28, %v544_v39  ;;  %v531_v53 = vld [vmem:[%s4666_s22 + $0x28] sm:$0xff]  ;;  %v4045_v54 = vpack.c.bf16 %v2928_v41, %v2927_v40  ;;  %s5774_s18 = smov (!%p4668_p9, %s5772_s18), 15  ;;  %vm4491_vm2 = vmmov 0  }
  0x20   : > { %s2851_s21 = sshll.u32 %s5770_s13, 1  ;;  %v3913_v42 = vpack.c.bf16 %v2878_v31, %v2877_v30  ;;  %v4720_v43 = vadd.f32 %v4689_v28, %v543_v34  ;;  %v530_v45 = vld [vmem:[%s4666_s22 + $0x20] sm:$0xff]  ;;  %4040 = vmatpush3.bf16.msra.mxu0 %v4037_v23  ;;  %v4740_v52 = vadd.f32 %v4689_v28, %v545_v44  ;;  %v2930_v55 = vld [vmem:[%s5738_s5 + $0x268] sm:$0xff]  ;;  %v3917_v60 = vpack.c.bf16 %v2880_v47, %v2879_v46  ;;  %v532_v4 = vld [vmem:[%s4666_s22 + $0x30] sm:$0xff]  ;;  %s4817_s23 = sshll.u32 %s5774_s18, 1 }
  0x21   : > { %v4709_v37 = vadd.f32 %v4689_v28, %v542_v33  ;;  %s425_s9 = sadd.s32 %s2851_s21, %s4640_s20  ;;  %v2929_v50 = vld [vmem:[%s5738_s5 + $0x260] sm:$0xff]  ;;  %4042 = vmatprep.subr.bf16.mxu0 %v4041_v36  ;;  %3912 = vmatpush3.bf16.msra.mxu1 %v3909_v26  ;;  %v592_v56 = vmul.f32 0.70710677, %v4733_v49  ;;  %v546_v59 = vmul.f32 %v4684_v27, %v530_v45  ;;  %v2882_v62 = vld [vmem:[%s5738_s5 + $0xe8] sm:$0xff]  ;;  %v547_v2 = vmul.f32 %v4684_v27, %v531_v53  ;;  %v533_v5 = vld [vmem:[%s4666_s22 + $0x38] sm:$0xff]  ;;  %s442_s12 = sadd.s32 %s4817_s23, %s4640_s20 }
  0x22   : > { %s2853_s15 = sshll.u32 %s425_s9, 3  ;;  %v591_v51 = vmul.f32 0.70710677, %v4720_v43  ;;  %3914 = vmatprep.subr.bf16.mxu1 %v3913_v42  ;;  %v2881_v61 = vld [vmem:[%s5738_s5 + $0xe0] sm:$0xff]  ;;  %v593_v63 = vmul.f32 0.70710677, %v4740_v52  ;;  %v4049_v6 = vpack.c.bf16 %v2930_v55, %v2929_v50  ;;  %v548_v20 = vmul.f32 %v4684_v27, %v532_v4  ;;  %s5636_s16 = scalar_lea.vmem %s5739_s6, %s2843_s17 }
  0x23   : > { %v590_v48 = vmul.f32 0.70710677, %v4709_v37  ;;  %s427_s10 = scalar_lea.vmem %s5734_s1, %s2853_s15  ;;  %v4763_v3 = vadd.f32 %v4689_v28, %v546_v59  ;;  %v2931_v8 = vld [vmem:[%s5738_s5 + $0x270] sm:$0xff]  ;;  %v2932_v9 = vld [vmem:[%s5738_s5 + $0x278] sm:$0xff]  ;;  %v2933_v10 = vld [vmem:[%s5738_s5 + $0x280] sm:$0xff]  ;;  %v3921_v12 = vpack.c.bf16 %v2882_v62, %v2881_v61  ;;  %v4795_v17 = vadd.f32 %v4689_v28, %v547_v2  ;;  %s2860_s13 = sshll.u32 %s442_s12, 3 }
  0x24   : > { %v476_v57 = vld [vmem:[%s427_s10] sm:$0xff]  ;;  %v477_v58 = vld [vmem:[%s427_s10 + $0x8] sm:$0xff]  ;;  %4044 = vmatpush3.bf16.msra.mxu0 %v4041_v36  ;;  %v2883_v14 = vld [vmem:[%s5738_s5 + $0xf0] sm:$0xff]  ;;  %v549_v21 = vmul.f32 %v4684_v27, %v533_v5  ;;  %v4053_v24 = vpack.c.bf16 %v2932_v9, %v2931_v8  ;;  %s4805_s8 = scalar_select %p470_p10, 1, 0  ;;  %v4812_v30 = vadd.f32 %v4689_v28, %v548_v20  ;;  %v574_v38 = vmul.f32 0.5, %v4709_v37 }
  0x25   : > { %4405 = verf.f32 %v590_v48  ;;  %v484_v0 = vmul.f32 %v4684_v27, %v476_v57  ;;  %v485_v1 = vmul.f32 %v4684_v27, %v477_v58  ;;  %4046 = vmatprep.subr.bf16.mxu0 %v4045_v54  ;;  %3916 = vmatpush3.bf16.msra.mxu1 %v3913_v42  ;;  %v2934_v13 = vld [vmem:[%s5738_s5 + $0x288] sm:$0xff]  ;;  %v2884_v15 = vld [vmem:[%s5738_s5 + $0xf8] sm:$0xff]  ;;  %v594_v19 = vmul.f32 0.70710677, %v4763_v3  ;;  %v534_v22 = vld [vmem:[%s4666_s22 + $0x40] sm:$0xff]  ;;  %s5776_s24 = smov (!%p462_p11, %s4471_s24), 1 }
  0x26   : > { %4407 = verf.f32 %v591_v51  ;;  %3918 = vmatprep.subr.bf16.mxu1 %v3917_v60  ;;  %v535_v23 = vld [vmem:[%s4666_s22 + $0x48] sm:$0xff]  ;;  %v595_v26 = vmul.f32 0.70710677, %v4795_v17  ;;  %v4809_v29 = vpack.c.bf16 %v2934_v13, %v2933_v10  ;;  %v4815_v31 = vadd.f32 %v4689_v28, %v549_v21  ;;  %v2935_v33 = vld [vmem:[%s5738_s5 + $0x290] sm:$0xff]  ;;  %v2936_v34 = vld [vmem:[%s5738_s5 + $0x298] sm:$0xff]  ;;  %s472_s21 = scvt.s32.f32 %s4805_s8  ;;  %s444_s8 = scalar_lea.vmem %s5735_s2, %s2860_s13 }
  0x27   : > { %4409 = verf.f32 %v592_v56  ;;  %v4777_v11 = vadd.f32 %v4689_v28, %v484_v0  ;;  %v4792_v16 = vadd.f32 %v4689_v28, %v485_v1  ;;  %v3925_v32 = vpack.c.bf16 %v2884_v15, %v2883_v14  ;;  %v726_v40 = vld [vmem:[%s5738_s5] sm:$0xff]  ;;  %v727_v41 = vld [vmem:[%s5738_s5 + $0x8] sm:$0xff]  ;;  %v536_v51 = vld [vmem:[%s4666_s22 + $0x50] sm:$0xff]  ;;  %s5286_s18 = scalar_select %p462_p11, 1, 0 }
  0x28   : > { %4411 = verf.f32 %v593_v63  ;;  %4048 = vmatpush3.bf16.msra.mxu0 %v4045_v54  ;;  %v550_v35 = vmul.f32 %v4684_v27, %v534_v22  ;;  %v551_v36 = vmul.f32 %v4684_v27, %v535_v23  ;;  %v575_v39 = vmul.f32 0.5, %v4720_v43  ;;  %v537_v53 = vld [vmem:[%s4666_s22 + $0x58] sm:$0xff]  ;;  %v538_v2 = vld [vmem:[%s4666_s22 + $0x60] sm:$0xff]  ;;  %s2865_s11 = sshll.u32 %s5768_s25, 1 }
  0x29   : > { %v496_v18 = vmul.f32 0.70710677, %v4777_v11  ;;  %v497_v25 = vmul.f32 0.70710677, %v4792_v16  ;;  %4050 = vmatprep.subr.bf16.mxu0 %v4049_v6  ;;  %3920 = vmatpush3.bf16.msra.mxu1 %v3917_v60  ;;  %v596_v42 = vmul.f32 0.70710677, %v4812_v30  ;;  %v4844_v50 = vpack.c.bf16 %v2936_v34, %v2935_v33  ;;  %s465_s17 = sadd.s32 %s2865_s11, %s5776_s24 }
  0x2a   : > { %3922 = vmatprep.subr.bf16.mxu1 %v3921_v12  ;;  %v597_v37 = vmul.f32 0.70710677, %v4815_v31  ;;  %v566_v45 = vadd.f32 %v4689_v28, %v550_v35  ;;  %v4841_v43 = vadd.f32 %v4689_v28, %v551_v36  ;;  %v576_v48 = vmul.f32 0.5, %v4733_v49  ;;  %s2866_s20 = sshll.u32 %s465_s17, 1 }
  0x2b   : > { %4413 = verf.f32 %v496_v18  ;;  %v577_v56 = vmul.f32 0.5, %v4740_v52  ;;  %v4850_v57 = vpack.c.bf16 %v727_v41, %v726_v40  ;;  %v552_v0 = vmul.f32 %v4684_v27, %v536_v51  ;;  %s467_s19 = scalar_lea.vmem %s5740_s7, %s2866_s20 }
  0x2c   : > { %4415 = verf.f32 %v497_v25  ;;  %4052 = vmatpush3.bf16.msra.mxu0 %v4049_v6  ;;  %v598_v60 = vmul.f32 0.70710677, %v566_v45  ;;  %v599_v61 = vmul.f32 0.70710677, %v4841_v43  ;;  %v553_v1 = vmul.f32 %v4684_v27, %v537_v53  ;;  %v539_v6 = vld [vmem:[%s4666_s22 + $0x68] sm:$0xff] }
  0x2d   : > { %4417 = verf.f32 %v594_v19  ;;  %4054 = vmatprep.subr.bf16.mxu0 %v4053_v24  ;;  %3924 = vmatpush3.bf16.msra.mxu1 %v3921_v12  ;;  %v494_v4 = vmul.f32 0.5, %v4777_v11  ;;  %v504_v5 = vstv %s472_s21  ;;  %v4860_v9 = vadd.f32 %v4689_v28, %v552_v0 }
  0x2e   : > { %4419 = verf.f32 %v595_v26  ;;  %3926 = vmatprep.subr.bf16.mxu1 %v3925_v32  ;;  %v4863_v10 = vadd.f32 %v4689_v28, %v553_v1  ;;  %v495_v13 = vmul.f32 0.5, %v4792_v16  ;;  %v578_v11 = vmul.f32 0.5, %v4763_v3 }
  0x2f   : > { %v4406_v44 = vpop.eup %4405  ;;  %4421 = verf.f32 %v596_v42  ;;  %v579_v14 = vmul.f32 0.5, %v4795_v17  ;;  %v554_v15 = vmul.f32 %v4684_v27, %v538_v2  ;;  %v580_v20 = vmul.f32 0.5, %v4812_v30 }
  0x30   : > { %v4408_v46 = vpop.eup %4407  ;;  %v622_v47 = vadd.f32 1.0, %v4406_v44  ;;  %4423 = verf.f32 %v597_v37  ;;  %4056 = vmatpush3.bf16.msra.mxu0 %v4053_v24  ;;  %v600_v21 = vmul.f32 0.70710677, %v4860_v9  ;;  %v555_v22 = vmul.f32 %v4684_v27, %v539_v6  ;;  %v541_v37 = vld [vmem:[%s4666_s22 + $0x78] sm:$0xff]  ;;  %v2937_v6 = vld [vmem:[%s5738_s5 + $0x2a0] sm:$0xff] }
  0x31   : > { %v4410_v54 = vpop.eup %4409  ;;  %v623_v55 = vadd.f32 1.0, %v4408_v46  ;;  %4425 = verf.f32 %v598_v60  ;;  %4058 = vmatprep.subr.bf16.mxu0 %v4809_v29  ;;  %3928 = vmatpush3.bf16.msra.mxu1 %v3925_v32  ;;  %v581_v24 = vmul.f32 0.5, %v4815_v31  ;;  %v4874_v25 = vmul.f32 0.5, %v566_v45  ;;  %v540_v31 = vld [vmem:[%s4666_s22 + $0x70] sm:$0xff] }
  0x32   : > { %v4412_v58 = vpop.eup %4411  ;;  %v638_v59 = vmul.f32 %v622_v47, %v574_v38  ;;  %v624_v49 = vadd.f32 1.0, %v4410_v54  ;;  %4427 = verf.f32 %v599_v61  ;;  %3930 = vmatprep.subr.bf16.mxu1 %v4850_v57  ;;  %v601_v3 = vmul.f32 0.70710677, %v4863_v10 }
  0x33   : > { %v639_v62 = vmul.f32 %v623_v55, %v575_v39  ;;  %v625_v63 = vadd.f32 1.0, %v4412_v58  ;;  %v4878_v33 = vmul.f32 0.5, %v4841_v43  ;;  %4429 = verf.f32 %v600_v21 }
  0x34   : > { %657 = vst [vmem:[#allocation2 + $0x19] sm:$0xff] %v638_v59  ;;  %v640_v52 = vmul.f32 %v624_v49, %v576_v48  ;;  %4431 = verf.f32 %v601_v3  ;;  %v4881_v36 = vadd.f32 %v4689_v28, %v554_v15  ;;  %v4887_v44 = vadd.f32 %v4689_v28, %v555_v22  ;;  %v728_v15 = vld [vmem:[%s5738_s5 + $0x10] sm:$0xff] }
  0x35   : > { %658 = vst [vmem:[#allocation2 + $0x21] sm:$0xff] %v639_v62  ;;  %v641_v8 = vmul.f32 %v625_v63, %v577_v56  ;;  %v4414_v12 = vpop.eup %4413  ;;  %v556_v58 = vmul.f32 %v4684_v27, %v540_v31  ;;  %v557_v0 = vmul.f32 %v4684_v27, %v541_v37  ;;  %v2939_v22 = vld [vmem:[%s5738_s5 + $0x2b0] sm:$0xff] }
  0x36   : > { %659 = vst [vmem:[#allocation2 + $0x31] sm:$0xff] %v640_v52  ;;  %v4416_v18 = vpop.eup %4415  ;;  %v500_v19 = vadd.f32 1.0, %v4414_v12  ;;  %v602_v63 = vmul.f32 0.70710677, %v4881_v36 }
  0x37   : > { %660 = vst [vmem:[#allocation2 + $0x39] sm:$0xff] %v641_v8  ;;  %v4418_v23 = vpop.eup %4417  ;;  %v501_v16 = vadd.f32 1.0, %v4416_v18  ;;  %v2938_v8 = vld [vmem:[%s5738_s5 + $0x2a8] sm:$0xff]  ;;  %v729_v18 = vld [vmem:[%s5738_s5 + $0x18] sm:$0xff] }
  0x38   : > { %v4420_v17 = vpop.eup %4419  ;;  %v502_v26 = vmul.f32 %v500_v19, %v494_v4  ;;  %v626_v32 = vadd.f32 1.0, %v4418_v23  ;;  %4433 = verf.f32 %v602_v63  ;;  %v4934_v19 = vadd.f32 %v4689_v28, %v556_v58  ;;  %v2940_v23 = vld [vmem:[%s5738_s5 + $0x2b8] sm:$0xff] }
  0x39   : > { %v4422_v30 = vpop.eup %4421  ;;  %v503_v34 = vmul.f32 %v501_v16, %v495_v13  ;;  %v627_v35 = vadd.f32 1.0, %v4420_v17  ;;  %v584_v17 = vmul.f32 0.5, %v4860_v9  ;;  %v4960_v31 = vpack.c.bf16 %v729_v18, %v728_v15 }
  0x3a   : > { %v4424_v38 = vpop.eup %4423  ;;  %v505_v40 = vmul.f32 %v504_v5, %v502_v26  ;;  %v642_v41 = vmul.f32 %v626_v32, %v578_v11  ;;  %v628_v42 = vadd.f32 1.0, %v4422_v30  ;;  %v603_v11 = vmul.f32 0.70710677, %v4887_v44 }
  0x3b   : > { %v4884_v39 = vld [vmem:[#allocation2 + $0x18] sm:$0xff]  ;;  %v506_v47 = vmul.f32 %v504_v5, %v503_v34  ;;  %v643_v48 = vmul.f32 %v627_v35, %v579_v14  ;;  %v629_v51 = vadd.f32 1.0, %v4424_v38  ;;  %v4426_v59 = vpop.eup %4425  ;;  %v604_v26 = vmul.f32 0.70710677, %v4934_v19 }
  0x3c   : > { %v4890_v45 = vld [vmem:[#allocation2 + $0x20] sm:$0xff]  ;;  %v772_v43 = vrot.slane %v4884_v39, 1  ;;  %v4893_v46 = vld [vmem:[#allocation2 + $0x28] sm:$0x3]  ;;  %654 = vst [vmem:[#allocation2 + $0x1] sm:$0xff] %v505_v40  ;;  %661 = vst [vmem:[#allocation2 + $0x49] sm:$0xff] %v642_v41  ;;  %v644_v56 = vmul.f32 %v628_v42, %v580_v20  ;;  %v4428_v1 = vpop.eup %4427  ;;  %v4937_v20 = vadd.f32 %v4689_v28, %v557_v0  ;;  %4435 = verf.f32 %v603_v11 }
  0x3d   : > { %v773_v53 = vrot.slane %v4890_v45, 1  ;;  %v775_v54 = vrot.slane %v4893_v46, 1  ;;  %v4897_v55 = vld [vmem:[#allocation2 + $0x30] sm:$0xff]  ;;  %655 = vst [vmem:[#allocation2 + $0x9] sm:$0xff] %v506_v47  ;;  %662 = vst [vmem:[#allocation2 + $0x51] sm:$0xff] %v643_v48  ;;  %v645_v62 = vmul.f32 %v629_v51, %v581_v24  ;;  %v630_v12 = vadd.f32 1.0, %v4426_v59  ;;  %v4430_v3 = vpop.eup %4429 }
  0x3e   : > { %v4900_v49 = vld [vmem:[#allocation2 + $0x38] sm:$0xff]  ;;  %v777_v60 = vrot.slane %v4897_v55, 1  ;;  %v4903_v61 = vld [vmem:[#allocation2 + $0x40] sm:$0x3]  ;;  %663 = vst [vmem:[#allocation2 + $0x61] sm:$0xff] %v644_v56  ;;  %v631_v13 = vadd.f32 1.0, %v4428_v1  ;;  %v4432_v30 = vpop.eup %4431  ;;  %v4972_v37 = vpack.c.bf16 %v2940_v23, %v2939_v22  ;;  %4437 = verf.f32 %v604_v26 }
  0x3f   : > { %v4908_v2 = vsel %vm766_vm0, %v772_v43, %v773_v53  ;;  %v4911_v52 = vsel %vm766_vm0, %v773_v53, %v775_v54  ;;  %v778_v4 = vrot.slane %v4900_v49, 1  ;;  %v780_v5 = vrot.slane %v4903_v61, 1  ;;  %664 = vst [vmem:[#allocation2 + $0x69] sm:$0xff] %v645_v62  ;;  %v2942_v11 = vld [vmem:[%s5738_s5 + $0x2c8] sm:$0xff] }
  0x40   : > { %3579 = vmatprep.mubr.f32.mxu0 %v4908_v2  ;;  %v646_v16 = vmul.f32 %v630_v12, %v4874_v25  ;;  %v647_v24 = vmul.f32 %v631_v13, %v4878_v33  ;;  %v605_v32 = vmul.f32 0.70710677, %v4937_v20  ;;  %v585_v25 = vmul.f32 0.5, %v4863_v10  ;;  %v2941_v13 = vld [vmem:[%s5738_s5 + $0x2c0] sm:$0xff] }
  0x41   : > { %3580 = vmatmul.mubr.f32.vlgmr.msra.gmra.mrb[0].mxu0 %v4911_v52  ;;  %v4925_v14 = vsel %vm766_vm0, %v777_v60, %v778_v4  ;;  %v4942_v21 = vsel %vm766_vm0, %v778_v4, %v780_v5  ;;  %v632_v33 = vadd.f32 1.0, %v4430_v3  ;;  %v586_v51 = vmul.f32 0.5, %v4881_v36  ;;  %v730_v5 = vld [vmem:[%s5738_s5 + $0x20] sm:$0xff] }
  0x42   : > { %4060 = vmatpush3.bf16.msra.mxu0 %v4809_v29  ;;  %3582 = vmatprep.mubr.f32.mxu0 %v4925_v14  ;;  %v4065_v29 = vpack.c.bf16 %v2938_v8, %v2937_v6  ;;  %665 = vst [vmem:[#allocation2 + $0x79] sm:$0xff] %v646_v16  ;;  %666 = vst [vmem:[#allocation2 + $0x81] sm:$0xff] %v647_v24  ;;  %v633_v59 = vadd.f32 1.0, %v4432_v30  ;;  %4439 = verf.f32 %v605_v32  ;;  %v731_v6 = vld [vmem:[%s5738_s5 + $0x28] sm:$0xff]  ;;  %v4434_v12 = vpop.eup %4433  ;;  %v587_v24 = vmul.f32 0.5, %v4887_v44  ;;  %v732_v44 = vld [vmem:[%s5738_s5 + $0x30] sm:$0xff] }
  0x43   : > { %4062 = vmatprep.subr.bf16.mxu0 %v4844_v50  ;;  %v4956_v34 = vld [vmem:[#allocation2] sm:$0xff]  ;;  %v4958_v35 = vld [vmem:[#allocation2 + $0x48] sm:$0xff]  ;;  %v648_v60 = vmul.f32 %v632_v33, %v584_v17  ;;  %v634_v3 = vadd.f32 1.0, %v4434_v12  ;;  %v4073_v30 = vpack.c.bf16 %v2942_v11, %v2941_v13 }
  0x44   : > { %v4963_v38 = vld [vmem:[#allocation2 + $0x8] sm:$0xff]  ;;  %v767_v9 = vrot.slane %v4956_v34, 1  ;;  %v4967_v40 = vld [vmem:[#allocation2 + $0x10] sm:$0x3]  ;;  %v782_v42 = vrot.slane %v4958_v35, 1  ;;  %v649_v8 = vmul.f32 %v633_v59, %v585_v25  ;;  %v2945_v12 = vld [vmem:[%s5738_s5 + $0x2e0] sm:$0xff] }
  0x45   : > { %3583 = vmatmul.mubr.f32.gmra.mrb[2].mxu0 %v4942_v21  ;;  %v4969_v41 = vld [vmem:[#allocation2 + $0x50] sm:$0xff]  ;;  %v768_v43 = vrot.slane %v4963_v38, 1  ;;  %v770_v10 = vrot.slane %v4967_v40, 1  ;;  %v4978_v48 = vld [vmem:[#allocation2 + $0x58] sm:$0x3]  ;;  %v4982_v54 = vld [vmem:[#allocation2 + $0x60] sm:$0xff]  ;;  %v650_v33 = vmul.f32 %v634_v3, %v586_v51 }
  0x46   : > { %4064 = vmatpush3.bf16.msra.mxu0 %v4844_v50  ;;  %v783_v47 = vrot.slane %v4969_v41, 1  ;;  %v785_v53 = vrot.slane %v4978_v48, 1  ;;  %v4984_v56 = vld [vmem:[#allocation2 + $0x68] sm:$0xff]  ;;  %v4986_v58 = vld [vmem:[#allocation2 + $0x70] sm:$0x3]  ;;  %v787_v36 = vrot.slane %v4982_v54, 1  ;;  %v4436_v17 = vpop.eup %4435 }
  0x47   : > { %4066 = vmatprep.subr.bf16.mxu0 %v4065_v29  ;;  %v769_v50 = vsel %vm766_vm0, %v767_v9, %v768_v43  ;;  %v771_v62 = vsel %vm766_vm0, %v768_v43, %v770_v10  ;;  %v788_v1 = vrot.slane %v4984_v56, 1  ;;  %v790_v4 = vrot.slane %v4986_v58, 1  ;;  %667 = vst [vmem:[#allocation2 + $0x91] sm:$0xff] %v648_v60  ;;  %668 = vst [vmem:[#allocation2 + $0x99] sm:$0xff] %v649_v8  ;;  %v2944_v43 = vld [vmem:[%s5738_s5 + $0x2d8] sm:$0xff]  ;;  %v2946_v13 = vld [vmem:[%s5738_s5 + $0x2e8] sm:$0xff] }
  0x48   : > { %v4991_v63 = vsel %vm766_vm0, %v782_v42, %v783_v47  ;;  %3355 = vmatprep.mubr.f32.mxu1 %v769_v50  ;;  %v4996_v0 = vsel %vm766_vm0, %v783_v47, %v785_v53  ;;  %v635_v25 = vadd.f32 1.0, %v4436_v17  ;;  %v2943_v42 = vld [vmem:[%s5738_s5 + $0x2d0] sm:$0xff]  ;;  %v588_v10 = vmul.f32 0.5, %v4934_v19  ;;  %v4438_v47 = vpop.eup %4437  ;;  %669 = vst [vmem:[#allocation2 + $0xa9] sm:$0xff] %v650_v33 }
  0x49   : > { %3585 = vmatprep.mubr.f32.mxu0 %v4991_v63  ;;  %3356 = vmatmul.mubr.f32.vlgmr.msra.gmra.mrb[0].mxu1 %v771_v62  ;;  %v5016_v15 = vsel %vm766_vm0, %v787_v36, %v788_v1  ;;  %v5019_v18 = vsel %vm766_vm0, %v788_v1, %v790_v4  ;;  %v5021_v22 = vld [vmem:[#allocation2 + $0x78] sm:$0xff]  ;;  %v5023_v23 = vld [vmem:[#allocation2 + $0x80] sm:$0xff]  ;;  %v5025_v16 = vld [vmem:[#allocation2 + $0x88] sm:$0x3]  ;;  %v589_v60 = vmul.f32 0.5, %v4937_v20  ;;  %v636_v50 = vadd.f32 1.0, %v4438_v47 }
  0x4a   : > { %3586 = vmatmul.mubr.f32.gmra.mrb[4].mxu0 %v4996_v0  ;;  %3932 = vmatpush3.bf16.msra.mxu1 %v4850_v57  ;;  %v3937_v57 = vpack.c.bf16 %v731_v6, %v730_v5  ;;  %v793_v26 = vrot.slane %v5023_v23, 1  ;;  %v795_v32 = vrot.slane %v5025_v16, 1  ;;  %v651_v51 = vmul.f32 %v635_v25, %v587_v24  ;;  %v734_v36 = vld [vmem:[%s5738_s5 + $0x40] sm:$0xff] }
  0x4b   : > { %3358 = vmatprep.mubr.f32.mxu1 %v4908_v2  ;;  %4068 = vmatpush3.bf16.msra.mxu0 %v4065_v29  ;;  %v792_v2 = vrot.slane %v5021_v22, 1  ;;  %v733_v29 = vld [vmem:[%s5738_s5 + $0x38] sm:$0xff]  ;;  %v4077_v62 = vpack.c.bf16 %v2944_v43, %v2943_v42  ;;  %v652_v5 = vmul.f32 %v636_v50, %v588_v10  ;;  %v738_v47 = vld [vmem:[%s5738_s5 + $0x60] sm:$0xff] }
  0x4c   : > { %3934 = vmatprep.subr.bf16.mxu1 %v4960_v31  ;;  %3588 = vmatprep.mubr.f32.mxu0 %v5016_v15  ;;  %v3941_v53 = vpack.c.bf16 %v733_v29, %v732_v44  ;;  %v4440_v19 = vpop.eup %4439  ;;  %670 = vst [vmem:[#allocation2 + $0xb1] sm:$0xff] %v651_v51  ;;  %v2947_v44 = vld [vmem:[%s5738_s5 + $0x2f0] sm:$0xff]  ;;  %v2948_v29 = vld [vmem:[%s5738_s5 + $0x2f8] sm:$0xff]  ;;  %v739_v51 = vld [vmem:[%s5738_s5 + $0x68] sm:$0xff] }
  0x4d   : > { %4070 = vmatprep.subr.bf16.mxu0 %v4972_v37  ;;  %3359 = vmatmul.mubr.f32.gmra.mrb[2].mxu1 %v4911_v52  ;;  %v5043_v9 = vsel %vm766_vm0, %v792_v2, %v793_v26  ;;  %v5055_v52 = vsel %vm766_vm0, %v793_v26, %v795_v32  ;;  %v637_v4 = vadd.f32 1.0, %v4440_v19  ;;  %671 = vst [vmem:[#allocation2 + $0xc1] sm:$0xff] %v652_v5  ;;  %v737_v2 = vld [vmem:[%s5738_s5 + $0x58] sm:$0xff] }
  0x4e   : > { %3589 = vmatmul.mubr.f32.gmra.mrb[6].mxu0 %v5019_v18  ;;  %3936 = vmatpush3.bf16.msra.mxu1 %v4960_v31  ;;  %v5058_v59 = vld [vmem:[#allocation2 + $0x90] sm:$0xff]  ;;  %v5071_v20 = vld [vmem:[#allocation2 + $0x98] sm:$0xff]  ;;  %v5073_v1 = vld [vmem:[#allocation2 + $0xa0] sm:$0x3]  ;;  %v4081_v32 = vpack.c.bf16 %v2946_v13, %v2945_v12  ;;  %v1137_v12 = vrot.slane %v4890_v45, 2  ;;  %v1132_v13 = vrot.slane %v4963_v38, 2 }
  0x4f   : > { %3361 = vmatprep.mubr.f32.mxu1 %v4925_v14  ;;  %4072 = vmatpush3.bf16.msra.mxu0 %v4972_v37  ;;  %v797_v31 = vrot.slane %v5058_v59, 1  ;;  %v735_v37 = vld [vmem:[%s5738_s5 + $0x48] sm:$0xff]  ;;  %v798_v6 = vrot.slane %v5071_v20, 1  ;;  %v800_v8 = vrot.slane %v5073_v1, 1  ;;  %v653_v24 = vmul.f32 %v637_v4, %v589_v60 }
  0x50   : > { %3938 = vmatprep.subr.bf16.mxu1 %v3937_v57  ;;  %3591 = vmatprep.mubr.f32.mxu0 %v5043_v9  ;;  %v3945_v11 = vpack.c.bf16 %v735_v37, %v734_v36  ;;  %v5098_v26 = vld [vmem:[#allocation2 + $0xa8] sm:$0xff]  ;;  %v1134_v60 = vrot.slane %v4967_v40, 2  ;;  %v3953_v36 = vpack.c.bf16 %v739_v51, %v738_v47  ;;  %v2949_v37 = vld [vmem:[%s5738_s5 + $0x300] sm:$0xff]  ;;  %v1141_v51 = vrot.slane %v4897_v55, 2 }
  0x51   : > { %4074 = vmatprep.subr.bf16.mxu0 %v4073_v30  ;;  %3362 = vmatmul.mubr.f32.gmra.mrb[4].mxu1 %v4942_v21  ;;  %v5085_v3 = vsel %vm766_vm0, %v797_v31, %v798_v6  ;;  %v5088_v17 = vsel %vm766_vm0, %v798_v6, %v800_v8  ;;  %672 = vst [vmem:[#allocation2 + $0xc9] sm:$0xff] %v653_v24  ;;  %v2950_v4 = vld [vmem:[%s5738_s5 + $0x308] sm:$0xff]  ;;  %v1136_v8 = vrot.slane %v4884_v39, 2 }
  0x52   : > { %3592 = vmatmul.mubr.f32.gmra.mrb[8].mxu0 %v5055_v52  ;;  %3940 = vmatpush3.bf16.msra.mxu1 %v3937_v57  ;;  %v736_v57 = vld [vmem:[%s5738_s5 + $0x50] sm:$0xff] }
  0x53   : > { %3364 = vmatprep.mubr.f32.mxu1 %v4991_v63  ;;  %4076 = vmatpush3.bf16.msra.mxu0 %v4073_v30  ;;  %v802_v30 = vrot.slane %v5098_v26, 1  ;;  %v5109_v25 = vld [vmem:[#allocation2 + $0xb0] sm:$0xff]  ;;  %v5111_v33 = vld [vmem:[#allocation2 + $0xb8] sm:$0x3]  ;;  %v3949_v42 = vpack.c.bf16 %v737_v2, %v736_v57 }
  0x54   : > { %3942 = vmatprep.subr.bf16.mxu1 %v3941_v53  ;;  %4078 = vmatprep.subr.bf16.mxu0 %v4077_v62  ;;  %v803_v43 = vrot.slane %v5109_v25, 1  ;;  %v805_v10 = vrot.slane %v5111_v33, 1  ;;  %v5130_v31 = vld [vmem:[#allocation2 + $0xc0] sm:$0xff]  ;;  %v740_v57 = vld [vmem:[%s5738_s5 + $0x70] sm:$0xff]  ;;  %v741_v2 = vld [vmem:[%s5738_s5 + $0x78] sm:$0xff] }
  0x55   : > { %3365 = vmatmul.mubr.f32.gmra.mrb[6].mxu1 %v4996_v0  ;;  %3594 = vmatprep.mubr.f32.mxu0 %v5085_v3  ;;  %v1546_v40 = vrot.slane %v5130_v31, 1  ;;  %v3957_v47 = vpack.c.bf16 %v741_v2, %v740_v57 }
  0x56   : > { %3944 = vmatpush3.bf16.msra.mxu1 %v3941_v53  ;;  %3367 = vmatprep.mubr.f32.mxu1 %v5016_v15  ;;  %v4085_v53 = vpack.c.bf16 %v2948_v29, %v2947_v44  ;;  %v5124_v50 = vsel %vm766_vm0, %v802_v30, %v803_v43  ;;  %v5128_v19 = vsel %vm766_vm0, %v803_v43, %v805_v10 }
  0x57   : > { %3595 = vmatmul.mubr.f32.gmra.mrb[10].mxu0 %v5088_v17  ;;  %3946 = vmatprep.subr.bf16.mxu1 %v3945_v11  ;;  %5748 = vst [vmem:[#allocation3_spill] sm:$0xff] %v5124_v50  ;;  %5749 = vst [vmem:[#allocation4_spill] sm:$0xff] %v5128_v19  ;;  %v5169_v44 = vsel %vm1130_vm1, %v1132_v13, %v1134_v60  ;;  %v4089_v10 = vpack.c.bf16 %v2950_v4, %v2949_v37  ;;  %v1142_v60 = vrot.slane %v4900_v49, 2  ;;  %v508_v37 = vld [vmem:[%s444_s8 + $0x8] sm:$0xff]  ;;  %v2885_v4 = vld [vmem:[%s5738_s5 + $0x100] sm:$0xff] }
  0x58   : > { %4080 = vmatpush3.bf16.msra.mxu0 %v4077_v62  ;;  %v1131_v62 = vrot.slane %v4956_v34, 2  ;;  %3597 = vmatprep.mubr.f32.mxu0 %v5124_v50  ;;  %v5145_v5 = vld [vmem:[#allocation2 + $0xc8] sm:$0xff]  ;;  %v5147_v6 = vld [vmem:[#allocation2 + $0xd0] sm:$0x3]  ;;  %v510_v2 = vmul.f32 %v4684_v27, %v508_v37  ;;  %v1149_v37 = vrot.slane %v4978_v48, 2  ;;  %v1152_v48 = vrot.slane %v4984_v56, 2 }
  0x59   : > { %3368 = vmatmul.mubr.f32.gmra.mrb[8].mxu1 %v5019_v18  ;;  %4082 = vmatprep.subr.bf16.mxu0 %v4081_v32  ;;  %v1549_v24 = vrot.slane %v5147_v6, 1  ;;  %v5207_v7 = vsel %vm1130_vm1, %v1141_v51, %v1142_v60 }
  0x5a   : > { %3948 = vmatpush3.bf16.msra.mxu1 %v3945_v11  ;;  %3370 = vmatprep.mubr.f32.mxu1 %v5043_v9  ;;  %v1547_v11 = vrot.slane %v5145_v5, 1  ;;  %v5166_v30 = vsel %vm1130_vm1, %v1131_v62, %v1132_v13  ;;  %v2952_v62 = vld [vmem:[%s5738_s5 + $0x318] sm:$0xff] }
  0x5b   : > { %3950 = vmatprep.subr.bf16.mxu1 %v3949_v42  ;;  %3598 = vmatmul.mubr.f32.gmra.mrb[12].mxu0 %v5128_v19 }
  0x5c   : > { %4084 = vmatpush3.bf16.msra.mxu0 %v4081_v32  ;;  %v1139_v32 = vrot.slane %v4893_v46, 2  ;;  %v5172_v29 = vsel %vm766_vm0, %v1546_v40, %v1547_v11  ;;  %v5176_v43 = vsel %vm766_vm0, %v1547_v11, %v1549_v24  ;;  %v2951_v46 = vld [vmem:[%s5738_s5 + $0x310] sm:$0xff]  ;;  %v507_v40 = vld [vmem:[%s444_s8] sm:$0xff]  ;;  %v1144_v11 = vrot.slane %v4903_v61, 2  ;;  %s475_s8 = scvt.s32.f32 %s5286_s18 }
  0x5d   : > { %3371 = vmatmul.mubr.f32.gmra.mrb[10].mxu1 %v5055_v52  ;;  %4086 = vmatprep.subr.bf16.mxu0 %v4085_v53  ;;  %5750 = vst [vmem:[#allocation5_spill] sm:$0xff] %v5172_v29  ;;  %5751 = vst [vmem:[#allocation6_spill] sm:$0xff] %v5176_v43  ;;  %v4093_v24 = vpack.c.bf16 %v2952_v62, %v2951_v46  ;;  %v509_v57 = vmul.f32 %v4684_v27, %v507_v40  ;;  %v2953_v61 = vld [vmem:[%s5738_s5 + $0x320] sm:$0xff]  ;;  %v2887_v27 = vld [vmem:[%s5738_s5 + $0x110] sm:$0xff] }
  0x5e   : > { %3952 = vmatpush3.bf16.msra.mxu1 %v3949_v42  ;;  %3373 = vmatprep.mubr.f32.mxu1 %v5085_v3  ;;  %v5183_v42 = vsel %vm1130_vm1, %v1136_v8, %v1137_v12  ;;  %v2886_v8 = vld [vmem:[%s5738_s5 + $0x108] sm:$0xff]  ;;  %v5199_v13 = vsel %vm1130_vm1, %v1137_v12, %v1139_v32  ;;  %v1147_v12 = vrot.slane %v4969_v41, 2  ;;  %v2888_v46 = vld [vmem:[%s5738_s5 + $0x118] sm:$0xff]  ;;  %v5229_v62 = vadd.f32 %v4689_v28, %v510_v2 }
  0x5f   : > { %3954 = vmatprep.subr.bf16.mxu1 %v3953_v36  ;;  %3600 = vmatprep.mubr.f32.mxu0 %v5172_v29  ;;  %v2954_v32 = vld [vmem:[%s5738_s5 + $0x328] sm:$0xff]  ;;  %v5226_v51 = vadd.f32 %v4689_v28, %v509_v57  ;;  %v5232_v40 = vsel %vm1130_vm1, %v1142_v60, %v1144_v11  ;;  %v2955_v60 = vld [vmem:[%s5738_s5 + $0x330] sm:$0xff]  ;;  %v2956_v11 = vld [vmem:[%s5738_s5 + $0x338] sm:$0xff] }
  0x60   : > { %3601 = vmatmul.mubr.f32.gmra.mrb[14].mxu0 %v5176_v43  ;;  %v516_v57 = vmul.f32 0.70710677, %v5229_v62  ;;  %v2890_v2 = vld [vmem:[%s5738_s5 + $0x128] sm:$0xff] }
  0x61   : > { %3374 = vmatmul.mubr.f32.gmra.mrb[12].mxu1 %v5088_v17  ;;  %4088 = vmatpush3.bf16.msra.mxu0 %v4085_v53  ;;  %v3961_v53 = vpack.c.bf16 %v2886_v8, %v2885_v4  ;;  %v4097_v4 = vpack.c.bf16 %v2954_v32, %v2953_v61  ;;  %v515_v8 = vmul.f32 0.70710677, %v5226_v51  ;;  %v1154_v61 = vrot.slane %v4986_v58, 2  ;;  %v2957_v58 = vld [vmem:[%s5738_s5 + $0x340] sm:$0xff] }
  0x62   : > { %3956 = vmatpush3.bf16.msra.mxu1 %v3953_v36  ;;  %3635 = vmatprep.mubr.f32.mxu0 %v5183_v42  ;;  %v1146_v36 = vrot.slane %v4958_v35, 2 }
  0x63   : > { %4090 = vmatprep.subr.bf16.mxu0 %v4089_v10  ;;  %3376 = vmatprep.mubr.f32.mxu1 %v5124_v50  ;;  %4441 = verf.f32 %v515_v8  ;;  %v1159_v8 = vrot.slane %v5025_v16, 2  ;;  %v2959_v16 = vld [vmem:[%s5738_s5 + $0x350] sm:$0xff] }
  0x64   : > { %3958 = vmatprep.subr.bf16.mxu1 %v3957_v47  ;;  %3636 = vmatmul.mubr.f32.vlgmr.msra.gmra.mrb[0].mxu0 %v5199_v13  ;;  %v5240_v28 = vsel %vm1130_vm1, %v1146_v36, %v1147_v12  ;;  %v5260_v36 = vsel %vm1130_vm1, %v1147_v12, %v1149_v37  ;;  %4443 = verf.f32 %v516_v57  ;;  %v2958_v12 = vld [vmem:[%s5738_s5 + $0x348] sm:$0xff]  ;;  %v5289_v37 = vsel %vm1130_vm1, %v1152_v48, %v1154_v61 }
  0x65   : > { %3377 = vmatmul.mubr.f32.gmra.mrb[14].mxu1 %v5128_v19  ;;  %4092 = vmatpush3.bf16.msra.mxu0 %v4089_v10  ;;  %v3965_v10 = vpack.c.bf16 %v2888_v46, %v2887_v27  ;;  %v2892_v46 = vld [vmem:[%s5738_s5 + $0x138] sm:$0xff]  ;;  %v1161_v57 = vrot.slane %v5058_v59, 2  ;;  %v513_v61 = vmul.f32 0.5, %v5226_v51  ;;  %v1166_v51 = vrot.slane %v5098_v26, 2 }
  0x66   : > { %3960 = vmatpush3.bf16.msra.mxu1 %v3957_v47  ;;  %3638 = vmatprep.mubr.f32.mxu0 %v5207_v7  ;;  %v1151_v47 = vrot.slane %v4982_v54, 2 }
  0x67   : > { %4094 = vmatprep.subr.bf16.mxu0 %v4093_v24  ;;  %3411 = vmatprep.mubr.f32.mxu1 %v4956_v34  ;;  %v2889_v34 = vld [vmem:[%s5738_s5 + $0x120] sm:$0xff] }
  0x68   : > { %3962 = vmatprep.subr.bf16.mxu1 %v3961_v53  ;;  %3639 = vmatmul.mubr.f32.gmra.mrb[2].mxu0 %v5232_v40  ;;  %v5266_v32 = vsel %vm1130_vm1, %v1151_v47, %v1152_v48  ;;  %v3969_v27 = vpack.c.bf16 %v2890_v2, %v2889_v34  ;;  %v1162_v47 = vrot.slane %v5071_v20, 2  ;;  %v2960_v48 = vld [vmem:[%s5738_s5 + $0x358] sm:$0xff]  ;;  %v1164_v2 = vrot.slane %v5073_v1, 2 }
  0x69   : > { %3412 = vmatmul.mubr.f32.vlgmr.msra.gmra.mrb[0].mxu1 %v4963_v38  ;;  %4096 = vmatpush3.bf16.msra.mxu0 %v4093_v24  ;;  %v4101_v38 = vpack.c.bf16 %v2956_v11, %v2955_v60  ;;  %v1156_v24 = vrot.slane %v5021_v22, 2  ;;  %v2893_v60 = vld [vmem:[%s5738_s5 + $0x140] sm:$0xff]  ;;  %v2894_v11 = vld [vmem:[%s5738_s5 + $0x148] sm:$0xff] }
  0x6a   : > { %3964 = vmatpush3.bf16.msra.mxu1 %v3961_v53  ;;  %3641 = vmatprep.mubr.f32.mxu0 %v5240_v28  ;;  %v1157_v53 = vrot.slane %v5023_v23, 2  ;;  %v3977_v1 = vpack.c.bf16 %v2894_v11, %v2893_v60  ;;  %v5342_v60 = vsel %vm1130_vm1, %v1162_v47, %v1164_v2  ;;  %v1169_v11 = vrot.slane %v5111_v33, 2  ;;  %v2963_v33 = vld [vmem:[%s5738_s5 + $0x370] sm:$0xff] }
  0x6b   : > { %4098 = vmatprep.subr.bf16.mxu0 %v4097_v4  ;;  %3414 = vmatprep.mubr.f32.mxu1 %v4884_v39  ;;  %v2891_v39 = vld [vmem:[%s5738_s5 + $0x130] sm:$0xff] }
  0x6c   : > { %3966 = vmatprep.subr.bf16.mxu1 %v3965_v10  ;;  %3642 = vmatmul.mubr.f32.gmra.mrb[4].mxu0 %v5260_v36  ;;  %v5315_v34 = vsel %vm1130_vm1, %v1157_v53, %v1159_v8  ;;  %v2895_v8 = vld [vmem:[%s5738_s5 + $0x150] sm:$0xff] }
  0x6d   : > { %3415 = vmatmul.mubr.f32.gmra.mrb[2].mxu1 %v4890_v45  ;;  %4100 = vmatpush3.bf16.msra.mxu0 %v4097_v4  ;;  %v4105_v45 = vpack.c.bf16 %v2958_v12, %v2957_v58  ;;  %v5297_v4 = vsel %vm1130_vm1, %v1156_v24, %v1157_v53  ;;  %v4442_v24 = vpop.eup %4441  ;;  %v5321_v58 = vsel %vm1130_vm1, %v1161_v57, %v1162_v47  ;;  %v1732_v47 = vrot.slane %v5145_v5, 2 }
  0x6e   : > { %3968 = vmatpush3.bf16.msra.mxu1 %v3965_v10  ;;  %3644 = vmatprep.mubr.f32.mxu0 %v5266_v32  ;;  %v3973_v10 = vpack.c.bf16 %v2892_v46, %v2891_v39  ;;  %v4109_v12 = vpack.c.bf16 %v2960_v48, %v2959_v16  ;;  %v4444_v53 = vpop.eup %4443  ;;  %v1167_v39 = vrot.slane %v5109_v25, 2  ;;  %v2962_v46 = vld [vmem:[%s5738_s5 + $0x368] sm:$0xff]  ;;  %v519_v57 = vadd.f32 1.0, %v4442_v24 }
  0x6f   : > { %4102 = vmatprep.subr.bf16.mxu0 %v4101_v38  ;;  %3417 = vmatprep.mubr.f32.mxu1 %v4897_v55  ;;  %v523_v16 = vstv %s475_s8  ;;  %v520_v48 = vadd.f32 1.0, %v4444_v53 }
  0x70   : > { %3970 = vmatprep.subr.bf16.mxu1 %v3969_v27  ;;  %3645 = vmatmul.mubr.f32.gmra.mrb[6].mxu0 %v5289_v37  ;;  %v521_v43 = vmul.f32 %v519_v57, %v513_v61  ;;  %v5348_v50 = vsel %vm1130_vm1, %v1166_v51, %v1167_v39  ;;  %v2897_v61 = vld [vmem:[%s5738_s5 + $0x160] sm:$0xff]  ;;  %v5367_v53 = vsel %vm1130_vm1, %v1167_v39, %v1169_v11  ;;  %v2900_v39 = vld [vmem:[%s5738_s5 + $0x178] sm:$0xff]  ;;  %v2902_v11 = vld [vmem:[%s5738_s5 + $0x188] sm:$0xff] }
  0x71   : > { %3418 = vmatmul.mubr.f32.gmra.mrb[4].mxu1 %v4900_v49  ;;  %4104 = vmatpush3.bf16.msra.mxu0 %v4101_v38  ;;  %v2961_v38 = vld [vmem:[%s5738_s5 + $0x360] sm:$0xff] }
  0x72   : > { %3972 = vmatpush3.bf16.msra.mxu1 %v3969_v27  ;;  %3647 = vmatprep.mubr.f32.mxu0 %v5297_v4  ;;  %v514_v27 = vmul.f32 0.5, %v5229_v62  ;;  %v2896_v62 = vld [vmem:[%s5738_s5 + $0x158] sm:$0xff]  ;;  %v4113_v29 = vpack.c.bf16 %v2962_v46, %v2961_v38  ;;  %v524_v2 = vmul.f32 %v523_v16, %v521_v43  ;;  %v2898_v38 = vld [vmem:[%s5738_s5 + $0x168] sm:$0xff]  ;;  %v1734_v43 = vrot.slane %v5147_v6, 2 }
  0x73   : > { %4106 = vmatprep.subr.bf16.mxu0 %v4105_v45  ;;  %3420 = vmatprep.mubr.f32.mxu1 %v4958_v35  ;;  %v3981_v19 = vpack.c.bf16 %v2896_v62, %v2895_v8  ;;  %v3985_v8 = vpack.c.bf16 %v2898_v38, %v2897_v61  ;;  %v2966_v6 = vld [vmem:[%s5738_s5 + $0x388] sm:$0xff]  ;;  %v2971_v61 = vld [vmem:[%s5738_s5 + $0x3b0] sm:$0xff]  ;;  %v2972_v38 = vld [vmem:[%s5738_s5 + $0x3b8] sm:$0xff] }
  0x74   : > { %3974 = vmatprep.subr.bf16.mxu1 %v3973_v10  ;;  %3648 = vmatmul.mubr.f32.gmra.mrb[8].mxu0 %v5315_v34  ;;  %v522_v24 = vmul.f32 %v520_v48, %v514_v27  ;;  %674 = vst [vmem:[#allocation2 + $0xd9] sm:$0xff] %v524_v2  ;;  %v5390_v62 = vsel %vm1130_vm1, %v1732_v47, %v1734_v43  ;;  %v2967_v48 = vld [vmem:[%s5738_s5 + $0x390] sm:$0xff] }
  0x75   : > { %3421 = vmatmul.mubr.f32.gmra.mrb[6].mxu1 %v4969_v41  ;;  %4108 = vmatpush3.bf16.msra.mxu0 %v4105_v45  ;;  %v1731_v45 = vrot.slane %v5130_v31, 2  ;;  %v4133_v43 = vpack.c.bf16 %v2972_v38, %v2971_v61 }
  0x76   : > { %3976 = vmatpush3.bf16.msra.mxu1 %v3973_v10  ;;  %3650 = vmatprep.mubr.f32.mxu0 %v5321_v58  ;;  %v2964_v10 = vld [vmem:[%s5738_s5 + $0x378] sm:$0xff]  ;;  %v525_v27 = vmul.f32 %v523_v16, %v522_v24 }
  0x77   : > { %4110 = vmatprep.subr.bf16.mxu0 %v4109_v12  ;;  %3423 = vmatprep.mubr.f32.mxu1 %v4982_v54  ;;  %v4117_v51 = vpack.c.bf16 %v2964_v10, %v2963_v33  ;;  %v5373_v46 = vsel %vm1130_vm1, %v1731_v45, %v1732_v47  ;;  %v2969_v47 = vld [vmem:[%s5738_s5 + $0x3a0] sm:$0xff]  ;;  %v2970_v33 = vld [vmem:[%s5738_s5 + $0x3a8] sm:$0xff]  ;;  %v2904_v10 = vld [vmem:[%s5738_s5 + $0x198] sm:$0xff] }
  0x78   : > { %3978 = vmatprep.subr.bf16.mxu1 %v3977_v1  ;;  %3651 = vmatmul.mubr.f32.gmra.mrb[10].mxu0 %v5342_v60  ;;  %675 = vst [vmem:[#allocation2 + $0xe1] sm:$0xff] %v525_v27  ;;  %v4129_v2 = vpack.c.bf16 %v2970_v33, %v2969_v47  ;;  %v2905_v27 = vld [vmem:[%s5738_s5 + $0x1a0] sm:$0xff] }
  0x79   : > { %3424 = vmatmul.mubr.f32.gmra.mrb[8].mxu1 %v4984_v56  ;;  %4112 = vmatpush3.bf16.msra.mxu0 %v4109_v12  ;;  %v2965_v12 = vld [vmem:[%s5738_s5 + $0x380] sm:$0xff] }
  0x7a   : > { %3980 = vmatpush3.bf16.msra.mxu1 %v3977_v1  ;;  %3653 = vmatprep.mubr.f32.mxu0 %v5348_v50  ;;  %v2899_v1 = vld [vmem:[%s5738_s5 + $0x170] sm:$0xff]  ;;  %v4121_v57 = vpack.c.bf16 %v2966_v6, %v2965_v12 }
  0x7b   : > { %4114 = vmatprep.subr.bf16.mxu0 %v4113_v29  ;;  %3426 = vmatprep.mubr.f32.mxu1 %v5021_v22  ;;  %v3989_v16 = vpack.c.bf16 %v2900_v39, %v2899_v1  ;;  %v2907_v12 = vld [vmem:[%s5738_s5 + $0x1b0] sm:$0xff]  ;;  %v2976_v39 = vld [vmem:[%s5738_s5 + $0x3d8] sm:$0xff] }
  0x7c   : > { %3982 = vmatprep.subr.bf16.mxu1 %v3981_v19  ;;  %3654 = vmatmul.mubr.f32.gmra.mrb[12].mxu0 %v5367_v53  ;;  %v5506_v38 = vld [vmem:[#allocation2 + $0xd8] sm:$0xff] }
  0x7d   : > { %3427 = vmatmul.mubr.f32.gmra.mrb[10].mxu1 %v5023_v23  ;;  %4116 = vmatpush3.bf16.msra.mxu0 %v4113_v29  ;;  %v2968_v29 = vld [vmem:[%s5738_s5 + $0x398] sm:$0xff] }
  0x7e   : > { %3984 = vmatpush3.bf16.msra.mxu1 %v3981_v19  ;;  %3656 = vmatprep.mubr.f32.mxu0 %v5373_v46  ;;  %v2901_v19 = vld [vmem:[%s5738_s5 + $0x180] sm:$0xff]  ;;  %v4125_v24 = vpack.c.bf16 %v2968_v29, %v2967_v48 }
  0x7f   : > { %4118 = vmatprep.subr.bf16.mxu0 %v4117_v51  ;;  %3429 = vmatprep.mubr.f32.mxu1 %v5058_v59  ;;  %v3993_v45 = vpack.c.bf16 %v2902_v11, %v2901_v19  ;;  %v2977_v19 = vld [vmem:[%s5738_s5 + $0x3e0] sm:$0xff]  ;;  %v2978_v11 = vld [vmem:[%s5738_s5 + $0x3e8] sm:$0xff] }
  0x80   : > { %3986 = vmatprep.subr.bf16.mxu1 %v3985_v8  ;;  %3657 = vmatmul.mubr.f32.gmra.mrb[14].mxu0 %v5390_v62  ;;  %v4145_v47 = vpack.c.bf16 %v2978_v11, %v2977_v19  ;;  %v2989_v11 = vld [vmem:[%s5738_s5 + $0x440] sm:$0xff] }
  0x81   : > { %3430 = vmatmul.mubr.f32.gmra.mrb[12].mxu1 %v5071_v20  ;;  %4120 = vmatpush3.bf16.msra.mxu0 %v4117_v51 }
  0x82   : > { %3988 = vmatpush3.bf16.msra.mxu1 %v3985_v8  ;;  %3691 = vmatprep.mubr.f32.mxu0 %v4897_v55  ;;  %v2903_v55 = vld [vmem:[%s5738_s5 + $0x190] sm:$0xff]  ;;  %v2974_v8 = vld [vmem:[%s5738_s5 + $0x3c8] sm:$0xff] }
  0x83   : > { %4122 = vmatprep.subr.bf16.mxu0 %v4121_v57  ;;  %3432 = vmatprep.mubr.f32.mxu1 %v5098_v26 }
  0x84   : > { %3990 = vmatprep.subr.bf16.mxu1 %v3989_v16  ;;  %3692 = vmatmul.mubr.f32.vlgmr.msra.gmra.mrb[0].mxu0 %v4900_v49  ;;  %v3997_v49 = vpack.c.bf16 %v2904_v10, %v2903_v55  ;;  %v2979_v55 = vld [vmem:[%s5738_s5 + $0x3f0] sm:$0xff]  ;;  %v2980_v10 = vld [vmem:[%s5738_s5 + $0x3f8] sm:$0xff] }
  0x85   : > { %3433 = vmatmul.mubr.f32.gmra.mrb[14].mxu1 %v5109_v25  ;;  %4124 = vmatpush3.bf16.msra.mxu0 %v4121_v57  ;;  %v2909_v57 = vld [vmem:[%s5738_s5 + $0x1c0] sm:$0xff]  ;;  %v4149_v61 = vpack.c.bf16 %v2980_v10, %v2979_v55  ;;  %v2995_v55 = vld [vmem:[%s5738_s5 + $0x470] sm:$0xff] }
  0x86   : > { %3992 = vmatpush3.bf16.msra.mxu1 %v3989_v16  ;;  %3694 = vmatprep.mubr.f32.mxu0 %v4958_v35  ;;  %v2910_v16 = vld [vmem:[%s5738_s5 + $0x1c8] sm:$0xff]  ;;  %v5754_v10 = vld [vmem:[#allocation5_spill] sm:$0xff] }
  0x87   : > { %4126 = vmatprep.subr.bf16.mxu0 %v4125_v24  ;;  %3467 = vmatprep.mubr.f32.mxu1 %v5166_v30  ;;  %v2906_v30 = vld [vmem:[%s5738_s5 + $0x1a8] sm:$0xff]  ;;  %v4009_v29 = vpack.c.bf16 %v2910_v16, %v2909_v57  ;;  %v4445_v16 = vld [vmem:[#allocation2 + $0x18] sm:$0xff] }
  0x88   : > { %3994 = vmatprep.subr.bf16.mxu1 %v3993_v45  ;;  %3695 = vmatmul.mubr.f32.gmra.mrb[2].mxu0 %v4969_v41  ;;  %v4001_v51 = vpack.c.bf16 %v2906_v30, %v2905_v27  ;;  %v2981_v30 = vld [vmem:[%s5738_s5 + $0x400] sm:$0xff]  ;;  %v2986_v57 = vld [vmem:[%s5738_s5 + $0x428] sm:$0xff] }
  0x89   : > { %3468 = vmatmul.mubr.f32.vlgmr.msra.gmra.mrb[0].mxu1 %v5169_v44  ;;  %4128 = vmatpush3.bf16.msra.mxu0 %v4125_v24  ;;  %v2973_v44 = vld [vmem:[%s5738_s5 + $0x3c0] sm:$0xff]  ;;  %v2911_v24 = vld [vmem:[%s5738_s5 + $0x1d0] sm:$0xff] }
  0x8a   : > { %3996 = vmatpush3.bf16.msra.mxu1 %v3993_v45  ;;  %3697 = vmatprep.mubr.f32.mxu0 %v4982_v54  ;;  %v4137_v6 = vpack.c.bf16 %v2974_v8, %v2973_v44  ;;  %v2912_v45 = vld [vmem:[%s5738_s5 + $0x1d8] sm:$0xff]  ;;  %v5522_v8 = vld [vmem:[#allocation2 + $0xe0] sm:$0xff] }
  0x8b   : > { %4130 = vmatprep.subr.bf16.mxu0 %v4129_v2  ;;  %3470 = vmatprep.mubr.f32.mxu1 %v5183_v42  ;;  %v2908_v42 = vld [vmem:[%s5738_s5 + $0x1b8] sm:$0xff]  ;;  %v4013_v33 = vpack.c.bf16 %v2912_v45, %v2911_v24  ;;  %v2990_v24 = vld [vmem:[%s5738_s5 + $0x448] sm:$0xff]  ;;  %v2991_v45 = vld [vmem:[%s5738_s5 + $0x450] sm:$0xff] }
  0x8c   : > { %3998 = vmatprep.subr.bf16.mxu1 %v3997_v49  ;;  %3698 = vmatmul.mubr.f32.gmra.mrb[4].mxu0 %v4984_v56  ;;  %v4005_v1 = vpack.c.bf16 %v2908_v42, %v2907_v12  ;;  %v2916_v44 = vld [vmem:[%s5738_s5 + $0x1f8] sm:$0xff] }
  0x8d   : > { %3471 = vmatmul.mubr.f32.gmra.mrb[2].mxu1 %v5199_v13  ;;  %4132 = vmatpush3.bf16.msra.mxu0 %v4129_v2  ;;  %v2975_v13 = vld [vmem:[%s5738_s5 + $0x3d0] sm:$0xff]  ;;  %v2913_v2 = vld [vmem:[%s5738_s5 + $0x1e0] sm:$0xff] }
  0x8e   : > { %4000 = vmatpush3.bf16.msra.mxu1 %v3997_v49  ;;  %3700 = vmatprep.mubr.f32.mxu0 %v5021_v22  ;;  %v4141_v48 = vpack.c.bf16 %v2976_v39, %v2975_v13  ;;  %v2914_v49 = vld [vmem:[%s5738_s5 + $0x1e8] sm:$0xff]  ;;  %v2985_v39 = vld [vmem:[%s5738_s5 + $0x420] sm:$0xff] }
  0x8f   : > { %4134 = vmatprep.subr.bf16.mxu0 %v4133_v43  ;;  %3473 = vmatprep.mubr.f32.mxu1 %v5207_v7  ;;  %v4017_v27 = vpack.c.bf16 %v2914_v49, %v2913_v2 }
  0x90   : > { %4002 = vmatprep.subr.bf16.mxu1 %v4001_v51  ;;  %3701 = vmatmul.mubr.f32.gmra.mrb[6].mxu0 %v5023_v23 }
  0x91   : > { %3474 = vmatmul.mubr.f32.gmra.mrb[4].mxu1 %v5232_v40  ;;  %4136 = vmatpush3.bf16.msra.mxu0 %v4133_v43  ;;  %v2982_v43 = vld [vmem:[%s5738_s5 + $0x408] sm:$0xff] }
  0x92   : > { %4004 = vmatpush3.bf16.msra.mxu1 %v4001_v51  ;;  %3703 = vmatprep.mubr.f32.mxu0 %v5058_v59  ;;  %v2915_v51 = vld [vmem:[%s5738_s5 + $0x1f0] sm:$0xff]  ;;  %v4153_v12 = vpack.c.bf16 %v2982_v43, %v2981_v30 }
  0x93   : > { %4138 = vmatprep.subr.bf16.mxu0 %v4137_v6  ;;  %3476 = vmatprep.mubr.f32.mxu1 %v5240_v28  ;;  %v4021_v42 = vpack.c.bf16 %v2916_v44, %v2915_v51 }
  0x94   : > { %4006 = vmatprep.subr.bf16.mxu1 %v4005_v1  ;;  %3704 = vmatmul.mubr.f32.gmra.mrb[8].mxu0 %v5071_v20 }
  0x95   : > { %3477 = vmatmul.mubr.f32.gmra.mrb[6].mxu1 %v5260_v36  ;;  %4140 = vmatpush3.bf16.msra.mxu0 %v4137_v6  ;;  %v2983_v6 = vld [vmem:[%s5738_s5 + $0x410] sm:$0xff] }
  0x96   : > { %4008 = vmatpush3.bf16.msra.mxu1 %v4005_v1  ;;  %3706 = vmatprep.mubr.f32.mxu0 %v5098_v26  ;;  %v2984_v1 = vld [vmem:[%s5738_s5 + $0x418] sm:$0xff] }
  0x97   : > { %4142 = vmatprep.subr.bf16.mxu0 %v4141_v48  ;;  %3479 = vmatprep.mubr.f32.mxu1 %v5266_v32  ;;  %v4157_v13 = vpack.c.bf16 %v2984_v1, %v2983_v6 }
  0x98   : > { %4010 = vmatprep.subr.bf16.mxu1 %v4009_v29  ;;  %3707 = vmatmul.mubr.f32.gmra.mrb[10].mxu0 %v5109_v25 }
  0x99   : > { %3480 = vmatmul.mubr.f32.gmra.mrb[8].mxu1 %v5289_v37  ;;  %4144 = vmatpush3.bf16.msra.mxu0 %v4141_v48  ;;  %v2987_v48 = vld [vmem:[%s5738_s5 + $0x430] sm:$0xff] }
  0x9a   : > { %4012 = vmatpush3.bf16.msra.mxu1 %v4009_v29  ;;  %3709 = vmatprep.mubr.f32.mxu0 %v5130_v31  ;;  %v2988_v29 = vld [vmem:[%s5738_s5 + $0x438] sm:$0xff] }
  0x9b   : > { %4146 = vmatprep.subr.bf16.mxu0 %v4145_v47  ;;  %3482 = vmatprep.mubr.f32.mxu1 %v5297_v4  ;;  %v4165_v19 = vpack.c.bf16 %v2988_v29, %v2987_v48 }
  0x9c   : > { %4014 = vmatprep.subr.bf16.mxu1 %v4013_v33  ;;  %3710 = vmatmul.mubr.f32.gmra.mrb[12].mxu0 %v5145_v5 }
  0x9d   : > { %3483 = vmatmul.mubr.f32.gmra.mrb[10].mxu1 %v5315_v34  ;;  %4148 = vmatpush3.bf16.msra.mxu0 %v4145_v47  ;;  %v2992_v47 = vld [vmem:[%s5738_s5 + $0x458] sm:$0xff] }
  0x9e   : > { %4016 = vmatpush3.bf16.msra.mxu1 %v4013_v33  ;;  %3712 = vmatprep.mubr.f32.mxu0 %v5506_v38  ;;  %v725_v33 = vld [vmem:[#allocation2 + $0xe8] sm:$0x3] }
  0x9f   : > { %4150 = vmatprep.subr.bf16.mxu0 %v4149_v61  ;;  %3485 = vmatprep.mubr.f32.mxu1 %v5321_v58  ;;  %v2100_v2 = vrot.slane %v725_v33, 1 }
  0xa0   : > { %4018 = vmatprep.subr.bf16.mxu1 %v4017_v27  ;;  %3713 = vmatmul.mubr.f32.gmra.mrb[14].mxu0 %v5522_v8 }
  0xa1   : > { %3486 = vmatmul.mubr.f32.gmra.mrb[12].mxu1 %v5342_v60  ;;  %4152 = vmatpush3.bf16.msra.mxu0 %v4149_v61  ;;  %v5755_v61 = vld [vmem:[#allocation6_spill] sm:$0xff] }
  0xa2   : > { %4020 = vmatpush3.bf16.msra.mxu1 %v4017_v27  ;;  %3747 = vmatprep.mubr.f32.mxu0 %v4925_v14  ;;  %v4161_v14 = vpack.c.bf16 %v2986_v57, %v2985_v39 }
  0xa3   : > { %4154 = vmatprep.subr.bf16.mxu0 %v4153_v12  ;;  %3488 = vmatprep.mubr.f32.mxu1 %v5348_v50 }
  0xa4   : > { %4022 = vmatprep.subr.bf16.mxu1 %v4021_v42  ;;  %3748 = vmatmul.mubr.f32.vlgmr.msra.gmra.mrb[0].mxu0 %v4942_v21  ;;  %v4446_v21 = vld [vmem:[#allocation2 + $0x20] sm:$0xff] }
  0xa5   : > { %3489 = vmatmul.mubr.f32.gmra.mrb[14].mxu1 %v5367_v53  ;;  %4156 = vmatpush3.bf16.msra.mxu0 %v4153_v12 }
  0xa6   : > { %4024 = vmatpush3.bf16.msra.mxu1 %v4021_v42  ;;  %3750 = vmatprep.mubr.f32.mxu0 %v4991_v63  ;;  %v4447_v63 = vld [vmem:[#allocation2 + $0x30] sm:$0xff] }
  0xa7   : > { %4158 = vmatprep.subr.bf16.mxu0 %v4157_v13  ;;  %3523 = vmatprep.mubr.f32.mxu1 %v4445_v16 }
  0xa8   : > { %3751 = vmatmul.mubr.f32.gmra.mrb[2].mxu0 %v4996_v0  ;;  %v4448_v0 = vld [vmem:[#allocation2 + $0x38] sm:$0xff] }
  0xa9   : > { %3524 = vmatmul.mubr.f32.vlgmr.msra.gmra.mrb[0].mxu1 %v4446_v21  ;;  %4160 = vmatpush3.bf16.msra.mxu0 %v4157_v13 }
  0xaa   : > { %3753 = vmatprep.mubr.f32.mxu0 %v5016_v15  ;;  %4162 = vmatprep.subr.bf16.mxu0 %v4161_v14  ;;  %v4169_v15 = vpack.c.bf16 %v2990_v24, %v2989_v11 }
  0xab   : > { %3526 = vmatprep.mubr.f32.mxu1 %v4447_v63 }
  0xac   : > { %3754 = vmatmul.mubr.f32.gmra.mrb[4].mxu0 %v5019_v18  ;;  %v2993_v18 = vld [vmem:[%s5738_s5 + $0x460] sm:$0xff] }
  0xad   : > { %3527 = vmatmul.mubr.f32.gmra.mrb[2].mxu1 %v4448_v0  ;;  %4164 = vmatpush3.bf16.msra.mxu0 %v4161_v14 }
  0xae   : > { %3756 = vmatprep.mubr.f32.mxu0 %v5043_v9  ;;  %4166 = vmatprep.subr.bf16.mxu0 %v4165_v19  ;;  %v2994_v9 = vld [vmem:[%s5738_s5 + $0x468] sm:$0xff] }
  0xaf   : > { %3529 = vmatprep.mubr.f32.mxu1 %v4958_v35  ;;  %v4173_v35 = vpack.c.bf16 %v2992_v47, %v2991_v45 }
  0xb0   : > { %3757 = vmatmul.mubr.f32.gmra.mrb[6].mxu0 %v5055_v52  ;;  %v2097_v52 = vrot.slane %v5506_v38, 1 }
  0xb1   : > { %3530 = vmatmul.mubr.f32.gmra.mrb[4].mxu1 %v4969_v41  ;;  %4168 = vmatpush3.bf16.msra.mxu0 %v4165_v19  ;;  %v5752_v41 = vld [vmem:[#allocation3_spill] sm:$0xff] }
  0xb2   : > { %3759 = vmatprep.mubr.f32.mxu0 %v5085_v3  ;;  %4170 = vmatprep.subr.bf16.mxu0 %v4169_v15  ;;  %v4177_v3 = vpack.c.bf16 %v2994_v9, %v2993_v18 }
  0xb3   : > { %3532 = vmatprep.mubr.f32.mxu1 %v4982_v54  ;;  %v2098_v54 = vrot.slane %v5522_v8, 1 }
  0xb4   : > { %3760 = vmatmul.mubr.f32.gmra.mrb[8].mxu0 %v5088_v17  ;;  %v5753_v17 = vld [vmem:[#allocation4_spill] sm:$0xff] }
  0xb5   : > { %3533 = vmatmul.mubr.f32.gmra.mrb[6].mxu1 %v4984_v56  ;;  %4172 = vmatpush3.bf16.msra.mxu0 %v4169_v15  ;;  %v2996_v56 = vld [vmem:[%s5738_s5 + $0x478] sm:$0xff]  ;;  %v2101_v27 = vsel %vm766_vm0, %v2098_v54, %v2100_v2 }
  0xb6   : > { %3762 = vmatprep.mubr.f32.mxu0 %v5752_v41  ;;  %4174 = vmatprep.subr.bf16.mxu0 %v4173_v35  ;;  %v4181_v49 = vpack.c.bf16 %v2996_v56, %v2995_v55 }
  0xb7   : > { %3535 = vmatprep.mubr.f32.mxu1 %v5021_v22  ;;  %v2099_v22 = vsel %vm766_vm0, %v2097_v52, %v2098_v54 }
  0xb8   : > { %3763 = vmatmul.mubr.f32.gmra.mrb[10].mxu0 %v5753_v17 }
  0xb9   : > { %3536 = vmatmul.mubr.f32.gmra.mrb[8].mxu1 %v5023_v23  ;;  %4176 = vmatpush3.bf16.msra.mxu0 %v4173_v35  ;;  %v2283_v23 = vrot.slane %v5522_v8, 2 }
  0xba   : > { %3765 = vmatprep.mubr.f32.mxu0 %v5754_v10  ;;  %4178 = vmatprep.subr.bf16.mxu0 %v4177_v3 }
  0xbb   : > { %3538 = vmatprep.mubr.f32.mxu1 %v5058_v59  ;;  %v2285_v59 = vrot.slane %v725_v33, 2 }
  0xbc   : > { %3766 = vmatmul.mubr.f32.gmra.mrb[12].mxu0 %v5755_v61 }
  0xbd   : > { %3539 = vmatmul.mubr.f32.gmra.mrb[10].mxu1 %v5071_v20  ;;  %4180 = vmatpush3.bf16.msra.mxu0 %v4177_v3 }
  0xbe   : > { %3768 = vmatprep.mubr.f32.mxu0 %v2099_v22  ;;  %4182 = vmatprep.subr.bf16.mxu0 %v4181_v49 }
  0xbf   : > { %3541 = vmatprep.mubr.f32.mxu1 %v5098_v26  ;;  %v2286_v26 = vsel %vm1130_vm1, %v2283_v23, %v2285_v59 }
  0xc0   : > { %3769 = vmatmul.mubr.f32.gmra.mrb[14].mxu0 %v2101_v27 }
  0xc1   : > { %3542 = vmatmul.mubr.f32.gmra.mrb[12].mxu1 %v5109_v25  ;;  %4184 = vmatpush3.bf16.msra.mxu0 %v4181_v49  ;;  %v4490_v25 = vmov 0.0|0.0  }
  0xc2   : > { %3803 = vmatprep.mubr.f32.mxu0 %v5207_v7  ;;  %3544 = vmatprep.mubr.f32.mxu1 %v5130_v31  ;;  %v2282_v7 = vrot.slane %v5506_v38, 2 }
  0xc3   : > { %4185 = vmatprep.subr.bf16.mxu1 %v4490_v25 }
  0xc4   : > { %3804 = vmatmul.mubr.f32.vlgmr.msra.gmra.mrb[0].mxu0 %v5232_v40  ;;  %v2284_v20 = vsel %vm1130_vm1, %v2282_v7, %v2283_v23 }
  0xc5   : > { %3545 = vmatmul.mubr.f32.gmra.mrb[14].mxu1 %v5145_v5  ;;  %3806 = vmatprep.mubr.f32.mxu0 %v5240_v28 }
  0xc8   : > { %3807 = vmatmul.mubr.f32.gmra.mrb[2].mxu0 %v5260_v36 }
  0xc9   : > { %3809 = vmatprep.mubr.f32.mxu0 %v5266_v32 }
  0xcc   : > { %3810 = vmatmul.mubr.f32.gmra.mrb[4].mxu0 %v5289_v37 }
  0xcd   : > { %3812 = vmatprep.mubr.f32.mxu0 %v5297_v4 }
  0xd0   : > { %3813 = vmatmul.mubr.f32.gmra.mrb[6].mxu0 %v5315_v34 }
  0xd1   : > { %3815 = vmatprep.mubr.f32.mxu0 %v5321_v58 }
  0xd4   : > { %3816 = vmatmul.mubr.f32.gmra.mrb[8].mxu0 %v5342_v60 }
  0xd5   : > { %3818 = vmatprep.mubr.f32.mxu0 %v5348_v50  ;;  %v5756_v50 = vmov 0.0  }
  0xd6   : > { %3859 = vmatprep.mubr.msk.f32.mxu1 %vm4491_vm2, %v5756_v50 }
  0xd8   : > { %3819 = vmatmul.mubr.f32.gmra.mrb[10].mxu0 %v5367_v53 }
  0xd9   : > { %3821 = vmatprep.mubr.f32.mxu0 %v5373_v46 }
  0xdc   : > { %3822 = vmatmul.mubr.f32.gmra.mrb[12].mxu0 %v5390_v62 }
  0xdd   : > { %3824 = vmatprep.mubr.f32.mxu0 %v2284_v20 }
  0xe0   : > { %3825 = vmatmul.mubr.f32.gmra.mrb[14].mxu0 %v2286_v26 }
 0x17c   : > { %v3525_v31 = vpop.f32.mrb[0].mxu1 }
 0x17d   : > { %v1448_v5 = vpop.f32.mrb[1].mxu1 }
 0x180   : > { %v3528_v40 = vpop.f32.mrb[2].mxu1 }
 0x181   : > { %v1458_v28 = vpop.f32.mrb[3].mxu1 }
 0x184   : > { %v3531_v36 = vpop.f32.mrb[4].mxu1 }
 0x185   : > { %v1468_v32 = vpop.f32.mrb[5].mxu1 }
 0x188   : > { %v3534_v37 = vpop.f32.mrb[6].mxu1 }
 0x189   : > { %v1478_v4 = vpop.f32.mrb[7].mxu1 }
 0x18c   : > { %v3537_v34 = vpop.f32.mrb[8].mxu1 }
 0x18d   : > { %v1488_v58 = vpop.f32.mrb[9].mxu1 }
 0x190   : > { %v5623_v60 = vpop.f32.mrb[10].mxu1 }
 0x191   : > { %v5625_v53 = vpop.f32.mrb[11].mxu1 }
 0x194   : > { %v5627_v46 = vpop.f32.mrb[12].mxu1 }
 0x195   : > { %v5629_v62 = vpop.f32.mrb[13].mxu1 }
 0x197   : > { %v3805_v38 = vpop.f32.mrb[0].mxu0 }
 0x198   : > { %v5638_v30 = vpop.f32.mrb[14].mxu1  ;;  %v4233_v43 = vadd.f32 %v3805_v38, %v3525_v31  ;;  %v2372_v51 = vpop.f32.mrb[1].mxu0 }
 0x199   : > { %v5640_v44 = vpop.f32.mrb[15].mxu1  ;;  %v4234_v8 = vadd.f32 %v2372_v51, %v1448_v5 }
 0x19a   : > { %2468 = vst [vmem:[%s5636_s16 + $0x8] sm:$0xff] %v4233_v43  ;;  %v5643_v12 = vmul.f32 %v4233_v43, %v4233_v43 }
 0x19b   : > { %2467 = vst [vmem:[%s5636_s16] sm:$0xff] %v4234_v8  ;;  %v4186_v42 = vpack.c.bf16 %v4233_v43, %v4234_v8  ;;  %v5646_v6 = vmul.f32 %v4234_v8, %v4234_v8  ;;  %v3808_v1 = vpop.f32.mrb[2].mxu0 }
 0x19c   : > { %v4235_v13 = vadd.f32 %v3808_v1, %v3528_v40  ;;  %v2382_v39 = vpop.f32.mrb[3].mxu0 }
 0x19d   : > { %v4210_v57 = vpack.c.bf16 %v5643_v12, %v5646_v6  ;;  %v4236_v14 = vadd.f32 %v2382_v39, %v1458_v28  ;;  %4187 = vmatpush3.bf16.msra.mxu1 %v4186_v42  ;;  %v4492_v42 = vmov 1.0  }
 0x19e   : > { %2470 = vst [vmem:[%s5636_s16 + $0x18] sm:$0xff] %v4235_v13  ;;  %v5651_v16 = vmul.f32 %v4235_v13, %v4235_v13  ;;  %4188 = vmatprep.subr.bf16.mxu1 %v4490_v25 }
 0x19f   : > { %2469 = vst [vmem:[%s5636_s16 + $0x10] sm:$0xff] %v4236_v14  ;;  %v4189_v48 = vpack.c.bf16 %v4235_v13, %v4236_v14  ;;  %v5655_v29 = vmul.f32 %v4236_v14, %v4236_v14  ;;  %v3811_v21 = vpop.f32.mrb[4].mxu0 }
 0x1a0   : > { %v4237_v63 = vadd.f32 %v3811_v21, %v3531_v36  ;;  %v2392_v19 = vpop.f32.mrb[5].mxu0 }
 0x1a1   : > { %v4213_v11 = vpack.c.bf16 %v5651_v16, %v5655_v29  ;;  %v4238_v24 = vadd.f32 %v2392_v19, %v1468_v32  ;;  %4190 = vmatpush3.bf16.msra.mxu1 %v4189_v48 }
 0x1a2   : > { %2472 = vst [vmem:[%s5636_s16 + $0x28] sm:$0xff] %v4237_v63  ;;  %v5660_v0 = vmul.f32 %v4237_v63, %v4237_v63  ;;  %4191 = vmatprep.subr.bf16.mxu1 %v4490_v25 }
 0x1a3   : > { %2471 = vst [vmem:[%s5636_s16 + $0x20] sm:$0xff] %v4238_v24  ;;  %v4192_v15 = vpack.c.bf16 %v4237_v63, %v4238_v24  ;;  %v5664_v45 = vmul.f32 %v4238_v24, %v4238_v24  ;;  %v3814_v47 = vpop.f32.mrb[6].mxu0 }
 0x1a4   : > { %v4239_v35 = vadd.f32 %v3814_v47, %v3534_v37  ;;  %v2402_v18 = vpop.f32.mrb[7].mxu0 }
 0x1a5   : > { %v4216_v9 = vpack.c.bf16 %v5660_v0, %v5664_v45  ;;  %v4240_v41 = vadd.f32 %v2402_v18, %v1478_v4  ;;  %4193 = vmatpush3.bf16.msra.mxu1 %v4192_v15 }
 0x1a6   : > { %2474 = vst [vmem:[%s5636_s16 + $0x38] sm:$0xff] %v4239_v35  ;;  %v5669_v52 = vmul.f32 %v4239_v35, %v4239_v35  ;;  %4194 = vmatprep.subr.bf16.mxu1 %v4490_v25 }
 0x1a7   : > { %2473 = vst [vmem:[%s5636_s16 + $0x30] sm:$0xff] %v4240_v41  ;;  %v4195_v54 = vpack.c.bf16 %v4239_v35, %v4240_v41  ;;  %v2560_v3 = vmul.f32 %v4240_v41, %v4240_v41  ;;  %v3817_v33 = vpop.f32.mrb[8].mxu0 }
 0x1a8   : > { %v4241_v55 = vadd.f32 %v3817_v33, %v3537_v34  ;;  %v2412_v56 = vpop.f32.mrb[9].mxu0 }
 0x1a9   : > { %v4219_v17 = vpack.c.bf16 %v5669_v52, %v2560_v3  ;;  %v4242_v10 = vadd.f32 %v2412_v56, %v1488_v58  ;;  %4196 = vmatpush3.bf16.msra.mxu1 %v4195_v54 }
 0x1aa   : > { %2476 = vst [vmem:[%s5636_s16 + $0x48] sm:$0xff] %v4241_v55  ;;  %v2563_v2 = vmul.f32 %v4241_v55, %v4241_v55  ;;  %4197 = vmatprep.subr.bf16.mxu1 %v4490_v25 }
 0x1ab   : > { %2475 = vst [vmem:[%s5636_s16 + $0x40] sm:$0xff] %v4242_v10  ;;  %v4198_v22 = vpack.c.bf16 %v4241_v55, %v4242_v10  ;;  %v2562_v49 = vmul.f32 %v4242_v10, %v4242_v10  ;;  %v3820_v61 = vpop.f32.mrb[10].mxu0 }
 0x1ac   : > { %v4243_v27 = vadd.f32 %v3820_v61, %v5623_v60  ;;  %v2422_v7 = vpop.f32.mrb[11].mxu0 }
 0x1ad   : > { %v4222_v23 = vpack.c.bf16 %v2563_v2, %v2562_v49  ;;  %v4244_v59 = vadd.f32 %v2422_v7, %v5625_v53  ;;  %4199 = vmatpush3.bf16.msra.mxu1 %v4198_v22 }
 0x1ae   : > { %2478 = vst [vmem:[%s5636_s16 + $0x58] sm:$0xff] %v4243_v27  ;;  %v2565_v20 = vmul.f32 %v4243_v27, %v4243_v27  ;;  %4200 = vmatprep.subr.bf16.mxu1 %v4490_v25 }
 0x1af   : > { %2477 = vst [vmem:[%s5636_s16 + $0x50] sm:$0xff] %v4244_v59  ;;  %v4201_v26 = vpack.c.bf16 %v4243_v27, %v4244_v59  ;;  %v2564_v31 = vmul.f32 %v4244_v59, %v4244_v59  ;;  %v3823_v5 = vpop.f32.mrb[12].mxu0 }
 0x1b0   : > { %v4245_v40 = vadd.f32 %v3823_v5, %v5627_v46  ;;  %v2432_v28 = vpop.f32.mrb[13].mxu0 }
 0x1b1   : > { %v4225_v36 = vpack.c.bf16 %v2565_v20, %v2564_v31  ;;  %v4246_v32 = vadd.f32 %v2432_v28, %v5629_v62  ;;  %4202 = vmatpush3.bf16.msra.mxu1 %v4201_v26 }
 0x1b2   : > { %2480 = vst [vmem:[%s5636_s16 + $0x68] sm:$0xff] %v4245_v40  ;;  %v2567_v37 = vmul.f32 %v4245_v40, %v4245_v40  ;;  %4203 = vmatprep.subr.bf16.mxu1 %v4490_v25 }
 0x1b3   : > { %2479 = vst [vmem:[%s5636_s16 + $0x60] sm:$0xff] %v4246_v32  ;;  %v4204_v4 = vpack.c.bf16 %v4245_v40, %v4246_v32  ;;  %v2566_v34 = vmul.f32 %v4246_v32, %v4246_v32  ;;  %v3826_v58 = vpop.f32.mrb[14].mxu0 }
 0x1b4   : > { %v4247_v60 = vadd.f32 %v3826_v58, %v5638_v30  ;;  %v2442_v53 = vpop.f32.mrb[15].mxu0 }
 0x1b5   : > { %v4228_v38 = vpack.c.bf16 %v2567_v37, %v2566_v34  ;;  %v4248_v46 = vadd.f32 %v2442_v53, %v5640_v44  ;;  %4205 = vmatpush3.bf16.msra.mxu1 %v4204_v4 }
 0x1b6   : > { %2482 = vst [vmem:[%s5636_s16 + $0x78] sm:$0xff] %v4247_v60  ;;  %v2569_v43 = vmul.f32 %v4247_v60, %v4247_v60  ;;  %4206 = vmatprep.subr.bf16.mxu1 %v4490_v25 }
 0x1b7   : > { %2481 = vst [vmem:[%s5636_s16 + $0x70] sm:$0xff] %v4248_v46  ;;  %v4207_v62 = vpack.c.bf16 %v4247_v60, %v4248_v46  ;;  %v2568_v51 = vmul.f32 %v4248_v46, %v4248_v46 }
 0x1b9   : > { %v4231_v8 = vpack.c.bf16 %v2569_v43, %v2568_v51  ;;  %4208 = vmatpush3.bf16.msra.mxu1 %v4207_v62 }
 0x1ba   : > { %4209 = vmatprep.subr.bf16.mxu1 %v4490_v25 }
 0x1bc   : > { %3860 = vmatmul.mubr.f32.vlgmr.msra.gmra.mrb[16].mxu1 %v4492_v42 }
 0x1bd   : > { %4211 = vmatpush3.bf16.msra.mxu1 %v4210_v57  ;;  %3894 = vmatprep.mubr.msk.f32.mxu1 %vm4491_vm2, %v5756_v50 }
 0x1be   : > { %4212 = vmatprep.subr.bf16.mxu1 %v4490_v25 }
 0x1c1   : > { %4214 = vmatpush3.bf16.msra.mxu1 %v4213_v11 }
 0x1c2   : > { %4215 = vmatprep.subr.bf16.mxu1 %v4490_v25 }
 0x1c5   : > { %4217 = vmatpush3.bf16.msra.mxu1 %v4216_v9 }
 0x1c6   : > { %4218 = vmatprep.subr.bf16.mxu1 %v4490_v25 }
 0x1c9   : > { %4220 = vmatpush3.bf16.msra.mxu1 %v4219_v17 }
 0x1ca   : > { %4221 = vmatprep.subr.bf16.mxu1 %v4490_v25 }
 0x1cd   : > { %4223 = vmatpush3.bf16.msra.mxu1 %v4222_v23 }
 0x1ce   : > { %4224 = vmatprep.subr.bf16.mxu1 %v4490_v25 }
 0x1d1   : > { %4226 = vmatpush3.bf16.msra.mxu1 %v4225_v36 }
 0x1d2   : > { %4227 = vmatprep.subr.bf16.mxu1 %v4490_v25 }
 0x1d5   : > { %4229 = vmatpush3.bf16.msra.mxu1 %v4228_v38 }
 0x1d6   : > { %4230 = vmatprep.subr.bf16.mxu1 %v4490_v25 }
 0x1d9   : > { %4232 = vmatpush3.bf16.msra.mxu1 %v4231_v8 }
 0x1dc   : > { %3895 = vmatmul.mubr.f32.vlgmr.msra.gmra.mrb[18].mxu1 %v4492_v42 }
 0x28f   : > { %v2549_v50 = vpop.f32.mrb[16].mxu1 }
 0x290   : > { %2553 = vst [vmem:[%s467_s19] sm:$0x1] %v2549_v50  ;;  %v3861_v30 = vpop.f32.mrb[17].mxu1 }
 0x2af   : > { %v2636_v44 = vpop.f32.mrb[18].mxu1 }
 0x2b0   : > { %2640 = vst [vmem:[%s467_s19 + $0x1] sm:$0x1] %v2636_v44  ;;  %v3896_v12 = vpop.f32.mrb[19].mxu1 }
 0x2b1 PF: > { %s18_s28 = sadd.s32 1, %s4487_s28   ;;  %s5757_s24 = smov %s4479_s26 }
 0x2b2   : > { %p15_p12 = scmp.ge.s32.totalorder %s18_s28, 6   ;;  %s5758_s25 = smov %s4483_s27 }
 0x2b3   : > { %s5759_s26 = smov %s5762_s29  ;;  %s5760_s27 = smov %s5766_s30 }
 0x2b4   :  { %17 = sbr.rel (!%p15_p12) target bundleno = 3 (0x3), region = 102 }

</bundles_post_ra>
